<compile_context>
chip_gen: v7x
topology: tpu7x:2x2x1
jax: 0.10.0
libtpu: 0.0.40
codegen_flags: <defaults>
</compile_context>

<pallas_src>
import jax
import jax.numpy as jnp
from jax.experimental import pallas as pl
from jax.experimental.pallas import tpu as pltpu

KSIZE = 4
NEG_SLOPE = 0.2
IN_EPS = 1e-5
LANE = 128
SUBLANE = 8
# Conservative per-call VMEM budget: fits under v5e's 16 MiB default scoped
# VMEM (and far under v6e 32 MiB / v7x 64 MiB-per-TC), no vmem_limit override.
VMEM_BUDGET = 12 * 1024 * 1024


def _round_up(x, m):
    return -(-x // m) * m


# ---------------------------------------------------------------------------
# Pallas kernels
# ---------------------------------------------------------------------------
def _mm_bias_act_kernel(apply_act):
    """K-tiled GEMM: (tm,tk)bf16 @ (tk,Cp)bf16 accumulated in f32 scratch;
    on the last K step add bias, optional LeakyReLU, store as o_ref.dtype."""
    def kernel(a_ref, b_ref, bias_ref, o_ref, acc_ref):
        @pl.when(pl.program_id(1) == 0)
        def _():
            acc_ref[...] = jnp.zeros_like(acc_ref)

        acc_ref[...] += jnp.dot(a_ref[...], b_ref[...],
                                preferred_element_type=jnp.float32)

        @pl.when(pl.program_id(1) == pl.num_programs(1) - 1)
        def _():
            acc = acc_ref[...] + bias_ref[...]
            if apply_act:
                acc = jnp.where(acc >= 0, acc, NEG_SLOPE * acc)
            o_ref[...] = acc.astype(o_ref.dtype)
    return kernel


def _instnorm_lrelu_kernel(x_ref, o_ref):
    """Per-sample InstanceNorm2d (affine=False, eps=1e-5) + LeakyReLU(0.2).

    Block is (1, H*W, tc) bf16; stats computed in f32 with a centered
    two-pass variance (safer than E[x^2]-E[x]^2 on bf16 inputs).
    """
    x = x_ref[0].astype(jnp.float32)                   # (HW, tc)
    inv_hw = 1.0 / x.shape[0]
    mean = jnp.sum(x, axis=0, keepdims=True) * inv_hw  # (1, tc)
    xc = x - mean
    var = jnp.sum(xc * xc, axis=0, keepdims=True) * inv_hw
    y = xc * jax.lax.rsqrt(var + IN_EPS)               # rsqrt -> EUP
    o_ref[0] = jnp.where(y >= 0, y, NEG_SLOPE * y).astype(o_ref.dtype)


# ---------------------------------------------------------------------------
# Pallas wrappers
# ---------------------------------------------------------------------------
def _pick_tiles(M, K, Cp, out_itemsize):
    """Pick (tm, tk). K is always a multiple of 128 by construction."""
    tk = 512 if K % 512 == 0 else 128
    m_cap = max(_round_up(M, SUBLANE), SUBLANE)
    tm = min(128, m_cap)
    for cand in (1024, 512, 256, 128):
        t = min(cand, m_cap)
        vmem = (2 * t * tk * 2            # A tile, bf16, double-buffered
                + 2 * tk * Cp * 2         # B tile, bf16, double-buffered
                + 2 * t * Cp * out_itemsize  # out tile, double-buffered
                + t * Cp * 4              # f32 accumulator scratch
                + 2 * Cp * 4)             # bias
        if vmem <= VMEM_BUDGET:
            tm = t
            break
    return tm, tk


def conv_gemm(cols, w_mat_p, bias_p, cout, apply_act, out_dtype=jnp.bfloat16):
    """cols: (M, K) bf16; w_mat_p: (K, Cp) bf16 (Cout zero-padded to Cp);
    bias_p: (1, Cp) f32.  Returns (M, cout) of out_dtype."""
    M, K = cols.shape
    Kw, Cp = w_mat_p.shape
    assert K == Kw, (K, Kw)
    out_itemsize = jnp.dtype(out_dtype).itemsize
    tm, tk = _pick_tiles(M, K, Cp, out_itemsize)
    grid = (pl.cdiv(M, tm), K // tk)

    cost = pl.CostEstimate(
        flops=2 * M * K * cout,            # true cout, not padded Cp
        transcendentals=0,
        bytes_accessed=M * K * 2 + K * Cp * 2 + Cp * 4 + M * Cp * out_itemsize,
    )

    out = pl.pallas_call(
        _mm_bias_act_kernel(apply_act),
        out_shape=jax.ShapeDtypeStruct((M, Cp), out_dtype),
        grid=grid,
        in_specs=[
            pl.BlockSpec((tm, tk), lambda i, k: (i, k)),
            pl.BlockSpec((tk, Cp), lambda i, k: (k, 0)),
            pl.BlockSpec((1, Cp), lambda i, k: (0, 0)),
        ],
        out_specs=pl.BlockSpec((tm, Cp), lambda i, k: (i, 0)),
        scratch_shapes=[pltpu.VMEM((tm, Cp), jnp.float32)],
        compiler_params=pltpu.CompilerParams(
            dimension_semantics=("parallel", "arbitrary")),
        cost_estimate=cost,
    )(cols, w_mat_p, bias_p)
    if Cp != cout:
        out = out[:, :cout]
    return out


def instnorm_lrelu(x_nhwc):
    N, H, W, C = x_nhwc.shape
    HW = H * W
    tc = LANE if C % LANE == 0 else C                  # channel tiling
    xr = x_nhwc.reshape(N, HW, C)
    out = pl.pallas_call(
        _instnorm_lrelu_kernel,
        out_shape=jax.ShapeDtypeStruct((N, HW, C), x_nhwc.dtype),
        grid=(N, C // tc),
        in_specs=[pl.BlockSpec((1, HW, tc), lambda n, c: (n, 0, c))],
        out_specs=pl.BlockSpec((1, HW, tc), lambda n, c: (n, 0, c)),
        compiler_params=pltpu.CompilerParams(
            dimension_semantics=("parallel", "parallel")),
    )(xr)
    return out.reshape(N, H, W, C)


# ---------------------------------------------------------------------------
# Plain-JAX glue: im2col, parameter init/prep, forward
# ---------------------------------------------------------------------------
def im2col(x_nhwc, k, stride, pad):
    """Returns bf16 cols (N*Ho*Wo, k*k*Cp) in (kh, kw, c) order, (N, Ho, Wo).

    Channel dim is zero-padded to a multiple of 8 so K = k*k*Cp is a multiple
    of 128 for every layer (weights are padded to match in prepare_params).
    """
    N, H, W, C = x_nhwc.shape
    c_pad = _round_up(C, SUBLANE) - C
    xp = jnp.pad(x_nhwc.astype(jnp.bfloat16),
                 ((0, 0), (pad, pad), (pad, pad), (0, c_pad)))
    _, Hp, Wp, Cpad = xp.shape
    Ho = (Hp - k) // stride + 1
    Wo = (Wp - k) // stride + 1
    patches = []
    for di in range(k):
        for dj in range(k):
            patches.append(
                xp[:, di:di + (Ho - 1) * stride + 1:stride,
                      dj:dj + (Wo - 1) * stride + 1:stride, :])
    cols = jnp.concatenate(patches, axis=-1)           # (N, Ho, Wo, k*k*Cpad)
    return cols.reshape(N * Ho * Wo, k * k * Cpad), (N, Ho, Wo)


def spectral_sigma(w, iters=30):
    wm = w.reshape(w.shape[0], -1)
    v = jnp.ones((wm.shape[1],), jnp.float32) / jnp.sqrt(wm.shape[1])
    u = wm @ v
    for _ in range(iters):
        u = wm @ v
        u = u / (jnp.linalg.norm(u) + 1e-12)
        v = wm.T @ u
        v = v / (jnp.linalg.norm(v) + 1e-12)
    return jnp.dot(u, wm @ v)


def init_params(key, inc=6, base=64, nlayers=4):
    cfgs = [(inc, base, True)]
    nf = base
    for i in range(1, nlayers):
        mult = min(2 ** i, 8)
        cfgs.append((nf, base * mult, False))
        nf = base * mult
    cfgs.append((nf, 1, True))

    params = []
    for cin, cout, has_bias in cfgs:
        key, kw, kb = jax.random.split(key, 3)
        fan_in = cin * KSIZE * KSIZE
        bound = 1.0 / (fan_in ** 0.5)                  # PyTorch conv default init
        w = jax.random.uniform(kw, (cout, cin, KSIZE, KSIZE),
                               minval=-bound, maxval=bound, dtype=jnp.float32)
        w = w / spectral_sigma(w)                      # spectral_norm
        if has_bias:
            b = jax.random.uniform(kb, (cout,), minval=-bound, maxval=bound,
                                   dtype=jnp.float32)
        else:
            b = jnp.zeros((cout,), jnp.float32)
        params.append((w, b))
    return params


def prepare_params(params):
    """Hoisted (one-time) weight prep: Cin pad to x8, GEMM layout, Cout lane
    pad, bf16 cast."""
    prepared = []
    for w, b in params:
        cout, cin, kh, kw = w.shape
        cin_p = _round_up(cin, SUBLANE)
        Cp = _round_up(cout, LANE)
        K = kh * kw * cin_p
        w_p = jnp.pad(w, ((0, Cp - cout), (0, cin_p - cin), (0, 0), (0, 0)))
        # (Coutp, Cinp, kh, kw) -> (kh, kw, Cinp, Coutp) -> (K, Cp); matches
        # the (kh, kw, c) order produced by im2col.
        w_mat_p = jnp.transpose(w_p, (2, 3, 1, 0)).reshape(K, Cp)
        w_mat_p = w_mat_p.astype(jnp.bfloat16)
        bias_p = jnp.pad(b.astype(jnp.float32), (0, Cp - cout)).reshape(1, Cp)
        prepared.append((w_mat_p, bias_p, cout, K))
    return prepared


def patchd_forward(x_nchw, prepared, nlayers=4):
    x = jnp.transpose(x_nchw, (0, 2, 3, 1)).astype(jnp.float32)   # NCHW -> NHWC
    n_total = len(prepared)                                       # nlayers + 1
    for li, (w_mat_p, bias_p, cout, _K) in enumerate(prepared):
        stride = 2 if li < nlayers else 1
        cols, (N, Ho, Wo) = im2col(x, KSIZE, stride, 1)
        is_first = li == 0
        is_last = li == n_total - 1
        out_dtype = jnp.float32 if is_last else jnp.bfloat16
        y = conv_gemm(cols, w_mat_p, bias_p, cout, apply_act=is_first,
                      out_dtype=out_dtype)
        y = y.reshape(N, Ho, Wo, cout)
        if (not is_first) and (not is_last):
            y = instnorm_lrelu(y)
        x = y
    return jnp.transpose(x, (0, 3, 1, 2))                         # back to NCHW


def reference_forward(x_nchw, params, nlayers=4):
    """Pure-JAX f32 reference (lax.conv) used only as a sanity check."""
    x = x_nchw.astype(jnp.float32)
    n_total = len(params)
    for li, (w, b) in enumerate(params):
        stride = 2 if li < nlayers else 1
        y = jax.lax.conv_general_dilated(
            x, w, (stride, stride), ((1, 1), (1, 1)),
            dimension_numbers=("NCHW", "OIHW", "NCHW"))
        y = y + b.reshape(1, -1, 1, 1)
        is_first = li == 0
        is_last = li == n_total - 1
        if not is_last:
            if not is_first:
                mean = jnp.mean(y, axis=(2, 3), keepdims=True)
                var = jnp.mean((y - mean) ** 2, axis=(2, 3), keepdims=True)
                y = (y - mean) / jnp.sqrt(var + IN_EPS)
            y = jnp.where(y >= 0, y, NEG_SLOPE * y)
        x = y
    return x


if __name__ == "__main__":
    key = jax.random.PRNGKey(0)
    kx, kp = jax.random.split(key)

    # Small but architecture-consistent input: 6-channel NCHW, 32x32 spatial
    # (4 stride-2 convs + final stride-1 conv -> (2, 1, 1, 1) output).
    x = jax.random.normal(kx, (2, 6, 32, 32), dtype=jnp.float32)
    params = init_params(kp, inc=6, base=64, nlayers=4)
    prepared = prepare_params(params)

    forward = jax.jit(lambda inp: patchd_forward(inp, prepared, nlayers=4))
    out = jax.block_until_ready(forward(x))

    ref = jax.block_until_ready(reference_forward(x, params, nlayers=4))
    assert out.shape == ref.shape == (2, 1, 1, 1), (out.shape, ref.shape)
    max_err = float(jnp.max(jnp.abs(out - ref)))
    # bf16 GEMM inputs/activations with f32 accumulation vs. pure-f32 reference.
    assert max_err < 7.5e-2, f"mismatch vs reference: {max_err}"

    print("KERNEL_OK")
</pallas_src>

<mosaic_0001>
module attributes {stable_mosaic.version = 11 : i64} {
  func.func @kernel(%arg0: i32, %arg1: i32, %arg2: memref<512x128xbf16, #tpu.memory_space<vmem>>, %arg3: memref<128x128xbf16, #tpu.memory_space<vmem>>, %arg4: memref<1x128xf32, #tpu.memory_space<vmem>>, %arg5: memref<512x128xbf16, #tpu.memory_space<vmem>>, %arg6: memref<512x128xf32, #tpu.memory_space<vmem>>) attributes {dimension_semantics = [#tpu.dimension_semantics<parallel>, #tpu.dimension_semantics<arbitrary>], iteration_bounds = array<i64: 1, 1>, scalar_prefetch = 0 : i64, scratch_operands = 1 : i64, tpu.core_type = #tpu.core_type<tc>, window_params = [{transform_indices = @transform_0, window_bounds = array<i64: 512, 128>}, {transform_indices = @transform_1, window_bounds = array<i64: 128, 128>}, {pipeline_mode = #tpu.pipeline_mode<synchronous>, transform_indices = @transform_2, window_bounds = array<i64: 1, 128>}, {transform_indices = @transform_3, window_bounds = array<i64: 512, 128>}]} {
    %c0_i32 = arith.constant 0 : i32
    %0 = arith.cmpi eq, %arg1, %c0_i32 : i32
    %1 = arith.extui %0 : i1 to i32
    %c0_i32_0 = arith.constant 0 : i32
    %2 = arith.cmpi ne, %1, %c0_i32_0 : i32
    scf.if %2 {
      %cst_10 = arith.constant 0.000000e+00 : f32
      %12 = vector.broadcast %cst_10 : f32 to vector<512x128xf32>
      %c0_11 = arith.constant 0 : index
      %c0_12 = arith.constant 0 : index
      %13 = vector.load %arg6[%c0_11, %c0_12] : memref<512x128xf32, #tpu.memory_space<vmem>>, vector<512x128xf32>
      tpu.vector_store %arg6[%c0_11, %c0_12], %12 {strides = array<i32>} : memref<512x128xf32, #tpu.memory_space<vmem>>, vector<512x128xf32>,
    } else {
    }
    %c0 = arith.constant 0 : index
    %c0_1 = arith.constant 0 : index
    %3 = vector.load %arg6[%c0, %c0_1] : memref<512x128xf32, #tpu.memory_space<vmem>>, vector<512x128xf32>
    %c0_2 = arith.constant 0 : index
    %c0_3 = arith.constant 0 : index
    %4 = vector.load %arg2[%c0_2, %c0_3] : memref<512x128xbf16, #tpu.memory_space<vmem>>, vector<512x128xbf16>
    %c0_4 = arith.constant 0 : index
    %c0_5 = arith.constant 0 : index
    %5 = vector.load %arg3[%c0_4, %c0_5] : memref<128x128xbf16, #tpu.memory_space<vmem>>, vector<128x128xbf16>
    %cst = arith.constant dense<0.000000e+00> : vector<512x128xf32>
    %6 = tpu.matmul %4, %5, %cst {dimension_numbers = #tpu.dot_dimension_numbers<[1], [0], [0], [1], [0, 0, 1, 1], [], []>} : vector<512x128xbf16>, vector<128x128xbf16>, vector<512x128xf32> -> vector<512x128xf32>
    %7 = arith.addf %3, %6 : vector<512x128xf32>
    %c0_6 = arith.constant 0 : index
    %c0_7 = arith.constant 0 : index
    %8 = vector.load %arg6[%c0_6, %c0_7] : memref<512x128xf32, #tpu.memory_space<vmem>>, vector<512x128xf32>
    tpu.vector_store %arg6[%c0_6, %c0_7], %7 {strides = array<i32>} : memref<512x128xf32, #tpu.memory_space<vmem>>, vector<512x128xf32>,
    %c0_i32_8 = arith.constant 0 : i32
    %9 = arith.cmpi eq, %arg1, %c0_i32_8 : i32
    %10 = arith.extui %9 : i1 to i32
    %c0_i32_9 = arith.constant 0 : i32
    %11 = arith.cmpi ne, %10, %c0_i32_9 : i32
    scf.if %11 {
      %c0_10 = arith.constant 0 : index
      %c0_11 = arith.constant 0 : index
      %12 = vector.load %arg6[%c0_10, %c0_11] : memref<512x128xf32, #tpu.memory_space<vmem>>, vector<512x128xf32>
      %c0_12 = arith.constant 0 : index
      %c0_13 = arith.constant 0 : index
      %13 = vector.load %arg4[%c0_12, %c0_13] : memref<1x128xf32, #tpu.memory_space<vmem>>, vector<1x128xf32>
      %14 = vector.broadcast %13 : vector<1x128xf32> to vector<512x128xf32>
      %15 = arith.addf %12, %14 : vector<512x128xf32>
      %cst_14 = arith.constant 0.000000e+00 : f32
      %16 = vector.broadcast %cst_14 : f32 to vector<512x128xf32>
      %17 = arith.cmpf oge, %15, %16 : vector<512x128xf32>
      %cst_15 = arith.constant 2.000000e-01 : f32
      %18 = vector.broadcast %cst_15 : f32 to vector<512x128xf32>
      %19 = arith.mulf %18, %15 : vector<512x128xf32>
      %20 = arith.select %17, %15, %19 : vector<512x128xi1>, vector<512x128xf32>
      %21 = arith.truncf %20 : vector<512x128xf32> to vector<512x128xbf16>
      %c0_16 = arith.constant 0 : index
      %c0_17 = arith.constant 0 : index
      %22 = vector.load %arg5[%c0_16, %c0_17] : memref<512x128xbf16, #tpu.memory_space<vmem>>, vector<512x128xbf16>
      tpu.vector_store %arg5[%c0_16, %c0_17], %21 {strides = array<i32>} : memref<512x128xbf16, #tpu.memory_space<vmem>>, vector<512x128xbf16>,
    } else {
    }
    return
  }
  func.func @transform_0(%arg0: i32, %arg1: i32) -> (i32, i32) {
    %c0_i32 = arith.constant 0 : i32
    return %arg0, %arg1 : i32, i32
  }
  func.func @transform_1(%arg0: i32, %arg1: i32) -> (i32, i32) {
    %c0_i32 = arith.constant 0 : i32
    %c0_i32_0 = arith.constant 0 : i32
    return %arg1, %c0_i32 : i32, i32
  }
  func.func @transform_2(%arg0: i32, %arg1: i32) -> (i32, i32) {
    %c0_i32 = arith.constant 0 : i32
    %c0_i32_0 = arith.constant 0 : i32
    %c0_i32_1 = arith.constant 0 : i32
    return %c0_i32, %c0_i32_0 : i32, i32
  }
  func.func @transform_3(%arg0: i32, %arg1: i32) -> (i32, i32) {
    %c0_i32 = arith.constant 0 : i32
    %c0_i32_0 = arith.constant 0 : i32
    return %arg0, %c0_i32 : i32, i32
  }
}

module attributes {stable_mosaic.version = 11 : i64} {
  func.func @kernel(%arg0: i32, %arg1: i32, %arg2: memref<128x512xbf16, #tpu.memory_space<vmem>>, %arg3: memref<512x128xbf16, #tpu.memory_space<vmem>>, %arg4: memref<1x128xf32, #tpu.memory_space<vmem>>, %arg5: memref<128x128xbf16, #tpu.memory_space<vmem>>, %arg6: memref<128x128xf32, #tpu.memory_space<vmem>>) attributes {dimension_semantics = [#tpu.dimension_semantics<parallel>, #tpu.dimension_semantics<arbitrary>], iteration_bounds = array<i64: 1, 2>, scalar_prefetch = 0 : i64, scratch_operands = 1 : i64, tpu.core_type = #tpu.core_type<tc>, window_params = [{transform_indices = @transform_0, window_bounds = array<i64: 128, 512>}, {transform_indices = @transform_1, window_bounds = array<i64: 512, 128>}, {pipeline_mode = #tpu.pipeline_mode<synchronous>, transform_indices = @transform_2, window_bounds = array<i64: 1, 128>}, {transform_indices = @transform_3, window_bounds = array<i64: 128, 128>}]} {
    %c0_i32 = arith.constant 0 : i32
    %0 = arith.cmpi eq, %arg1, %c0_i32 : i32
    %1 = arith.extui %0 : i1 to i32
    %c0_i32_0 = arith.constant 0 : i32
    %2 = arith.cmpi ne, %1, %c0_i32_0 : i32
    scf.if %2 {
      %cst_9 = arith.constant 0.000000e+00 : f32
      %12 = vector.broadcast %cst_9 : f32 to vector<128x128xf32>
      %c0_10 = arith.constant 0 : index
      %c0_11 = arith.constant 0 : index
      %13 = vector.load %arg6[%c0_10, %c0_11] : memref<128x128xf32, #tpu.memory_space<vmem>>, vector<128x128xf32>
      tpu.vector_store %arg6[%c0_10, %c0_11], %12 {strides = array<i32>} : memref<128x128xf32, #tpu.memory_space<vmem>>, vector<128x128xf32>,
    } else {
    }
    %c0 = arith.constant 0 : index
    %c0_1 = arith.constant 0 : index
    %3 = vector.load %arg6[%c0, %c0_1] : memref<128x128xf32, #tpu.memory_space<vmem>>, vector<128x128xf32>
    %c0_2 = arith.constant 0 : index
    %c0_3 = arith.constant 0 : index
    %4 = vector.load %arg2[%c0_2, %c0_3] : memref<128x512xbf16, #tpu.memory_space<vmem>>, vector<128x512xbf16>
    %c0_4 = arith.constant 0 : index
    %c0_5 = arith.constant 0 : index
    %5 = vector.load %arg3[%c0_4, %c0_5] : memref<512x128xbf16, #tpu.memory_space<vmem>>, vector<512x128xbf16>
    %cst = arith.constant dense<0.000000e+00> : vector<128x128xf32>
    %6 = tpu.matmul %4, %5, %cst {dimension_numbers = #tpu.dot_dimension_numbers<[1], [0], [0], [1], [0, 0, 1, 1], [], []>} : vector<128x512xbf16>, vector<512x128xbf16>, vector<128x128xf32> -> vector<128x128xf32>
    %7 = arith.addf %3, %6 : vector<128x128xf32>
    %c0_6 = arith.constant 0 : index
    %c0_7 = arith.constant 0 : index
    %8 = vector.load %arg6[%c0_6, %c0_7] : memref<128x128xf32, #tpu.memory_space<vmem>>, vector<128x128xf32>
    tpu.vector_store %arg6[%c0_6, %c0_7], %7 {strides = array<i32>} : memref<128x128xf32, #tpu.memory_space<vmem>>, vector<128x128xf32>,
    %c1_i32 = arith.constant 1 : i32
    %9 = arith.cmpi eq, %arg1, %c1_i32 : i32
    %10 = arith.extui %9 : i1 to i32
    %c0_i32_8 = arith.constant 0 : i32
    %11 = arith.cmpi ne, %10, %c0_i32_8 : i32
    scf.if %11 {
      %c0_9 = arith.constant 0 : index
      %c0_10 = arith.constant 0 : index
      %12 = vector.load %arg6[%c0_9, %c0_10] : memref<128x128xf32, #tpu.memory_space<vmem>>, vector<128x128xf32>
      %c0_11 = arith.constant 0 : index
      %c0_12 = arith.constant 0 : index
      %13 = vector.load %arg4[%c0_11, %c0_12] : memref<1x128xf32, #tpu.memory_space<vmem>>, vector<1x128xf32>
      %14 = vector.broadcast %13 : vector<1x128xf32> to vector<128x128xf32>
      %15 = arith.addf %12, %14 : vector<128x128xf32>
      %16 = arith.truncf %15 : vector<128x128xf32> to vector<128x128xbf16>
      %c0_13 = arith.constant 0 : index
      %c0_14 = arith.constant 0 : index
      %17 = vector.load %arg5[%c0_13, %c0_14] : memref<128x128xbf16, #tpu.memory_space<vmem>>, vector<128x128xbf16>
      tpu.vector_store %arg5[%c0_13, %c0_14], %16 {strides = array<i32>} : memref<128x128xbf16, #tpu.memory_space<vmem>>, vector<128x128xbf16>,
    } else {
    }
    return
  }
  func.func @transform_0(%arg0: i32, %arg1: i32) -> (i32, i32) {
    %c0_i32 = arith.constant 0 : i32
    return %arg0, %arg1 : i32, i32
  }
  func.func @transform_1(%arg0: i32, %arg1: i32) -> (i32, i32) {
    %c0_i32 = arith.constant 0 : i32
    %c0_i32_0 = arith.constant 0 : i32
    return %arg1, %c0_i32 : i32, i32
  }
  func.func @transform_2(%arg0: i32, %arg1: i32) -> (i32, i32) {
    %c0_i32 = arith.constant 0 : i32
    %c0_i32_0 = arith.constant 0 : i32
    %c0_i32_1 = arith.constant 0 : i32
    return %c0_i32, %c0_i32_0 : i32, i32
  }
  func.func @transform_3(%arg0: i32, %arg1: i32) -> (i32, i32) {
    %c0_i32 = arith.constant 0 : i32
    %c0_i32_0 = arith.constant 0 : i32
    return %arg0, %c0_i32 : i32, i32
  }
}

module attributes {stable_mosaic.version = 11 : i64} {
  func.func @_instnorm_lrelu_kernel(%arg0: i32, %arg1: i32, %arg2: memref<1x64x128xbf16, #tpu.memory_space<vmem>>, %arg3: memref<1x64x128xbf16, #tpu.memory_space<vmem>>) attributes {dimension_semantics = [#tpu.dimension_semantics<parallel>, #tpu.dimension_semantics<parallel>], iteration_bounds = array<i64: 2, 1>, scalar_prefetch = 0 : i64, scratch_operands = 0 : i64, tpu.core_type = #tpu.core_type<tc>, window_params = [{transform_indices = @transform_0, window_bounds = array<i64: 1, 64, 128>}, {transform_indices = @transform_1, window_bounds = array<i64: 1, 64, 128>}]} {
    %c0 = arith.constant 0 : index
    %c0_0 = arith.constant 0 : index
    %c0_1 = arith.constant 0 : index
    %0 = vector.load %arg2[%c0, %c0_0, %c0_1] : memref<1x64x128xbf16, #tpu.memory_space<vmem>>, vector<1x64x128xbf16>
    %1 = vector.shape_cast %0 : vector<1x64x128xbf16> to vector<64x128xbf16>
    %2 = arith.extf %1 : vector<64x128xbf16> to vector<64x128xf32>
    %cst = arith.constant dense<0.000000e+00> : vector<128xf32>
    %3 = vector.multi_reduction <add>, %2, %cst [0] : vector<64x128xf32> to vector<128xf32>
    %4 = vector.shape_cast %3 : vector<128xf32> to vector<1x128xf32>
    %cst_2 = arith.constant 1.562500e-02 : f32
    %5 = vector.broadcast %cst_2 : f32 to vector<1x128xf32>
    %6 = arith.mulf %4, %5 : vector<1x128xf32>
    %7 = vector.broadcast %6 : vector<1x128xf32> to vector<64x128xf32>
    %8 = arith.subf %2, %7 : vector<64x128xf32>
    %9 = arith.mulf %8, %8 : vector<64x128xf32>
    %cst_3 = arith.constant dense<0.000000e+00> : vector<128xf32>
    %10 = vector.multi_reduction <add>, %9, %cst_3 [0] : vector<64x128xf32> to vector<128xf32>
    %11 = vector.shape_cast %10 : vector<128xf32> to vector<1x128xf32>
    %cst_4 = arith.constant 1.562500e-02 : f32
    %12 = vector.broadcast %cst_4 : f32 to vector<1x128xf32>
    %13 = arith.mulf %11, %12 : vector<1x128xf32>
    %cst_5 = arith.constant 9.99999974E-6 : f32
    %14 = vector.broadcast %cst_5 : f32 to vector<1x128xf32>
    %15 = arith.addf %13, %14 : vector<1x128xf32>
    %16 = math.rsqrt %15 : vector<1x128xf32>
    %17 = vector.broadcast %16 : vector<1x128xf32> to vector<64x128xf32>
    %18 = arith.mulf %8, %17 : vector<64x128xf32>
    %cst_6 = arith.constant 0.000000e+00 : f32
    %19 = vector.broadcast %cst_6 : f32 to vector<64x128xf32>
    %20 = arith.cmpf oge, %18, %19 : vector<64x128xf32>
    %cst_7 = arith.constant 2.000000e-01 : f32
    %21 = vector.broadcast %cst_7 : f32 to vector<64x128xf32>
    %22 = arith.mulf %21, %18 : vector<64x128xf32>
    %23 = arith.select %20, %18, %22 : vector<64x128xi1>, vector<64x128xf32>
    %24 = arith.truncf %23 : vector<64x128xf32> to vector<64x128xbf16>
    %c0_8 = arith.constant 0 : index
    %c0_9 = arith.constant 0 : index
    %c0_10 = arith.constant 0 : index
    %25 = vector.load %arg3[%c0_8, %c0_9, %c0_10] : memref<1x64x128xbf16, #tpu.memory_space<vmem>>, vector<1x64x128xbf16>
    %26 = vector.shape_cast %25 : vector<1x64x128xbf16> to vector<64x128xbf16>
    %27 = vector.shape_cast %24 : vector<64x128xbf16> to vector<1x64x128xbf16>
    tpu.vector_store %arg3[%c0_8, %c0_9, %c0_10], %27 {strides = array<i32>} : memref<1x64x128xbf16, #tpu.memory_space<vmem>>, vector<1x64x128xbf16>,
    return
  }
  func.func @transform_0(%arg0: i32, %arg1: i32) -> (i32, i32, i32) {
    %c0_i32 = arith.constant 0 : i32
    %c0_i32_0 = arith.constant 0 : i32
    return %arg0, %c0_i32, %arg1 : i32, i32, i32
  }
  func.func @transform_1(%arg0: i32, %arg1: i32) -> (i32, i32, i32) {
    %c0_i32 = arith.constant 0 : i32
    %c0_i32_0 = arith.constant 0 : i32
    return %arg0, %c0_i32, %arg1 : i32, i32, i32
  }
}

module attributes {stable_mosaic.version = 11 : i64} {
  func.func @kernel(%arg0: i32, %arg1: i32, %arg2: memref<32x512xbf16, #tpu.memory_space<vmem>>, %arg3: memref<512x256xbf16, #tpu.memory_space<vmem>>, %arg4: memref<1x256xf32, #tpu.memory_space<vmem>>, %arg5: memref<32x256xbf16, #tpu.memory_space<vmem>>, %arg6: memref<32x256xf32, #tpu.memory_space<vmem>>) attributes {dimension_semantics = [#tpu.dimension_semantics<parallel>, #tpu.dimension_semantics<arbitrary>], iteration_bounds = array<i64: 1, 4>, scalar_prefetch = 0 : i64, scratch_operands = 1 : i64, tpu.core_type = #tpu.core_type<tc>, window_params = [{transform_indices = @transform_0, window_bounds = array<i64: 32, 512>}, {transform_indices = @transform_1, window_bounds = array<i64: 512, 256>}, {pipeline_mode = #tpu.pipeline_mode<synchronous>, transform_indices = @transform_2, window_bounds = array<i64: 1, 256>}, {transform_indices = @transform_3, window_bounds = array<i64: 32, 256>}]} {
    %c0_i32 = arith.constant 0 : i32
    %0 = arith.cmpi eq, %arg1, %c0_i32 : i32
    %1 = arith.extui %0 : i1 to i32
    %c0_i32_0 = arith.constant 0 : i32
    %2 = arith.cmpi ne, %1, %c0_i32_0 : i32
    scf.if %2 {
      %cst_9 = arith.constant 0.000000e+00 : f32
      %12 = vector.broadcast %cst_9 : f32 to vector<32x256xf32>
      %c0_10 = arith.constant 0 : index
      %c0_11 = arith.constant 0 : index
      %13 = vector.load %arg6[%c0_10, %c0_11] : memref<32x256xf32, #tpu.memory_space<vmem>>, vector<32x256xf32>
      tpu.vector_store %arg6[%c0_10, %c0_11], %12 {strides = array<i32>} : memref<32x256xf32, #tpu.memory_space<vmem>>, vector<32x256xf32>,
    } else {
    }
    %c0 = arith.constant 0 : index
    %c0_1 = arith.constant 0 : index
    %3 = vector.load %arg6[%c0, %c0_1] : memref<32x256xf32, #tpu.memory_space<vmem>>, vector<32x256xf32>
    %c0_2 = arith.constant 0 : index
    %c0_3 = arith.constant 0 : index
    %4 = vector.load %arg2[%c0_2, %c0_3] : memref<32x512xbf16, #tpu.memory_space<vmem>>, vector<32x512xbf16>
    %c0_4 = arith.constant 0 : index
    %c0_5 = arith.constant 0 : index
    %5 = vector.load %arg3[%c0_4, %c0_5] : memref<512x256xbf16, #tpu.memory_space<vmem>>, vector<512x256xbf16>
    %cst = arith.constant dense<0.000000e+00> : vector<32x256xf32>
    %6 = tpu.matmul %4, %5, %cst {dimension_numbers = #tpu.dot_dimension_numbers<[1], [0], [0], [1], [0, 0, 1, 1], [], []>} : vector<32x512xbf16>, vector<512x256xbf16>, vector<32x256xf32> -> vector<32x256xf32>
    %7 = arith.addf %3, %6 : vector<32x256xf32>
    %c0_6 = arith.constant 0 : index
    %c0_7 = arith.constant 0 : index
    %8 = vector.load %arg6[%c0_6, %c0_7] : memref<32x256xf32, #tpu.memory_space<vmem>>, vector<32x256xf32>
    tpu.vector_store %arg6[%c0_6, %c0_7], %7 {strides = array<i32>} : memref<32x256xf32, #tpu.memory_space<vmem>>, vector<32x256xf32>,
    %c3_i32 = arith.constant 3 : i32
    %9 = arith.cmpi eq, %arg1, %c3_i32 : i32
    %10 = arith.extui %9 : i1 to i32
    %c0_i32_8 = arith.constant 0 : i32
    %11 = arith.cmpi ne, %10, %c0_i32_8 : i32
    scf.if %11 {
      %c0_9 = arith.constant 0 : index
      %c0_10 = arith.constant 0 : index
      %12 = vector.load %arg6[%c0_9, %c0_10] : memref<32x256xf32, #tpu.memory_space<vmem>>, vector<32x256xf32>
      %c0_11 = arith.constant 0 : index
      %c0_12 = arith.constant 0 : index
      %13 = vector.load %arg4[%c0_11, %c0_12] : memref<1x256xf32, #tpu.memory_space<vmem>>, vector<1x256xf32>
      %14 = vector.broadcast %13 : vector<1x256xf32> to vector<32x256xf32>
      %15 = arith.addf %12, %14 : vector<32x256xf32>
      %16 = arith.truncf %15 : vector<32x256xf32> to vector<32x256xbf16>
      %c0_13 = arith.constant 0 : index
      %c0_14 = arith.constant 0 : index
      %17 = vector.load %arg5[%c0_13, %c0_14] : memref<32x256xbf16, #tpu.memory_space<vmem>>, vector<32x256xbf16>
      tpu.vector_store %arg5[%c0_13, %c0_14], %16 {strides = array<i32>} : memref<32x256xbf16, #tpu.memory_space<vmem>>, vector<32x256xbf16>,
    } else {
    }
    return
  }
  func.func @transform_0(%arg0: i32, %arg1: i32) -> (i32, i32) {
    %c0_i32 = arith.constant 0 : i32
    return %arg0, %arg1 : i32, i32
  }
  func.func @transform_1(%arg0: i32, %arg1: i32) -> (i32, i32) {
    %c0_i32 = arith.constant 0 : i32
    %c0_i32_0 = arith.constant 0 : i32
    return %arg1, %c0_i32 : i32, i32
  }
  func.func @transform_2(%arg0: i32, %arg1: i32) -> (i32, i32) {
    %c0_i32 = arith.constant 0 : i32
    %c0_i32_0 = arith.constant 0 : i32
    %c0_i32_1 = arith.constant 0 : i32
    return %c0_i32, %c0_i32_0 : i32, i32
  }
  func.func @transform_3(%arg0: i32, %arg1: i32) -> (i32, i32) {
    %c0_i32 = arith.constant 0 : i32
    %c0_i32_0 = arith.constant 0 : i32
    return %arg0, %c0_i32 : i32, i32
  }
}

module attributes {stable_mosaic.version = 11 : i64} {
  func.func @_instnorm_lrelu_kernel(%arg0: i32, %arg1: i32, %arg2: memref<1x16x128xbf16, #tpu.memory_space<vmem>>, %arg3: memref<1x16x128xbf16, #tpu.memory_space<vmem>>) attributes {dimension_semantics = [#tpu.dimension_semantics<parallel>, #tpu.dimension_semantics<parallel>], iteration_bounds = array<i64: 2, 2>, scalar_prefetch = 0 : i64, scratch_operands = 0 : i64, tpu.core_type = #tpu.core_type<tc>, window_params = [{transform_indices = @transform_0, window_bounds = array<i64: 1, 16, 128>}, {transform_indices = @transform_1, window_bounds = array<i64: 1, 16, 128>}]} {
    %c0 = arith.constant 0 : index
    %c0_0 = arith.constant 0 : index
    %c0_1 = arith.constant 0 : index
    %0 = vector.load %arg2[%c0, %c0_0, %c0_1] : memref<1x16x128xbf16, #tpu.memory_space<vmem>>, vector<1x16x128xbf16>
    %1 = vector.shape_cast %0 : vector<1x16x128xbf16> to vector<16x128xbf16>
    %2 = arith.extf %1 : vector<16x128xbf16> to vector<16x128xf32>
    %cst = arith.constant dense<0.000000e+00> : vector<128xf32>
    %3 = vector.multi_reduction <add>, %2, %cst [0] : vector<16x128xf32> to vector<128xf32>
    %4 = vector.shape_cast %3 : vector<128xf32> to vector<1x128xf32>
    %cst_2 = arith.constant 6.250000e-02 : f32
    %5 = vector.broadcast %cst_2 : f32 to vector<1x128xf32>
    %6 = arith.mulf %4, %5 : vector<1x128xf32>
    %7 = vector.broadcast %6 : vector<1x128xf32> to vector<16x128xf32>
    %8 = arith.subf %2, %7 : vector<16x128xf32>
    %9 = arith.mulf %8, %8 : vector<16x128xf32>
    %cst_3 = arith.constant dense<0.000000e+00> : vector<128xf32>
    %10 = vector.multi_reduction <add>, %9, %cst_3 [0] : vector<16x128xf32> to vector<128xf32>
    %11 = vector.shape_cast %10 : vector<128xf32> to vector<1x128xf32>
    %cst_4 = arith.constant 6.250000e-02 : f32
    %12 = vector.broadcast %cst_4 : f32 to vector<1x128xf32>
    %13 = arith.mulf %11, %12 : vector<1x128xf32>
    %cst_5 = arith.constant 9.99999974E-6 : f32
    %14 = vector.broadcast %cst_5 : f32 to vector<1x128xf32>
    %15 = arith.addf %13, %14 : vector<1x128xf32>
    %16 = math.rsqrt %15 : vector<1x128xf32>
    %17 = vector.broadcast %16 : vector<1x128xf32> to vector<16x128xf32>
    %18 = arith.mulf %8, %17 : vector<16x128xf32>
    %cst_6 = arith.constant 0.000000e+00 : f32
    %19 = vector.broadcast %cst_6 : f32 to vector<16x128xf32>
    %20 = arith.cmpf oge, %18, %19 : vector<16x128xf32>
    %cst_7 = arith.constant 2.000000e-01 : f32
    %21 = vector.broadcast %cst_7 : f32 to vector<16x128xf32>
    %22 = arith.mulf %21, %18 : vector<16x128xf32>
    %23 = arith.select %20, %18, %22 : vector<16x128xi1>, vector<16x128xf32>
    %24 = arith.truncf %23 : vector<16x128xf32> to vector<16x128xbf16>
    %c0_8 = arith.constant 0 : index
    %c0_9 = arith.constant 0 : index
    %c0_10 = arith.constant 0 : index
    %25 = vector.load %arg3[%c0_8, %c0_9, %c0_10] : memref<1x16x128xbf16, #tpu.memory_space<vmem>>, vector<1x16x128xbf16>
    %26 = vector.shape_cast %25 : vector<1x16x128xbf16> to vector<16x128xbf16>
    %27 = vector.shape_cast %24 : vector<16x128xbf16> to vector<1x16x128xbf16>
    tpu.vector_store %arg3[%c0_8, %c0_9, %c0_10], %27 {strides = array<i32>} : memref<1x16x128xbf16, #tpu.memory_space<vmem>>, vector<1x16x128xbf16>,
    return
  }
  func.func @transform_0(%arg0: i32, %arg1: i32) -> (i32, i32, i32) {
    %c0_i32 = arith.constant 0 : i32
    %c0_i32_0 = arith.constant 0 : i32
    return %arg0, %c0_i32, %arg1 : i32, i32, i32
  }
  func.func @transform_1(%arg0: i32, %arg1: i32) -> (i32, i32, i32) {
    %c0_i32 = arith.constant 0 : i32
    %c0_i32_0 = arith.constant 0 : i32
    return %arg0, %c0_i32, %arg1 : i32, i32, i32
  }
}

module attributes {stable_mosaic.version = 11 : i64} {
  func.func @kernel(%arg0: i32, %arg1: i32, %arg2: memref<8x512xbf16, #tpu.memory_space<vmem>>, %arg3: memref<512x512xbf16, #tpu.memory_space<vmem>>, %arg4: memref<1x512xf32, #tpu.memory_space<vmem>>, %arg5: memref<8x512xbf16, #tpu.memory_space<vmem>>, %arg6: memref<8x512xf32, #tpu.memory_space<vmem>>) attributes {dimension_semantics = [#tpu.dimension_semantics<parallel>, #tpu.dimension_semantics<arbitrary>], iteration_bounds = array<i64: 1, 8>, scalar_prefetch = 0 : i64, scratch_operands = 1 : i64, tpu.core_type = #tpu.core_type<tc>, window_params = [{transform_indices = @transform_0, window_bounds = array<i64: 8, 512>}, {transform_indices = @transform_1, window_bounds = array<i64: 512, 512>}, {pipeline_mode = #tpu.pipeline_mode<synchronous>, transform_indices = @transform_2, window_bounds = array<i64: 1, 512>}, {transform_indices = @transform_3, window_bounds = array<i64: 8, 512>}]} {
    %c0_i32 = arith.constant 0 : i32
    %0 = arith.cmpi eq, %arg1, %c0_i32 : i32
    %1 = arith.extui %0 : i1 to i32
    %c0_i32_0 = arith.constant 0 : i32
    %2 = arith.cmpi ne, %1, %c0_i32_0 : i32
    scf.if %2 {
      %cst_9 = arith.constant 0.000000e+00 : f32
      %12 = vector.broadcast %cst_9 : f32 to vector<8x512xf32>
      %c0_10 = arith.constant 0 : index
      %c0_11 = arith.constant 0 : index
      %13 = vector.load %arg6[%c0_10, %c0_11] : memref<8x512xf32, #tpu.memory_space<vmem>>, vector<8x512xf32>
      tpu.vector_store %arg6[%c0_10, %c0_11], %12 {strides = array<i32>} : memref<8x512xf32, #tpu.memory_space<vmem>>, vector<8x512xf32>,
    } else {
    }
    %c0 = arith.constant 0 : index
    %c0_1 = arith.constant 0 : index
    %3 = vector.load %arg6[%c0, %c0_1] : memref<8x512xf32, #tpu.memory_space<vmem>>, vector<8x512xf32>
    %c0_2 = arith.constant 0 : index
    %c0_3 = arith.constant 0 : index
    %4 = vector.load %arg2[%c0_2, %c0_3] : memref<8x512xbf16, #tpu.memory_space<vmem>>, vector<8x512xbf16>
    %c0_4 = arith.constant 0 : index
    %c0_5 = arith.constant 0 : index
    %5 = vector.load %arg3[%c0_4, %c0_5] : memref<512x512xbf16, #tpu.memory_space<vmem>>, vector<512x512xbf16>
    %cst = arith.constant dense<0.000000e+00> : vector<8x512xf32>
    %6 = tpu.matmul %4, %5, %cst {dimension_numbers = #tpu.dot_dimension_numbers<[1], [0], [0], [1], [0, 0, 1, 1], [], []>} : vector<8x512xbf16>, vector<512x512xbf16>, vector<8x512xf32> -> vector<8x512xf32>
    %7 = arith.addf %3, %6 : vector<8x512xf32>
    %c0_6 = arith.constant 0 : index
    %c0_7 = arith.constant 0 : index
    %8 = vector.load %arg6[%c0_6, %c0_7] : memref<8x512xf32, #tpu.memory_space<vmem>>, vector<8x512xf32>
    tpu.vector_store %arg6[%c0_6, %c0_7], %7 {strides = array<i32>} : memref<8x512xf32, #tpu.memory_space<vmem>>, vector<8x512xf32>,
    %c7_i32 = arith.constant 7 : i32
    %9 = arith.cmpi eq, %arg1, %c7_i32 : i32
    %10 = arith.extui %9 : i1 to i32
    %c0_i32_8 = arith.constant 0 : i32
    %11 = arith.cmpi ne, %10, %c0_i32_8 : i32
    scf.if %11 {
      %c0_9 = arith.constant 0 : index
      %c0_10 = arith.constant 0 : index
      %12 = vector.load %arg6[%c0_9, %c0_10] : memref<8x512xf32, #tpu.memory_space<vmem>>, vector<8x512xf32>
      %c0_11 = arith.constant 0 : index
      %c0_12 = arith.constant 0 : index
      %13 = vector.load %arg4[%c0_11, %c0_12] : memref<1x512xf32, #tpu.memory_space<vmem>>, vector<1x512xf32>
      %14 = vector.broadcast %13 : vector<1x512xf32> to vector<8x512xf32>
      %15 = arith.addf %12, %14 : vector<8x512xf32>
      %16 = arith.truncf %15 : vector<8x512xf32> to vector<8x512xbf16>
      %c0_13 = arith.constant 0 : index
      %c0_14 = arith.constant 0 : index
      %17 = vector.load %arg5[%c0_13, %c0_14] : memref<8x512xbf16, #tpu.memory_space<vmem>>, vector<8x512xbf16>
      tpu.vector_store %arg5[%c0_13, %c0_14], %16 {strides = array<i32>} : memref<8x512xbf16, #tpu.memory_space<vmem>>, vector<8x512xbf16>,
    } else {
    }
    return
  }
  func.func @transform_0(%arg0: i32, %arg1: i32) -> (i32, i32) {
    %c0_i32 = arith.constant 0 : i32
    return %arg0, %arg1 : i32, i32
  }
  func.func @transform_1(%arg0: i32, %arg1: i32) -> (i32, i32) {
    %c0_i32 = arith.constant 0 : i32
    %c0_i32_0 = arith.constant 0 : i32
    return %arg1, %c0_i32 : i32, i32
  }
  func.func @transform_2(%arg0: i32, %arg1: i32) -> (i32, i32) {
    %c0_i32 = arith.constant 0 : i32
    %c0_i32_0 = arith.constant 0 : i32
    %c0_i32_1 = arith.constant 0 : i32
    return %c0_i32, %c0_i32_0 : i32, i32
  }
  func.func @transform_3(%arg0: i32, %arg1: i32) -> (i32, i32) {
    %c0_i32 = arith.constant 0 : i32
    %c0_i32_0 = arith.constant 0 : i32
    return %arg0, %c0_i32 : i32, i32
  }
}

module attributes {stable_mosaic.version = 11 : i64} {
  func.func @_instnorm_lrelu_kernel(%arg0: i32, %arg1: i32, %arg2: memref<1x4x128xbf16, #tpu.memory_space<vmem>>, %arg3: memref<1x4x128xbf16, #tpu.memory_space<vmem>>) attributes {dimension_semantics = [#tpu.dimension_semantics<parallel>, #tpu.dimension_semantics<parallel>], iteration_bounds = array<i64: 2, 4>, scalar_prefetch = 0 : i64, scratch_operands = 0 : i64, tpu.core_type = #tpu.core_type<tc>, window_params = [{transform_indices = @transform_0, window_bounds = array<i64: 1, 4, 128>}, {transform_indices = @transform_1, window_bounds = array<i64: 1, 4, 128>}]} {
    %c0 = arith.constant 0 : index
    %c0_0 = arith.constant 0 : index
    %c0_1 = arith.constant 0 : index
    %0 = vector.load %arg2[%c0, %c0_0, %c0_1] : memref<1x4x128xbf16, #tpu.memory_space<vmem>>, vector<1x4x128xbf16>
    %1 = vector.shape_cast %0 : vector<1x4x128xbf16> to vector<4x128xbf16>
    %2 = arith.extf %1 : vector<4x128xbf16> to vector<4x128xf32>
    %cst = arith.constant dense<0.000000e+00> : vector<128xf32>
    %3 = vector.multi_reduction <add>, %2, %cst [0] : vector<4x128xf32> to vector<128xf32>
    %4 = vector.shape_cast %3 : vector<128xf32> to vector<1x128xf32>
    %cst_2 = arith.constant 2.500000e-01 : f32
    %5 = vector.broadcast %cst_2 : f32 to vector<1x128xf32>
    %6 = arith.mulf %4, %5 : vector<1x128xf32>
    %7 = vector.broadcast %6 : vector<1x128xf32> to vector<4x128xf32>
    %8 = arith.subf %2, %7 : vector<4x128xf32>
    %9 = arith.mulf %8, %8 : vector<4x128xf32>
    %cst_3 = arith.constant dense<0.000000e+00> : vector<128xf32>
    %10 = vector.multi_reduction <add>, %9, %cst_3 [0] : vector<4x128xf32> to vector<128xf32>
    %11 = vector.shape_cast %10 : vector<128xf32> to vector<1x128xf32>
    %cst_4 = arith.constant 2.500000e-01 : f32
    %12 = vector.broadcast %cst_4 : f32 to vector<1x128xf32>
    %13 = arith.mulf %11, %12 : vector<1x128xf32>
    %cst_5 = arith.constant 9.99999974E-6 : f32
    %14 = vector.broadcast %cst_5 : f32 to vector<1x128xf32>
    %15 = arith.addf %13, %14 : vector<1x128xf32>
    %16 = math.rsqrt %15 : vector<1x128xf32>
    %17 = vector.broadcast %16 : vector<1x128xf32> to vector<4x128xf32>
    %18 = arith.mulf %8, %17 : vector<4x128xf32>
    %cst_6 = arith.constant 0.000000e+00 : f32
    %19 = vector.broadcast %cst_6 : f32 to vector<4x128xf32>
    %20 = arith.cmpf oge, %18, %19 : vector<4x128xf32>
    %cst_7 = arith.constant 2.000000e-01 : f32
    %21 = vector.broadcast %cst_7 : f32 to vector<4x128xf32>
    %22 = arith.mulf %21, %18 : vector<4x128xf32>
    %23 = arith.select %20, %18, %22 : vector<4x128xi1>, vector<4x128xf32>
    %24 = arith.truncf %23 : vector<4x128xf32> to vector<4x128xbf16>
    %c0_8 = arith.constant 0 : index
    %c0_9 = arith.constant 0 : index
    %c0_10 = arith.constant 0 : index
    %25 = vector.load %arg3[%c0_8, %c0_9, %c0_10] : memref<1x4x128xbf16, #tpu.memory_space<vmem>>, vector<1x4x128xbf16>
    %26 = vector.shape_cast %25 : vector<1x4x128xbf16> to vector<4x128xbf16>
    %27 = vector.shape_cast %24 : vector<4x128xbf16> to vector<1x4x128xbf16>
    tpu.vector_store %arg3[%c0_8, %c0_9, %c0_10], %27 {strides = array<i32>} : memref<1x4x128xbf16, #tpu.memory_space<vmem>>, vector<1x4x128xbf16>,
    return
  }
  func.func @transform_0(%arg0: i32, %arg1: i32) -> (i32, i32, i32) {
    %c0_i32 = arith.constant 0 : i32
    %c0_i32_0 = arith.constant 0 : i32
    return %arg0, %c0_i32, %arg1 : i32, i32, i32
  }
  func.func @transform_1(%arg0: i32, %arg1: i32) -> (i32, i32, i32) {
    %c0_i32 = arith.constant 0 : i32
    %c0_i32_0 = arith.constant 0 : i32
    return %arg0, %c0_i32, %arg1 : i32, i32, i32
  }
}

module attributes {stable_mosaic.version = 11 : i64} {
  func.func @kernel(%arg0: i32, %arg1: i32, %arg2: memref<8x512xbf16, #tpu.memory_space<vmem>>, %arg3: memref<512x128xbf16, #tpu.memory_space<vmem>>, %arg4: memref<1x128xf32, #tpu.memory_space<vmem>>, %arg5: memref<8x128xf32, #tpu.memory_space<vmem>>, %arg6: memref<8x128xf32, #tpu.memory_space<vmem>>) attributes {dimension_semantics = [#tpu.dimension_semantics<parallel>, #tpu.dimension_semantics<arbitrary>], iteration_bounds = array<i64: 1, 16>, scalar_prefetch = 0 : i64, scratch_operands = 1 : i64, tpu.core_type = #tpu.core_type<tc>, window_params = [{transform_indices = @transform_0, window_bounds = array<i64: 8, 512>}, {transform_indices = @transform_1, window_bounds = array<i64: 512, 128>}, {pipeline_mode = #tpu.pipeline_mode<synchronous>, transform_indices = @transform_2, window_bounds = array<i64: 1, 128>}, {transform_indices = @transform_3, window_bounds = array<i64: 8, 128>}]} {
    %c0_i32 = arith.constant 0 : i32
    %0 = arith.cmpi eq, %arg1, %c0_i32 : i32
    %1 = arith.extui %0 : i1 to i32
    %c0_i32_0 = arith.constant 0 : i32
    %2 = arith.cmpi ne, %1, %c0_i32_0 : i32
    scf.if %2 {
      %cst_9 = arith.constant 0.000000e+00 : f32
      %12 = vector.broadcast %cst_9 : f32 to vector<8x128xf32>
      %c0_10 = arith.constant 0 : index
      %c0_11 = arith.constant 0 : index
      %13 = vector.load %arg6[%c0_10, %c0_11] : memref<8x128xf32, #tpu.memory_space<vmem>>, vector<8x128xf32>
      tpu.vector_store %arg6[%c0_10, %c0_11], %12 {strides = array<i32>} : memref<8x128xf32, #tpu.memory_space<vmem>>, vector<8x128xf32>,
    } else {
    }
    %c0 = arith.constant 0 : index
    %c0_1 = arith.constant 0 : index
    %3 = vector.load %arg6[%c0, %c0_1] : memref<8x128xf32, #tpu.memory_space<vmem>>, vector<8x128xf32>
    %c0_2 = arith.constant 0 : index
    %c0_3 = arith.constant 0 : index
    %4 = vector.load %arg2[%c0_2, %c0_3] : memref<8x512xbf16, #tpu.memory_space<vmem>>, vector<8x512xbf16>
    %c0_4 = arith.constant 0 : index
    %c0_5 = arith.constant 0 : index
    %5 = vector.load %arg3[%c0_4, %c0_5] : memref<512x128xbf16, #tpu.memory_space<vmem>>, vector<512x128xbf16>
    %cst = arith.constant dense<0.000000e+00> : vector<8x128xf32>
    %6 = tpu.matmul %4, %5, %cst {dimension_numbers = #tpu.dot_dimension_numbers<[1], [0], [0], [1], [0, 0, 1, 1], [], []>} : vector<8x512xbf16>, vector<512x128xbf16>, vector<8x128xf32> -> vector<8x128xf32>
    %7 = arith.addf %3, %6 : vector<8x128xf32>
    %c0_6 = arith.constant 0 : index
    %c0_7 = arith.constant 0 : index
    %8 = vector.load %arg6[%c0_6, %c0_7] : memref<8x128xf32, #tpu.memory_space<vmem>>, vector<8x128xf32>
    tpu.vector_store %arg6[%c0_6, %c0_7], %7 {strides = array<i32>} : memref<8x128xf32, #tpu.memory_space<vmem>>, vector<8x128xf32>,
    %c15_i32 = arith.constant 15 : i32
    %9 = arith.cmpi eq, %arg1, %c15_i32 : i32
    %10 = arith.extui %9 : i1 to i32
    %c0_i32_8 = arith.constant 0 : i32
    %11 = arith.cmpi ne, %10, %c0_i32_8 : i32
    scf.if %11 {
      %c0_9 = arith.constant 0 : index
      %c0_10 = arith.constant 0 : index
      %12 = vector.load %arg6[%c0_9, %c0_10] : memref<8x128xf32, #tpu.memory_space<vmem>>, vector<8x128xf32>
      %c0_11 = arith.constant 0 : index
      %c0_12 = arith.constant 0 : index
      %13 = vector.load %arg4[%c0_11, %c0_12] : memref<1x128xf32, #tpu.memory_space<vmem>>, vector<1x128xf32>
      %14 = vector.broadcast %13 : vector<1x128xf32> to vector<8x128xf32>
      %15 = arith.addf %12, %14 : vector<8x128xf32>
      %c0_13 = arith.constant 0 : index
      %c0_14 = arith.constant 0 : index
      %16 = vector.load %arg5[%c0_13, %c0_14] : memref<8x128xf32, #tpu.memory_space<vmem>>, vector<8x128xf32>
      tpu.vector_store %arg5[%c0_13, %c0_14], %15 {strides = array<i32>} : memref<8x128xf32, #tpu.memory_space<vmem>>, vector<8x128xf32>,
    } else {
    }
    return
  }
  func.func @transform_0(%arg0: i32, %arg1: i32) -> (i32, i32) {
    %c0_i32 = arith.constant 0 : i32
    return %arg0, %arg1 : i32, i32
  }
  func.func @transform_1(%arg0: i32, %arg1: i32) -> (i32, i32) {
    %c0_i32 = arith.constant 0 : i32
    %c0_i32_0 = arith.constant 0 : i32
    return %arg1, %c0_i32 : i32, i32
  }
  func.func @transform_2(%arg0: i32, %arg1: i32) -> (i32, i32) {
    %c0_i32 = arith.constant 0 : i32
    %c0_i32_0 = arith.constant 0 : i32
    %c0_i32_1 = arith.constant 0 : i32
    return %c0_i32, %c0_i32_0 : i32, i32
  }
  func.func @transform_3(%arg0: i32, %arg1: i32) -> (i32, i32) {
    %c0_i32 = arith.constant 0 : i32
    %c0_i32_0 = arith.constant 0 : i32
    return %arg0, %c0_i32 : i32, i32
  }
}

</mosaic_0001>

<bundles_post_ra>
// kernel: _lambda_.8
= control target key start
LH: loop header
LB: loop body
LE: loop exit
PB: predicated region body
PF: predicated region fallthrough
CT: control target
= control target key end

     0   :  { %s2388_s1 = inlined_call_operand.vmem [shape: bf16[128,128], index: 1, kind: input, shape index: {}]   ;;  %s2389_s0 = inlined_call_operand.vmem [shape: bf16[512,128], index: 0, kind: input, shape index: {}]   ;;  %s2390_s2 = inlined_call_operand.vmem [shape: f32[1,128], index: 2, kind: input, shape index: {}]   ;;  %s2391_s3 = inlined_call_operand.vmem [shape: bf16[512,128], index: 3, kind: output, shape index: {}]  }
   0x1   :  { %v2034_v0 = vld [vmem:[%s2388_s1] sm:$0xff]   ;;  %v2035_v1 = vld [vmem:[%s2388_s1 + $0x8] sm:$0xff]   ;;  %v2036_v2 = vld [vmem:[%s2388_s1 + $0x10] sm:$0xff]  }
   0x2   :  { %1938 = vmatprep.subr.bf16.mxu0 %v2034_v0  ;;  %2018 = vmatprep.subr.bf16.mxu1 %v2034_v0  ;;  %v2037_v3 = vld [vmem:[%s2388_s1 + $0x18] sm:$0xff]   ;;  %v2042_v4 = vld [vmem:[%s2389_s0] sm:$0xff]   ;;  %v2039_v7 = vld [vmem:[%s2388_s1 + $0x28] sm:$0xff]  }
   0x3   :  { %1939 = vmatpush3.bf16.msra.mxu0 %v2034_v0  ;;  %2026 = vmatpush3.bf16.msra.mxu1 %v2034_v0  ;;  %v2043_v5 = vld [vmem:[%s2389_s0 + $0x80] sm:$0xff]   ;;  %v2040_v8 = vld [vmem:[%s2388_s1 + $0x30] sm:$0xff]   ;;  %v2041_v9 = vld [vmem:[%s2388_s1 + $0x38] sm:$0xff]  }
   0x4   :  { %1940 = vmatprep.subr.bf16.mxu0 %v2035_v1  ;;  %2019 = vmatprep.subr.bf16.mxu1 %v2035_v1  ;;  %v2038_v6 = vld [vmem:[%s2388_s1 + $0x20] sm:$0xff]   ;;  %v2044_v10 = vld [vmem:[%s2389_s0 + $0x8] sm:$0xff]   ;;  %v2046_v12 = vld [vmem:[%s2389_s0 + $0x10] sm:$0xff]  }
   0x5   :  { %1954 = vmatprep.mubr.bf16.mxu0 %v2042_v4  ;;  %1986 = vmatprep.mubr.bf16.mxu1 %v2043_v5  ;;  %v2045_v11 = vld [vmem:[%s2389_s0 + $0x88] sm:$0xff]   ;;  %v2047_v13 = vld [vmem:[%s2389_s0 + $0x90] sm:$0xff]   ;;  %v2048_v14 = vld [vmem:[%s2389_s0 + $0x18] sm:$0xff]  }
   0x6   :  { %v2049_v15 = vld [vmem:[%s2389_s0 + $0x98] sm:$0xff]   ;;  %v2050_v16 = vld [vmem:[%s2389_s0 + $0x20] sm:$0xff]   ;;  %v2052_v18 = vld [vmem:[%s2389_s0 + $0x28] sm:$0xff]  }
   0x7   :  { %1941 = vmatpush3.bf16.msra.mxu0 %v2035_v1  ;;  %2027 = vmatpush3.bf16.msra.mxu1 %v2035_v1  ;;  %v2051_v17 = vld [vmem:[%s2389_s0 + $0xa0] sm:$0xff]   ;;  %v2053_v19 = vld [vmem:[%s2389_s0 + $0xa8] sm:$0xff]   ;;  %v2054_v20 = vld [vmem:[%s2389_s0 + $0x30] sm:$0xff]  }
   0x8   :  { %1942 = vmatprep.subr.bf16.mxu0 %v2036_v2  ;;  %2020 = vmatprep.subr.bf16.mxu1 %v2036_v2  ;;  %v2055_v21 = vld [vmem:[%s2389_s0 + $0xb0] sm:$0xff]   ;;  %v2056_v22 = vld [vmem:[%s2389_s0 + $0x38] sm:$0xff]   ;;  %v2058_v24 = vld [vmem:[%s2389_s0 + $0x40] sm:$0xff]  }
   0x9   :  { %v2057_v23 = vld [vmem:[%s2389_s0 + $0xb8] sm:$0xff]   ;;  %v2059_v25 = vld [vmem:[%s2389_s0 + $0xc0] sm:$0xff]   ;;  %v2060_v26 = vld [vmem:[%s2389_s0 + $0x48] sm:$0xff]  }
   0xa   :  { %v2061_v27 = vld [vmem:[%s2389_s0 + $0xc8] sm:$0xff]   ;;  %v2062_v28 = vld [vmem:[%s2389_s0 + $0x50] sm:$0xff]   ;;  %v2064_v30 = vld [vmem:[%s2389_s0 + $0x58] sm:$0xff]  }
   0xb   :  { %1943 = vmatpush3.bf16.msra.mxu0 %v2036_v2  ;;  %2028 = vmatpush3.bf16.msra.mxu1 %v2036_v2  ;;  %v2063_v29 = vld [vmem:[%s2389_s0 + $0xd0] sm:$0xff]   ;;  %v2065_v31 = vld [vmem:[%s2389_s0 + $0xd8] sm:$0xff]   ;;  %v2066_v32 = vld [vmem:[%s2389_s0 + $0x60] sm:$0xff]  }
   0xc   :  { %1944 = vmatprep.subr.bf16.mxu0 %v2037_v3  ;;  %2021 = vmatprep.subr.bf16.mxu1 %v2037_v3  ;;  %v2067_v33 = vld [vmem:[%s2389_s0 + $0xe0] sm:$0xff]   ;;  %v2068_v34 = vld [vmem:[%s2389_s0 + $0x68] sm:$0xff]   ;;  %v2070_v36 = vld [vmem:[%s2389_s0 + $0x70] sm:$0xff]  }
   0xd   :  { %v2069_v35 = vld [vmem:[%s2389_s0 + $0xe8] sm:$0xff]   ;;  %v2071_v37 = vld [vmem:[%s2389_s0 + $0xf0] sm:$0xff]   ;;  %v2072_v38 = vld [vmem:[%s2389_s0 + $0x78] sm:$0xff]  }
   0xe   :  { %v2073_v39 = vld [vmem:[%s2389_s0 + $0xf8] sm:$0xff]   ;;  %v2217_v40 = vld [vmem:[%s2390_s2] ss:$0 sm:$0xff] }
   0xf   :  { %1945 = vmatpush3.bf16.msra.mxu0 %v2037_v3  ;;  %2029 = vmatpush3.bf16.msra.mxu1 %v2037_v3 }
  0x10   :  { %1946 = vmatprep.subr.bf16.mxu0 %v2038_v6  ;;  %2022 = vmatprep.subr.bf16.mxu1 %v2038_v6 }
  0x13   :  { %1947 = vmatpush3.bf16.msra.mxu0 %v2038_v6  ;;  %2030 = vmatpush3.bf16.msra.mxu1 %v2038_v6 }
  0x14   :  { %1948 = vmatprep.subr.bf16.mxu0 %v2039_v7  ;;  %2023 = vmatprep.subr.bf16.mxu1 %v2039_v7 }
  0x17   :  { %1949 = vmatpush3.bf16.msra.mxu0 %v2039_v7  ;;  %2031 = vmatpush3.bf16.msra.mxu1 %v2039_v7 }
  0x18   :  { %1950 = vmatprep.subr.bf16.mxu0 %v2040_v8  ;;  %2024 = vmatprep.subr.bf16.mxu1 %v2040_v8 }
  0x1b   :  { %1951 = vmatpush3.bf16.msra.mxu0 %v2040_v8  ;;  %2032 = vmatpush3.bf16.msra.mxu1 %v2040_v8 }
  0x1c   :  { %1952 = vmatprep.subr.bf16.mxu0 %v2041_v9  ;;  %2025 = vmatprep.subr.bf16.mxu1 %v2041_v9 }
  0x1f   :  { %1953 = vmatpush3.bf16.msra.mxu0 %v2041_v9  ;;  %2033 = vmatpush3.bf16.msra.mxu1 %v2041_v9 }
  0x22   :  { %1955 = vmatmul.mubr.bf16.vlgmr.msra.gmra.mrb[0].mxu0 %v2044_v10  ;;  %1987 = vmatmul.mubr.bf16.vlgmr.msra.gmra.mrb[0].mxu1 %v2045_v11 }
  0x23   :  { %1958 = vmatprep.mubr.bf16.mxu0 %v2046_v12  ;;  %1990 = vmatprep.mubr.bf16.mxu1 %v2047_v13 }
  0x2a   :  { %1959 = vmatmul.mubr.bf16.gmra.mrb[4].mxu0 %v2048_v14  ;;  %1991 = vmatmul.mubr.bf16.gmra.mrb[4].mxu1 %v2049_v15 }
  0x2b   :  { %1962 = vmatprep.mubr.bf16.mxu0 %v2050_v16  ;;  %1994 = vmatprep.mubr.bf16.mxu1 %v2051_v17 }
  0x32   :  { %1963 = vmatmul.mubr.bf16.gmra.mrb[8].mxu0 %v2052_v18  ;;  %1995 = vmatmul.mubr.bf16.gmra.mrb[8].mxu1 %v2053_v19 }
  0x33   :  { %1966 = vmatprep.mubr.bf16.mxu0 %v2054_v20  ;;  %1998 = vmatprep.mubr.bf16.mxu1 %v2055_v21 }
  0x3a   :  { %1967 = vmatmul.mubr.bf16.gmra.mrb[12].mxu0 %v2056_v22  ;;  %1999 = vmatmul.mubr.bf16.gmra.mrb[12].mxu1 %v2057_v23 }
  0x3b   :  { %1970 = vmatprep.mubr.bf16.mxu0 %v2058_v24  ;;  %2002 = vmatprep.mubr.bf16.mxu1 %v2059_v25 }
  0x42   :  { %1971 = vmatmul.mubr.bf16.gmra.mrb[16].mxu0 %v2060_v26  ;;  %2003 = vmatmul.mubr.bf16.gmra.mrb[16].mxu1 %v2061_v27 }
  0x43   :  { %1974 = vmatprep.mubr.bf16.mxu0 %v2062_v28  ;;  %2006 = vmatprep.mubr.bf16.mxu1 %v2063_v29 }
  0x4a   :  { %1975 = vmatmul.mubr.bf16.gmra.mrb[20].mxu0 %v2064_v30  ;;  %2007 = vmatmul.mubr.bf16.gmra.mrb[20].mxu1 %v2065_v31 }
  0x4b   :  { %1978 = vmatprep.mubr.bf16.mxu0 %v2066_v32  ;;  %2010 = vmatprep.mubr.bf16.mxu1 %v2067_v33 }
  0x52   :  { %1979 = vmatmul.mubr.bf16.gmra.mrb[24].mxu0 %v2068_v34  ;;  %2011 = vmatmul.mubr.bf16.gmra.mrb[24].mxu1 %v2069_v35 }
  0x53   :  { %1982 = vmatprep.mubr.bf16.mxu0 %v2070_v36  ;;  %2014 = vmatprep.mubr.bf16.mxu1 %v2071_v37 }
  0x5a   :  { %1983 = vmatmul.mubr.bf16.gmra.mrb[28].mxu0 %v2072_v38  ;;  %2015 = vmatmul.mubr.bf16.gmra.mrb[28].mxu1 %v2073_v39 }
  0xf5   :  { %v1956_v41 = vpop.f32.mrb[0].mxu0  ;;  %v1988_v42 = vpop.f32.mrb[0].mxu1 }
  0xf6   :  { %v960_v43 = vadd.f32 %v1956_v41, %v2217_v40  ;;  %v992_v44 = vadd.f32 %v1988_v42, %v2217_v40  ;;  %v501_v45 = vpop.f32.mrb[1].mxu0  ;;  %v629_v46 = vpop.f32.mrb[1].mxu1 }
  0xf7   :  { %v958_v47 = vadd.f32 %v2217_v40, %v501_v45  ;;  %v990_v48 = vadd.f32 %v2217_v40, %v629_v46  ;;  %v1957_v49 = vpop.f32.mrb[2].mxu0  ;;  %v1989_v50 = vpop.f32.mrb[2].mxu1 }
  0xf8   :  { %vm1024_vm0 = vcmp.ge.f32.partialorder %v960_v43, 0.0  ;;  %v1088_v51 = vmul.f32 0.2, %v960_v43  ;;  %vm1056_vm1 = vcmp.ge.f32.partialorder %v992_v44, 0.0  ;;  %v1120_v52 = vmul.f32 0.2, %v992_v44 }
  0xf9   :  { %vm1022_vm2 = vcmp.ge.f32.partialorder %v958_v47, 0.0  ;;  %v1086_v53 = vmul.f32 0.2, %v958_v47  ;;  %vm1054_vm3 = vcmp.ge.f32.partialorder %v990_v48, 0.0  ;;  %v1118_v54 = vmul.f32 0.2, %v990_v48 }
  0xfa   :  { %v961_v55 = vadd.f32 %v1957_v49, %v2217_v40  ;;  %v993_v56 = vadd.f32 %v1989_v50, %v2217_v40  ;;  %v504_v57 = vpop.f32.mrb[3].mxu0  ;;  %v632_v58 = vpop.f32.mrb[3].mxu1  ;;  %v1152_v59 = vsel %vm1024_vm0, %v960_v43, %v1088_v51  ;;  %v1184_v60 = vsel %vm1056_vm1, %v992_v44, %v1120_v52 }
  0xfb   :  { %v959_v61 = vadd.f32 %v2217_v40, %v504_v57  ;;  %v991_v62 = vadd.f32 %v2217_v40, %v632_v58  ;;  %v1150_v3 = vsel %vm1022_vm2, %v958_v47, %v1086_v53  ;;  %v1182_v4 = vsel %vm1054_vm3, %v990_v48, %v1118_v54 }
  0xfc   :  { %vm1025_vm4 = vcmp.ge.f32.partialorder %v961_v55, 0.0  ;;  %v1089_v63 = vmul.f32 0.2, %v961_v55  ;;  %vm1057_vm5 = vcmp.ge.f32.partialorder %v993_v56, 0.0  ;;  %v1121_v0 = vmul.f32 0.2, %v993_v56 }
  0xfd   :  { %vm1023_vm6 = vcmp.ge.f32.partialorder %v959_v61, 0.0  ;;  %v1087_v1 = vmul.f32 0.2, %v959_v61  ;;  %vm1055_vm7 = vcmp.ge.f32.partialorder %v991_v62, 0.0  ;;  %v1119_v2 = vmul.f32 0.2, %v991_v62 }
  0xfe   :  { %v1153_v5 = vsel %vm1025_vm4, %v961_v55, %v1089_v63  ;;  %v1185_v6 = vsel %vm1057_vm5, %v993_v56, %v1121_v0  ;;  %v1960_v7 = vpop.f32.mrb[4].mxu0  ;;  %v1992_v8 = vpop.f32.mrb[4].mxu1 }
  0xff   :  { %v1715_v9 = vpack.c.bf16 %v1153_v5, %v1152_v59  ;;  %v1795_v10 = vpack.c.bf16 %v1185_v6, %v1184_v60  ;;  %v1151_v11 = vsel %vm1023_vm6, %v959_v61, %v1087_v1  ;;  %v1183_v12 = vsel %vm1055_vm7, %v991_v62, %v1119_v2  ;;  %v517_v13 = vpop.f32.mrb[5].mxu0  ;;  %v645_v14 = vpop.f32.mrb[5].mxu1 }
 0x100   :  { %v1710_v15 = vpack.c.bf16 %v1151_v11, %v1150_v3  ;;  %v1790_v16 = vpack.c.bf16 %v1183_v12, %v1182_v4  ;;  %v964_v17 = vadd.f32 %v1960_v7, %v2217_v40  ;;  %v996_v18 = vadd.f32 %v1992_v8, %v2217_v40  ;;  %v1961_v19 = vpop.f32.mrb[6].mxu0  ;;  %v1993_v20 = vpop.f32.mrb[6].mxu1 }
 0x101   :  { %1867 = vst [vmem:[%s2391_s3 + $0x8] sm:$0xff] %v1715_v9   ;;  %1883 = vst [vmem:[%s2391_s3 + $0x88] sm:$0xff] %v1795_v10   ;;  %v962_v21 = vadd.f32 %v2217_v40, %v517_v13  ;;  %v994_v22 = vadd.f32 %v2217_v40, %v645_v14  ;;  %v965_v23 = vadd.f32 %v1961_v19, %v2217_v40  ;;  %v520_v25 = vpop.f32.mrb[7].mxu0  ;;  %v648_v26 = vpop.f32.mrb[7].mxu1 }
 0x102   :  { %v997_v24 = vadd.f32 %v1993_v20, %v2217_v40  ;;  %1711 = vst [vmem:[%s2391_s3] sm:$0xff] %v1710_v15   ;;  %1882 = vst [vmem:[%s2391_s3 + $0x80] sm:$0xff] %v1790_v16   ;;  %vm1028_vm8 = vcmp.ge.f32.partialorder %v964_v17, 0.0  ;;  %v1092_v27 = vmul.f32 0.2, %v964_v17  ;;  %vm1060_vm9 = vcmp.ge.f32.partialorder %v996_v18, 0.0 }
 0x103   :  { %v1124_v28 = vmul.f32 0.2, %v996_v18  ;;  %vm1026_vm10 = vcmp.ge.f32.partialorder %v962_v21, 0.0  ;;  %v1090_v29 = vmul.f32 0.2, %v962_v21  ;;  %vm1058_vm11 = vcmp.ge.f32.partialorder %v994_v22, 0.0 }
 0x104   :  { %v1122_v30 = vmul.f32 0.2, %v994_v22  ;;  %v1156_v31 = vsel %vm1028_vm8, %v964_v17, %v1092_v27  ;;  %vm1029_vm12 = vcmp.ge.f32.partialorder %v965_v23, 0.0  ;;  %v1093_v33 = vmul.f32 0.2, %v965_v23 }
 0x105   :  { %v1188_v32 = vsel %vm1060_vm9, %v996_v18, %v1124_v28  ;;  %v1154_v34 = vsel %vm1026_vm10, %v962_v21, %v1090_v29  ;;  %vm1061_vm13 = vcmp.ge.f32.partialorder %v997_v24, 0.0  ;;  %v1125_v36 = vmul.f32 0.2, %v997_v24  ;;  %v1964_v37 = vpop.f32.mrb[8].mxu0  ;;  %v1996_v38 = vpop.f32.mrb[8].mxu1 }
 0x106   :  { %v1186_v35 = vsel %vm1058_vm11, %v994_v22, %v1122_v30  ;;  %v1157_v39 = vsel %vm1029_vm12, %v965_v23, %v1093_v33  ;;  %v963_v41 = vadd.f32 %v2217_v40, %v520_v25  ;;  %v995_v42 = vadd.f32 %v2217_v40, %v648_v26  ;;  %v533_v44 = vpop.f32.mrb[9].mxu0  ;;  %v661_v45 = vpop.f32.mrb[9].mxu1 }
 0x107   :  { %v968_v43 = vadd.f32 %v1964_v37, %v2217_v40  ;;  %v1725_v46 = vpack.c.bf16 %v1157_v39, %v1156_v31  ;;  %v1189_v47 = vsel %vm1061_vm13, %v997_v24, %v1125_v36  ;;  %v1000_v48 = vadd.f32 %v1996_v38, %v2217_v40  ;;  %v1965_v50 = vpop.f32.mrb[10].mxu0  ;;  %v1997_v51 = vpop.f32.mrb[10].mxu1 }
 0x108   :  { %v966_v49 = vadd.f32 %v2217_v40, %v533_v44  ;;  %v1805_v52 = vpack.c.bf16 %v1189_v47, %v1188_v32  ;;  %vm1027_vm14 = vcmp.ge.f32.partialorder %v963_v41, 0.0  ;;  %v1091_v53 = vmul.f32 0.2, %v963_v41  ;;  %v536_v54 = vpop.f32.mrb[11].mxu0  ;;  %v664_v55 = vpop.f32.mrb[11].mxu1 }
 0x109   :  { %vm1059_vm15 = vcmp.ge.f32.partialorder %v995_v42, 0.0  ;;  %1869 = vst [vmem:[%s2391_s3 + $0x18] sm:$0xff] %v1725_v46   ;;  %v1123_v56 = vmul.f32 0.2, %v995_v42  ;;  %vm1032_vm0 = vcmp.ge.f32.partialorder %v968_v43, 0.0  ;;  %vm1064_vm1 = vcmp.ge.f32.partialorder %v1000_v48, 0.0 }
 0x10a   :  { %v1096_v57 = vmul.f32 0.2, %v968_v43  ;;  %1885 = vst [vmem:[%s2391_s3 + $0x98] sm:$0xff] %v1805_v52   ;;  %v1155_v58 = vsel %vm1027_vm14, %v963_v41, %v1091_v53  ;;  %v1128_v59 = vmul.f32 0.2, %v1000_v48  ;;  %vm1030_vm2 = vcmp.ge.f32.partialorder %v966_v49, 0.0 }
 0x10b   :  { %v1094_v60 = vmul.f32 0.2, %v966_v49  ;;  %v1720_v61 = vpack.c.bf16 %v1155_v58, %v1154_v34  ;;  %v1187_v62 = vsel %vm1059_vm15, %v995_v42, %v1123_v56  ;;  %v998_v0 = vadd.f32 %v2217_v40, %v661_v45 }
 0x10c   :  { %v1160_v63 = vsel %vm1032_vm0, %v968_v43, %v1096_v57  ;;  %v1800_v1 = vpack.c.bf16 %v1187_v62, %v1186_v35  ;;  %v1192_v2 = vsel %vm1064_vm1, %v1000_v48, %v1128_v59  ;;  %v969_v4 = vadd.f32 %v1965_v50, %v2217_v40 }
 0x10d   :  { %v1158_v3 = vsel %vm1030_vm2, %v966_v49, %v1094_v60  ;;  %1868 = vst [vmem:[%s2391_s3 + $0x10] sm:$0xff] %v1720_v61   ;;  %vm1062_vm3 = vcmp.ge.f32.partialorder %v998_v0, 0.0  ;;  %v1126_v5 = vmul.f32 0.2, %v998_v0  ;;  %v1001_v6 = vadd.f32 %v1997_v51, %v2217_v40  ;;  %v1968_v8 = vpop.f32.mrb[12].mxu0  ;;  %v2000_v9 = vpop.f32.mrb[12].mxu1 }
 0x10e   :  { %v967_v7 = vadd.f32 %v2217_v40, %v536_v54  ;;  %1884 = vst [vmem:[%s2391_s3 + $0x90] sm:$0xff] %v1800_v1   ;;  %vm1033_vm4 = vcmp.ge.f32.partialorder %v969_v4, 0.0  ;;  %v1097_v10 = vmul.f32 0.2, %v969_v4  ;;  %v999_v11 = vadd.f32 %v2217_v40, %v664_v55  ;;  %v549_v13 = vpop.f32.mrb[13].mxu0  ;;  %v677_v14 = vpop.f32.mrb[13].mxu1 }
 0x10f   :  { %v972_v12 = vadd.f32 %v1968_v8, %v2217_v40  ;;  %v1190_v15 = vsel %vm1062_vm3, %v998_v0, %v1126_v5  ;;  %vm1065_vm5 = vcmp.ge.f32.partialorder %v1001_v6, 0.0  ;;  %v1129_v16 = vmul.f32 0.2, %v1001_v6  ;;  %v1969_v17 = vpop.f32.mrb[14].mxu0  ;;  %v2001_v18 = vpop.f32.mrb[14].mxu1 }
 0x110   :  { %vm1031_vm6 = vcmp.ge.f32.partialorder %v967_v7, 0.0  ;;  %v1161_v19 = vsel %vm1033_vm4, %v969_v4, %v1097_v10  ;;  %v1095_v20 = vmul.f32 0.2, %v967_v7  ;;  %vm1063_vm7 = vcmp.ge.f32.partialorder %v999_v11, 0.0  ;;  %v552_v22 = vpop.f32.mrb[15].mxu0  ;;  %v680_v26 = vpop.f32.mrb[15].mxu1 }
 0x111   :  { %v1127_v21 = vmul.f32 0.2, %v999_v11  ;;  %v1735_v23 = vpack.c.bf16 %v1161_v19, %v1160_v63  ;;  %v1193_v24 = vsel %vm1065_vm5, %v1001_v6, %v1129_v16  ;;  %vm1036_vm8 = vcmp.ge.f32.partialorder %v972_v12, 0.0 }
 0x112   :  { %v1100_v25 = vmul.f32 0.2, %v972_v12  ;;  %v1815_v27 = vpack.c.bf16 %v1193_v24, %v1192_v2  ;;  %v1159_v28 = vsel %vm1031_vm6, %v967_v7, %v1095_v20  ;;  %v1004_v30 = vadd.f32 %v2000_v9, %v2217_v40 }
 0x113   :  { %v1191_v29 = vsel %vm1063_vm7, %v999_v11, %v1127_v21  ;;  %1871 = vst [vmem:[%s2391_s3 + $0x28] sm:$0xff] %v1735_v23   ;;  %v1730_v31 = vpack.c.bf16 %v1159_v28, %v1158_v3  ;;  %v970_v34 = vadd.f32 %v2217_v40, %v549_v13  ;;  %v1002_v36 = vadd.f32 %v2217_v40, %v677_v14 }
 0x114   :  { %v1810_v32 = vpack.c.bf16 %v1191_v29, %v1190_v15  ;;  %v1164_v33 = vsel %vm1036_vm8, %v972_v12, %v1100_v25  ;;  %1887 = vst [vmem:[%s2391_s3 + $0xa8] sm:$0xff] %v1815_v27   ;;  %vm1068_vm9 = vcmp.ge.f32.partialorder %v1004_v30, 0.0  ;;  %v1132_v35 = vmul.f32 0.2, %v1004_v30 }
 0x115   :  { %v973_v37 = vadd.f32 %v1969_v17, %v2217_v40  ;;  %1870 = vst [vmem:[%s2391_s3 + $0x20] sm:$0xff] %v1730_v31   ;;  %vm1034_vm10 = vcmp.ge.f32.partialorder %v970_v34, 0.0  ;;  %v1098_v38 = vmul.f32 0.2, %v970_v34  ;;  %v1005_v39 = vadd.f32 %v2001_v18, %v2217_v40  ;;  %v1972_v42 = vpop.f32.mrb[16].mxu0  ;;  %v2004_v43 = vpop.f32.mrb[16].mxu1 }
 0x116   :  { %1886 = vst [vmem:[%s2391_s3 + $0xa0] sm:$0xff] %v1810_v32   ;;  %v971_v41 = vadd.f32 %v2217_v40, %v552_v22  ;;  %v1196_v44 = vsel %vm1068_vm9, %v1004_v30, %v1132_v35  ;;  %vm1066_vm11 = vcmp.ge.f32.partialorder %v1002_v36, 0.0  ;;  %v1130_v45 = vmul.f32 0.2, %v1002_v36  ;;  %v565_v46 = vpop.f32.mrb[17].mxu0  ;;  %v693_v47 = vpop.f32.mrb[17].mxu1 }
 0x117   :  { %vm1037_vm12 = vcmp.ge.f32.partialorder %v973_v37, 0.0  ;;  %v1162_v48 = vsel %vm1034_vm10, %v970_v34, %v1098_v38  ;;  %v1101_v49 = vmul.f32 0.2, %v973_v37  ;;  %vm1069_vm13 = vcmp.ge.f32.partialorder %v1005_v39, 0.0  ;;  %v1973_v51 = vpop.f32.mrb[18].mxu0  ;;  %v2005_v55 = vpop.f32.mrb[18].mxu1 }
 0x118   :  { %v1133_v50 = vmul.f32 0.2, %v1005_v39  ;;  %v1194_v52 = vsel %vm1066_vm11, %v1002_v36, %v1130_v45  ;;  %vm1035_vm14 = vcmp.ge.f32.partialorder %v971_v41, 0.0  ;;  %v1099_v53 = vmul.f32 0.2, %v971_v41  ;;  %v568_v56 = vpop.f32.mrb[19].mxu0 }
 0x119   :  { %v1003_v54 = vadd.f32 %v2217_v40, %v680_v26  ;;  %v1165_v57 = vsel %vm1037_vm12, %v973_v37, %v1101_v49  ;;  %v976_v59 = vadd.f32 %v1972_v42, %v2217_v40  ;;  %v1008_v60 = vadd.f32 %v2004_v43, %v2217_v40  ;;  %v696_v61 = vpop.f32.mrb[19].mxu1 }
 0x11a   :  { %v1197_v58 = vsel %vm1069_vm13, %v1005_v39, %v1133_v50  ;;  %v1745_v62 = vpack.c.bf16 %v1165_v57, %v1164_v33  ;;  %v1163_v0 = vsel %vm1035_vm14, %v971_v41, %v1099_v53  ;;  %v974_v5 = vadd.f32 %v2217_v40, %v565_v46 }
 0x11b   :  { %v1825_v63 = vpack.c.bf16 %v1197_v58, %v1196_v44  ;;  %vm1067_vm15 = vcmp.ge.f32.partialorder %v1003_v54, 0.0  ;;  %v1740_v1 = vpack.c.bf16 %v1163_v0, %v1162_v48  ;;  %v1131_v2 = vmul.f32 0.2, %v1003_v54 }
 0x11c   :  { %vm1040_vm0 = vcmp.ge.f32.partialorder %v976_v59, 0.0  ;;  %v1104_v3 = vmul.f32 0.2, %v976_v59  ;;  %1873 = vst [vmem:[%s2391_s3 + $0x38] sm:$0xff] %v1745_v62   ;;  %vm1072_vm1 = vcmp.ge.f32.partialorder %v1008_v60, 0.0  ;;  %v1006_v6 = vadd.f32 %v2217_v40, %v693_v47 }
 0x11d   :  { %1889 = vst [vmem:[%s2391_s3 + $0xb8] sm:$0xff] %v1825_v63   ;;  %v1136_v4 = vmul.f32 0.2, %v1008_v60  ;;  %1872 = vst [vmem:[%s2391_s3 + $0x30] sm:$0xff] %v1740_v1   ;;  %v1195_v7 = vsel %vm1067_vm15, %v1003_v54, %v1131_v2  ;;  %v977_v9 = vadd.f32 %v1973_v51, %v2217_v40  ;;  %v1009_v10 = vadd.f32 %v2005_v55, %v2217_v40  ;;  %v1976_v11 = vpop.f32.mrb[20].mxu0  ;;  %v2008_v12 = vpop.f32.mrb[20].mxu1 }
 0x11e   :  { %v1168_v8 = vsel %vm1040_vm0, %v976_v59, %v1104_v3  ;;  %v1820_v13 = vpack.c.bf16 %v1195_v7, %v1194_v52  ;;  %vm1038_vm2 = vcmp.ge.f32.partialorder %v974_v5, 0.0  ;;  %v1102_v15 = vmul.f32 0.2, %v974_v5  ;;  %v581_v16 = vpop.f32.mrb[21].mxu0  ;;  %v709_v17 = vpop.f32.mrb[21].mxu1 }
 0x11f   :  { %v1200_v14 = vsel %vm1072_vm1, %v1008_v60, %v1136_v4  ;;  %vm1070_vm3 = vcmp.ge.f32.partialorder %v1006_v6, 0.0  ;;  %v1134_v18 = vmul.f32 0.2, %v1006_v6  ;;  %vm1041_vm4 = vcmp.ge.f32.partialorder %v977_v9, 0.0  ;;  %v1977_v23 = vpop.f32.mrb[22].mxu0  ;;  %v2009_v24 = vpop.f32.mrb[22].mxu1 }
 0x120   :  { %v1105_v19 = vmul.f32 0.2, %v977_v9  ;;  %1888 = vst [vmem:[%s2391_s3 + $0xb0] sm:$0xff] %v1820_v13   ;;  %v1166_v20 = vsel %vm1038_vm2, %v974_v5, %v1102_v15  ;;  %vm1073_vm5 = vcmp.ge.f32.partialorder %v1009_v10, 0.0  ;;  %v1137_v21 = vmul.f32 0.2, %v1009_v10 }
 0x121   :  { %v975_v22 = vadd.f32 %v2217_v40, %v568_v56  ;;  %v1198_v25 = vsel %vm1070_vm3, %v1006_v6, %v1134_v18  ;;  %v1007_v27 = vadd.f32 %v2217_v40, %v696_v61  ;;  %v980_v28 = vadd.f32 %v1976_v11, %v2217_v40  ;;  %v584_v29 = vpop.f32.mrb[23].mxu0  ;;  %v712_v30 = vpop.f32.mrb[23].mxu1 }
 0x122   :  { %v1169_v26 = vsel %vm1041_vm4, %v977_v9, %v1105_v19  ;;  %v1201_v32 = vsel %vm1073_vm5, %v1009_v10, %v1137_v21  ;;  %v1012_v38 = vadd.f32 %v2008_v12, %v2217_v40  ;;  %v978_v39 = vadd.f32 %v2217_v40, %v581_v16 }
 0x123   :  { %v1755_v31 = vpack.c.bf16 %v1169_v26, %v1168_v8  ;;  %vm1039_vm6 = vcmp.ge.f32.partialorder %v975_v22, 0.0  ;;  %v1103_v33 = vmul.f32 0.2, %v975_v22  ;;  %v1835_v34 = vpack.c.bf16 %v1201_v32, %v1200_v14 }
 0x124   :  { %vm1071_vm7 = vcmp.ge.f32.partialorder %v1007_v27, 0.0  ;;  %v1135_v35 = vmul.f32 0.2, %v1007_v27  ;;  %vm1044_vm8 = vcmp.ge.f32.partialorder %v980_v28, 0.0  ;;  %v1108_v37 = vmul.f32 0.2, %v980_v28 }
 0x125   :  { %1875 = vst [vmem:[%s2391_s3 + $0x48] sm:$0xff] %v1755_v31   ;;  %v1167_v36 = vsel %vm1039_vm6, %v975_v22, %v1103_v33  ;;  %1891 = vst [vmem:[%s2391_s3 + $0xc8] sm:$0xff] %v1835_v34   ;;  %v1010_v43 = vadd.f32 %v2217_v40, %v709_v17  ;;  %v981_v44 = vadd.f32 %v1977_v23, %v2217_v40  ;;  %v1980_v45 = vpop.f32.mrb[24].mxu0  ;;  %v2012_v46 = vpop.f32.mrb[24].mxu1  ;;  %vm1076_vm9 = vcmp.ge.f32.partialorder %v1012_v38, 0.0 }
 0x126   :  { %v1750_v41 = vpack.c.bf16 %v1167_v36, %v1166_v20  ;;  %v1199_v42 = vsel %vm1071_vm7, %v1007_v27, %v1135_v35  ;;  %v1140_v48 = vmul.f32 0.2, %v1012_v38  ;;  %v597_v49 = vpop.f32.mrb[25].mxu0  ;;  %v725_v50 = vpop.f32.mrb[25].mxu1  ;;  %v1172_v51 = vsel %vm1044_vm8, %v980_v28, %v1108_v37 }
 0x127   :  { %v1830_v47 = vpack.c.bf16 %v1199_v42, %v1198_v25  ;;  %vm1042_vm10 = vcmp.ge.f32.partialorder %v978_v39, 0.0  ;;  %v1106_v52 = vmul.f32 0.2, %v978_v39  ;;  %v1138_v53 = vmul.f32 0.2, %v1010_v43  ;;  %v1981_v56 = vpop.f32.mrb[26].mxu0 }
 0x128   :  { %1874 = vst [vmem:[%s2391_s3 + $0x40] sm:$0xff] %v1750_v41   ;;  %vm1074_vm11 = vcmp.ge.f32.partialorder %v1010_v43, 0.0  ;;  %vm1045_vm12 = vcmp.ge.f32.partialorder %v981_v44, 0.0  ;;  %v1109_v54 = vmul.f32 0.2, %v981_v44  ;;  %v1013_v55 = vadd.f32 %v2009_v24, %v2217_v40  ;;  %v2013_v57 = vpop.f32.mrb[26].mxu1 }
 0x129   :  { %1890 = vst [vmem:[%s2391_s3 + $0xc0] sm:$0xff] %v1830_v47   ;;  %v1204_v58 = vsel %vm1076_vm9, %v1012_v38, %v1140_v48  ;;  %v1170_v59 = vsel %vm1042_vm10, %v978_v39, %v1106_v52  ;;  %v979_v60 = vadd.f32 %v2217_v40, %v584_v29  ;;  %v1011_v61 = vadd.f32 %v2217_v40, %v712_v30  ;;  %v600_v62 = vpop.f32.mrb[27].mxu0  ;;  %v728_v63 = vpop.f32.mrb[27].mxu1 }
 0x12a   :  { %v1173_v0 = vsel %vm1045_vm12, %v981_v44, %v1109_v54  ;;  %vm1077_vm13 = vcmp.ge.f32.partialorder %v1013_v55, 0.0  ;;  %v1141_v1 = vmul.f32 0.2, %v1013_v55  ;;  %v984_v2 = vadd.f32 %v1980_v45, %v2217_v40 }
 0x12b   :  { %v1765_v3 = vpack.c.bf16 %v1173_v0, %v1172_v51  ;;  %vm1043_vm14 = vcmp.ge.f32.partialorder %v979_v60, 0.0  ;;  %v1107_v4 = vmul.f32 0.2, %v979_v60  ;;  %vm1075_vm15 = vcmp.ge.f32.partialorder %v1011_v61, 0.0 }
 0x12c   :  { %v1205_v5 = vsel %vm1077_vm13, %v1013_v55, %v1141_v1  ;;  %v1139_v6 = vmul.f32 0.2, %v1011_v61  ;;  %vm1048_vm0 = vcmp.ge.f32.partialorder %v984_v2, 0.0  ;;  %v1112_v7 = vmul.f32 0.2, %v984_v2 }
 0x12d   :  { %1877 = vst [vmem:[%s2391_s3 + $0x58] sm:$0xff] %v1765_v3   ;;  %v1845_v8 = vpack.c.bf16 %v1205_v5, %v1204_v58  ;;  %v1171_v9 = vsel %vm1043_vm14, %v979_v60, %v1107_v4  ;;  %v1016_v10 = vadd.f32 %v2012_v46, %v2217_v40  ;;  %v982_v11 = vadd.f32 %v2217_v40, %v597_v49  ;;  %v1984_v12 = vpop.f32.mrb[28].mxu0  ;;  %v2016_v13 = vpop.f32.mrb[28].mxu1 }
 0x12e   :  { %v1202_v14 = vsel %vm1074_vm11, %v1010_v43, %v1138_v53  ;;  %v1760_v15 = vpack.c.bf16 %v1171_v9, %v1170_v59  ;;  %v1203_v16 = vsel %vm1075_vm15, %v1011_v61, %v1139_v6  ;;  %v1014_v17 = vadd.f32 %v2217_v40, %v725_v50  ;;  %v613_v18 = vpop.f32.mrb[29].mxu0  ;;  %v741_v19 = vpop.f32.mrb[29].mxu1 }
 0x12f   :  { %1893 = vst [vmem:[%s2391_s3 + $0xd8] sm:$0xff] %v1845_v8   ;;  %v1840_v20 = vpack.c.bf16 %v1203_v16, %v1202_v14  ;;  %vm1080_vm1 = vcmp.ge.f32.partialorder %v1016_v10, 0.0  ;;  %v1144_v21 = vmul.f32 0.2, %v1016_v10  ;;  %vm1046_vm2 = vcmp.ge.f32.partialorder %v982_v11, 0.0  ;;  %v1985_v22 = vpop.f32.mrb[30].mxu0 }
 0x130   :  { %v2017_v23 = vpop.f32.mrb[30].mxu1  ;;  %1876 = vst [vmem:[%s2391_s3 + $0x50] sm:$0xff] %v1760_v15   ;;  %v1176_v24 = vsel %vm1048_vm0, %v984_v2, %v1112_v7  ;;  %v1110_v25 = vmul.f32 0.2, %v982_v11  ;;  %vm1078_vm3 = vcmp.ge.f32.partialorder %v1014_v17, 0.0  ;;  %v985_v26 = vadd.f32 %v1981_v56, %v2217_v40  ;;  %v616_v27 = vpop.f32.mrb[31].mxu0 }
 0x131   :  { %1892 = vst [vmem:[%s2391_s3 + $0xd0] sm:$0xff] %v1840_v20   ;;  %v1142_v28 = vmul.f32 0.2, %v1014_v17  ;;  %v1017_v29 = vadd.f32 %v2013_v57, %v2217_v40  ;;  %v983_v30 = vadd.f32 %v2217_v40, %v600_v62  ;;  %v1015_v31 = vadd.f32 %v2217_v40, %v728_v63  ;;  %v744_v32 = vpop.f32.mrb[31].mxu1 }
 0x132   :  { %v1208_v33 = vsel %vm1080_vm1, %v1016_v10, %v1144_v21  ;;  %v1174_v34 = vsel %vm1046_vm2, %v982_v11, %v1110_v25  ;;  %vm1049_vm4 = vcmp.ge.f32.partialorder %v985_v26, 0.0  ;;  %v1113_v35 = vmul.f32 0.2, %v985_v26 }
 0x133   :  { %vm1081_vm5 = vcmp.ge.f32.partialorder %v1017_v29, 0.0  ;;  %v1145_v36 = vmul.f32 0.2, %v1017_v29  ;;  %vm1047_vm6 = vcmp.ge.f32.partialorder %v983_v30, 0.0  ;;  %v1111_v37 = vmul.f32 0.2, %v983_v30 }
 0x134   :  { %v1177_v38 = vsel %vm1049_vm4, %v985_v26, %v1113_v35  ;;  %vm1079_vm7 = vcmp.ge.f32.partialorder %v1015_v31, 0.0  ;;  %v1143_v39 = vmul.f32 0.2, %v1015_v31  ;;  %v988_v41 = vadd.f32 %v1984_v12, %v2217_v40 }
 0x135   :  { %v1775_v42 = vpack.c.bf16 %v1177_v38, %v1176_v24  ;;  %v1209_v43 = vsel %vm1081_vm5, %v1017_v29, %v1145_v36  ;;  %v1175_v44 = vsel %vm1047_vm6, %v983_v30, %v1111_v37  ;;  %v1020_v45 = vadd.f32 %v2016_v13, %v2217_v40 }
 0x136   :  { %v1206_v46 = vsel %vm1078_vm3, %v1014_v17, %v1142_v28  ;;  %v1855_v47 = vpack.c.bf16 %v1209_v43, %v1208_v33  ;;  %v1770_v48 = vpack.c.bf16 %v1175_v44, %v1174_v34  ;;  %v1207_v49 = vsel %vm1079_vm7, %v1015_v31, %v1143_v39 }
 0x137   :  { %1879 = vst [vmem:[%s2391_s3 + $0x68] sm:$0xff] %v1775_v42   ;;  %v1850_v50 = vpack.c.bf16 %v1207_v49, %v1206_v46  ;;  %vm1052_vm8 = vcmp.ge.f32.partialorder %v988_v41, 0.0  ;;  %v1116_v51 = vmul.f32 0.2, %v988_v41  ;;  %v1148_v52 = vmul.f32 0.2, %v1020_v45 }
 0x138   :  { %1895 = vst [vmem:[%s2391_s3 + $0xe8] sm:$0xff] %v1855_v47   ;;  %1878 = vst [vmem:[%s2391_s3 + $0x60] sm:$0xff] %v1770_v48   ;;  %v986_v53 = vadd.f32 %v2217_v40, %v613_v18  ;;  %v1018_v54 = vadd.f32 %v2217_v40, %v741_v19  ;;  %v989_v55 = vadd.f32 %v1985_v22, %v2217_v40  ;;  %vm1084_vm9 = vcmp.ge.f32.partialorder %v1020_v45, 0.0 }
 0x139   :  { %v1021_v56 = vadd.f32 %v2017_v23, %v2217_v40  ;;  %1894 = vst [vmem:[%s2391_s3 + $0xe0] sm:$0xff] %v1850_v50   ;;  %v987_v57 = vadd.f32 %v2217_v40, %v616_v27  ;;  %v1019_v58 = vadd.f32 %v2217_v40, %v744_v32  ;;  %v1180_v59 = vsel %vm1052_vm8, %v988_v41, %v1116_v51 }
 0x13a   :  { %vm1050_vm10 = vcmp.ge.f32.partialorder %v986_v53, 0.0  ;;  %v1114_v60 = vmul.f32 0.2, %v986_v53  ;;  %v1146_v61 = vmul.f32 0.2, %v1018_v54  ;;  %vm1053_vm11 = vcmp.ge.f32.partialorder %v989_v55, 0.0 }
 0x13b   :  { %v1117_v62 = vmul.f32 0.2, %v989_v55  ;;  %vm1085_vm12 = vcmp.ge.f32.partialorder %v1021_v56, 0.0  ;;  %v1149_v63 = vmul.f32 0.2, %v1021_v56  ;;  %v1212_v0 = vsel %vm1084_vm9, %v1020_v45, %v1148_v52 }
 0x13c   :  { %vm1082_vm13 = vcmp.ge.f32.partialorder %v1018_v54, 0.0  ;;  %vm1051_vm14 = vcmp.ge.f32.partialorder %v987_v57, 0.0  ;;  %v1115_v1 = vmul.f32 0.2, %v987_v57  ;;  %vm1083_vm15 = vcmp.ge.f32.partialorder %v1019_v58, 0.0 }
 0x13d   :  { %v1181_v2 = vsel %vm1053_vm11, %v989_v55, %v1117_v62  ;;  %v1213_v3 = vsel %vm1085_vm12, %v1021_v56, %v1149_v63  ;;  %v1147_v4 = vmul.f32 0.2, %v1019_v58  ;;  %v1178_v5 = vsel %vm1050_vm10, %v986_v53, %v1114_v60 }
 0x13e   :  { %v1785_v6 = vpack.c.bf16 %v1181_v2, %v1180_v59  ;;  %v1865_v7 = vpack.c.bf16 %v1213_v3, %v1212_v0  ;;  %v1179_v40 = vsel %vm1051_vm14, %v987_v57, %v1115_v1  ;;  %v1210_v8 = vsel %vm1082_vm13, %v1018_v54, %v1146_v61 }
 0x13f   :  { %v1780_v9 = vpack.c.bf16 %v1179_v40, %v1178_v5  ;;  %v1211_v10 = vsel %vm1083_vm15, %v1019_v58, %v1147_v4 }
 0x140   :  { %1881 = vst [vmem:[%s2391_s3 + $0x78] sm:$0xff] %v1785_v6   ;;  %1897 = vst [vmem:[%s2391_s3 + $0xf8] sm:$0xff] %v1865_v7   ;;  %v1860_v11 = vpack.c.bf16 %v1211_v10, %v1210_v8 }
 0x141   :  { %1880 = vst [vmem:[%s2391_s3 + $0x70] sm:$0xff] %v1780_v9  }
 0x142   :  { %1896 = vst [vmem:[%s2391_s3 + $0xf0] sm:$0xff] %v1860_v11  }

// kernel: _lambda_.10
= control target key start
LH: loop header
LB: loop body
LE: loop exit
PB: predicated region body
PF: predicated region fallthrough
CT: control target
= control target key end

     0   :  { %s496_s6 = smov 0   ;;  %s498_s7 = smov 0   ;;  %s536_s0 = inlined_call_operand.vmem [shape: bf16[2,64,128], index: 0, kind: input, shape index: {}]   ;;  %s537_s1 = inlined_call_operand.vmem [shape: bf16[2,64,128], index: 1, kind: output, shape index: {}]  }
   0x1   :  { %s500_s8 = smov 0  }
   0x2 LB: > { %s23_s9 = sadd.s32 1, %s480_s7  ;;  %p369_p0 = scmp.ge.s32.totalorder %s484_s8, 1  ;;  %s484_s8 = sphi %s500_s8, %s11_s8   ;;  %s480_s7 = sphi %s498_s7, %s539_s7   ;;  %s476_s6 = sphi %s496_s6, %s538_s6  }
   0x3   : > { %p25_p1 = scmp.ge.s32.totalorder %s23_s9, 2  ;;  %p106_p2 = scmp.lt.s32.totalorder %s484_s8, 3 }
   0x5   : > { %s541_s9 = smov (%p25_p1, %s23_s9), 0  ;;  %p107_p3 = pnand %p369_p0, %p106_p2 }
   0x6   : > { %p132_p4 = scmp.lt.s32.totalorder (!%p107_p3), %s476_s6, 1 }
   0x7   : > { %110 = sbr.rel (%p107_p3) target bundleno = 106 (0x6a), region = 24 }
   0xe   : > { %s543_s6 = smov (!%p132_p4, %s476_s6), 1 }
   0xf   : > { %s384_s10 = sshll.u32 %s543_s6, 5 }
  0x10   : > { %s139_s13 = scalar_lea.vmem %s536_s0, %s384_s10  ;;  %s147_s16 = scalar_lea.vmem %s537_s1, %s384_s10 }
  0x11   : > { %v395_v0 = vld [vmem:[%s139_s13] sm:$0xff]   ;;  %v430_v1 = vld [vmem:[%s139_s13 + $0x8] sm:$0xff]   ;;  %v431_v5 = vld [vmem:[%s139_s13 + $0x10] sm:$0xff]  }
  0x12   : > { %v396_v2 = vunpack.c.l.bf16 %v395_v0  ;;  %v397_v3 = vunpack.c.h.bf16 %v395_v0  ;;  %v400_v4 = vunpack.c.l.bf16 %v430_v1  ;;  %v401_v6 = vunpack.c.h.bf16 %v430_v1  ;;  %v432_v10 = vld [vmem:[%s139_s13 + $0x18] sm:$0xff]  }
  0x13   : > { %v404_v8 = vunpack.c.l.bf16 %v431_v5  ;;  %v405_v11 = vunpack.c.h.bf16 %v431_v5  ;;  %v408_v13 = vunpack.c.l.bf16 %v432_v10  ;;  %v409_v15 = vunpack.c.h.bf16 %v432_v10 }
  0x14   : > { %v164_v7 = vadd.f32 %v397_v3, %v396_v2 }
  0x16   : > { %v165_v9 = vadd.f32 %v400_v4, %v164_v7 }
  0x18   : > { %v166_v12 = vadd.f32 %v401_v6, %v165_v9 }
  0x1a   : > { %v167_v14 = vadd.f32 %v404_v8, %v166_v12 }
  0x1c   : > { %v168_v16 = vadd.f32 %v405_v11, %v167_v14 }
  0x1e   : > { %v169_v17 = vadd.f32 %v408_v13, %v168_v16 }
  0x20   : > { %v170_v18 = vadd.f32 %v409_v15, %v169_v17 }
  0x22   : > { %v171_v19 = vrot.slane %v170_v18, 4 }
  0x24   : > { %v172_v20 = vadd.f32 %v171_v19, %v170_v18 }
  0x26   : > { %v173_v21 = vrot.slane %v172_v20, 2 }
  0x28   : > { %v174_v22 = vadd.f32 %v173_v21, %v172_v20 }
  0x2a   : > { %v175_v23 = vrot.slane %v174_v22, 1 }
  0x2c   : > { %v176_v24 = vadd.f32 %v175_v23, %v174_v22 }
  0x2e   : > { %v177_v25 = vmul.f32 0.015625, %v176_v24 }
  0x30   : > { %v178_v26 = vsub.f32 %v396_v2, %v177_v25  ;;  %v179_v27 = vsub.f32 %v397_v3, %v177_v25  ;;  %v180_v28 = vsub.f32 %v400_v4, %v177_v25  ;;  %v181_v29 = vsub.f32 %v401_v6, %v177_v25 }
  0x31   : > { %v182_v30 = vsub.f32 %v404_v8, %v177_v25  ;;  %v183_v34 = vsub.f32 %v405_v11, %v177_v25  ;;  %v184_v37 = vsub.f32 %v408_v13, %v177_v25  ;;  %v185_v40 = vsub.f32 %v409_v15, %v177_v25 }
  0x32   : > { %v186_v31 = vmul.f32 %v178_v26, %v178_v26  ;;  %v187_v32 = vmul.f32 %v179_v27, %v179_v27  ;;  %v188_v33 = vmul.f32 %v180_v28, %v180_v28  ;;  %v189_v35 = vmul.f32 %v181_v29, %v181_v29 }
  0x33   : > { %v190_v38 = vmul.f32 %v182_v30, %v182_v30  ;;  %v191_v41 = vmul.f32 %v183_v34, %v183_v34  ;;  %v192_v43 = vmul.f32 %v184_v37, %v184_v37  ;;  %v193_v45 = vmul.f32 %v185_v40, %v185_v40 }
  0x34   : > { %v194_v36 = vadd.f32 %v187_v32, %v186_v31 }
  0x36   : > { %v195_v39 = vadd.f32 %v194_v36, %v188_v33 }
  0x38   : > { %v196_v42 = vadd.f32 %v195_v39, %v189_v35 }
  0x3a   : > { %v197_v44 = vadd.f32 %v196_v42, %v190_v38 }
  0x3c   : > { %v198_v46 = vadd.f32 %v197_v44, %v191_v41 }
  0x3e   : > { %v199_v47 = vadd.f32 %v198_v46, %v192_v43 }
  0x40   : > { %v200_v48 = vadd.f32 %v199_v47, %v193_v45 }
  0x42   : > { %v201_v49 = vrot.slane %v200_v48, 4 }
  0x44   : > { %v202_v50 = vadd.f32 %v201_v49, %v200_v48 }
  0x46   : > { %v203_v51 = vrot.slane %v202_v50, 2 }
  0x48   : > { %v204_v52 = vadd.f32 %v203_v51, %v202_v50 }
  0x4a   : > { %v205_v53 = vrot.slane %v204_v52, 1 }
  0x4c   : > { %v206_v54 = vadd.f32 %v205_v53, %v204_v52 }
  0x4e   : > { %v207_v55 = vmul.f32 0.015625, %v206_v54 }
  0x50   : > { %v208_v56 = vadd.f32 1e-05, %v207_v55 }
  0x52   : > { %460 = vrsqrt.f32 %v208_v56 }
  0x5c   : > { %v461_v57 = vpop.eup %460 }
  0x5d   : > { %v210_v58 = vmul.f32 %v461_v57, %v178_v26  ;;  %v211_v59 = vmul.f32 %v461_v57, %v179_v27  ;;  %v212_v60 = vmul.f32 %v461_v57, %v180_v28  ;;  %v213_v61 = vmul.f32 %v461_v57, %v181_v29 }
  0x5e   : > { %v214_v62 = vmul.f32 %v461_v57, %v182_v30  ;;  %v215_v63 = vmul.f32 %v461_v57, %v183_v34  ;;  %v216_v0 = vmul.f32 %v461_v57, %v184_v37  ;;  %v217_v1 = vmul.f32 %v461_v57, %v185_v40 }
  0x5f   : > { %vm218_vm0 = vcmp.ge.f32.partialorder %v210_v58, 0.0  ;;  %vm219_vm1 = vcmp.ge.f32.partialorder %v211_v59, 0.0  ;;  %v226_v2 = vmul.f32 0.2, %v210_v58  ;;  %v227_v3 = vmul.f32 0.2, %v211_v59 }
  0x60   : > { %vm220_vm2 = vcmp.ge.f32.partialorder %v212_v60, 0.0  ;;  %vm221_vm3 = vcmp.ge.f32.partialorder %v213_v61, 0.0  ;;  %v228_v4 = vmul.f32 0.2, %v212_v60  ;;  %v229_v5 = vmul.f32 0.2, %v213_v61 }
  0x61   : > { %v234_v6 = vsel %vm218_vm0, %v210_v58, %v226_v2  ;;  %v235_v7 = vsel %vm219_vm1, %v211_v59, %v227_v3  ;;  %vm222_vm4 = vcmp.ge.f32.partialorder %v214_v62, 0.0  ;;  %vm223_vm5 = vcmp.ge.f32.partialorder %v215_v63, 0.0 }
  0x62   : > { %v413_v8 = vpack.c.bf16 %v235_v7, %v234_v6  ;;  %v236_v9 = vsel %vm220_vm2, %v212_v60, %v228_v4  ;;  %v237_v10 = vsel %vm221_vm3, %v213_v61, %v229_v5  ;;  %v230_v11 = vmul.f32 0.2, %v214_v62 }
  0x63   : > { %v418_v12 = vpack.c.bf16 %v237_v10, %v236_v9  ;;  %v231_v13 = vmul.f32 0.2, %v215_v63  ;;  %vm224_vm6 = vcmp.ge.f32.partialorder %v216_v0, 0.0  ;;  %vm225_vm7 = vcmp.ge.f32.partialorder %v217_v1, 0.0 }
  0x64   : > { %414 = vst [vmem:[%s147_s16] sm:$0xff] %v413_v8   ;;  %v238_v14 = vsel %vm222_vm4, %v214_v62, %v230_v11  ;;  %v232_v15 = vmul.f32 0.2, %v216_v0  ;;  %v233_v16 = vmul.f32 0.2, %v217_v1 }
  0x65   : > { %433 = vst [vmem:[%s147_s16 + $0x8] sm:$0xff] %v418_v12   ;;  %v239_v17 = vsel %vm223_vm5, %v215_v63, %v231_v13 }
  0x66   : > { %v423_v18 = vpack.c.bf16 %v239_v17, %v238_v14  ;;  %v240_v19 = vsel %vm224_vm6, %v216_v0, %v232_v15  ;;  %v241_v20 = vsel %vm225_vm7, %v217_v1, %v233_v16 }
  0x67   : > { %v428_v21 = vpack.c.bf16 %v241_v20, %v240_v19 }
  0x68   : > { %434 = vst [vmem:[%s147_s16 + $0x10] sm:$0xff] %v423_v18  }
  0x69   : > { %435 = vst [vmem:[%s147_s16 + $0x18] sm:$0xff] %v428_v21  }
  0x6a PF: > { %s11_s8 = sadd.s32 1, %s484_s8   ;;  %s538_s6 = smov %s480_s7 }
  0x6b   : > { %p8_p5 = scmp.ge.s32.totalorder %s11_s8, 4   ;;  %s539_s7 = smov %s541_s9 }
  0x6d   :  { %10 = sbr.rel (!%p8_p5) target bundleno = 2 (0x2), region = 54 }

// kernel: _lambda_.9
= control target key start
LH: loop header
LB: loop body
LE: loop exit
PB: predicated region body
PF: predicated region fallthrough
CT: control target
= control target key end

     0   :  { %s1683_s12 = smov 0   ;;  %s1685_s13 = smov 0   ;;  %s1913_s0 = inlined_call_operand.vmem [shape: bf16[128,1024], index: 0, kind: input, shape index: {}]   ;;  %s1914_s1 = inlined_call_operand.vmem [shape: bf16[1024,128], index: 1, kind: input, shape index: {}]   ;;  %s1915_s2 = inlined_call_operand.vmem [shape: f32[1,128], index: 2, kind: input, shape index: {}]   ;;  %s1916_s3 = inlined_call_operand.vmem [shape: bf16[128,128], index: 3, kind: output, shape index: {}]  }
   0x1   :  { %s1687_s14 = smov 0   ;;  %s1689_s15 = smov 0  }
   0x2   :  { %s1691_s16 = smov 0  }
   0x3 LB: > { %s22_s17 = sadd.s32 1, %s1656_s15  ;;  %p41_p1 = scmp.ne.s32.totalorder %s1648_s13, %s1644_s12  ;;  %s1660_s16 = sphi %s1691_s16, %s13_s16   ;;  %s1656_s15 = sphi %s1689_s15, %s1920_s15   ;;  %s1652_s14 = sphi %s1687_s14, %s1919_s14   ;;  %s1648_s13 = sphi %s1685_s13, %s1918_s13   ;;  %s1644_s12 = sphi %s1683_s12, %s1917_s12  }
   0x4   : > { %p23_p0 = scmp.ge.s32.totalorder %s22_s17, 2  ;;  %p42_p2 = scmp.eq.s32.totalorder %s1660_s16, 0 }
   0x5   : > { %s34_s19 = sadd.s32 1, %s1648_s13  ;;  %p1214_p5 = scmp.ge.s32.totalorder %s1660_s16, 2 }
   0x6   : > { %s1922_s17 = smov (%p23_p0, %s22_s17), 0  ;;  %p43_p3 = por %p42_p2, %p41_p1 }
   0x7   : > { %s30_s18 = ssub.s32 %s1656_s15, %s1922_s17  ;;  %143 = sbr.rel (%p1214_p5) target bundleno = 34 (0x22), region = 20 }
   0x8   : > { %p32_p4 = scmp.eq.s32.totalorder %s30_s18, 0 }
   0xa   : > { %s1718_s20 = scalar_select %p32_p4, %s1648_s13, %s34_s19  }
   0xe   : > { %146 = sbr.rel (!%p43_p3) target bundleno = 34 (0x22), region = 24  ;;  %s148_s21 = sand.u32 (%p43_p3), 1, %s1648_s13  }
   0xf   : > { %s1309_s22 = sshll.u32 (%p43_p3), %s1656_s15, 4  ;;  %s1215_s23 = sshll.u32 (%p43_p3), %s148_s21, 8 }
  0x10   : > { %s1726_s26 = scalar_lea.vmem (%p43_p3), %s1913_s0, %s1309_s22  ;;  %s1731_s27 = scalar_lea.vmem (%p43_p3), [#allocation3], %s1215_s23 }
  0x11   : > { %v169_v0 = vld [vmem:[%s1726_s26] sm:$0xff] (%p43_p3)  ;;  %v171_v1 = vld [vmem:[%s1726_s26 + $0x8] sm:$0xff] (%p43_p3) }
  0x12   : > { %v173_v2 = vld [vmem:[%s1726_s26 + $0x20] sm:$0xff] (%p43_p3)  ;;  %170 = vst [vmem:[%s1731_s27] sm:$0xff] (%p43_p3), %v169_v0  ;;  %172 = vst [vmem:[%s1731_s27 + $0x8] sm:$0xff] (%p43_p3), %v171_v1  ;;  %v175_v3 = vld [vmem:[%s1726_s26 + $0x28] sm:$0xff] (%p43_p3) }
  0x13   : > { %174 = vst [vmem:[%s1731_s27 + $0x10] sm:$0xff] (%p43_p3), %v173_v2  ;;  %v177_v4 = vld [vmem:[%s1726_s26 + $0x40] sm:$0xff] (%p43_p3)  ;;  %v179_v5 = vld [vmem:[%s1726_s26 + $0x48] sm:$0xff] (%p43_p3)  ;;  %176 = vst [vmem:[%s1731_s27 + $0x18] sm:$0xff] (%p43_p3), %v175_v3 }
  0x14   : > { %178 = vst [vmem:[%s1731_s27 + $0x20] sm:$0xff] (%p43_p3), %v177_v4  ;;  %180 = vst [vmem:[%s1731_s27 + $0x28] sm:$0xff] (%p43_p3), %v179_v5  ;;  %v181_v6 = vld [vmem:[%s1726_s26 + $0x60] sm:$0xff] (%p43_p3)  ;;  %v183_v7 = vld [vmem:[%s1726_s26 + $0x68] sm:$0xff] (%p43_p3) }
  0x15   : > { %v185_v8 = vld [vmem:[%s1726_s26 + $0x80] sm:$0xff]  ;;  %182 = vst [vmem:[%s1731_s27 + $0x30] sm:$0xff] %v181_v6  ;;  %184 = vst [vmem:[%s1731_s27 + $0x38] sm:$0xff] %v183_v7  ;;  %v187_v9 = vld [vmem:[%s1726_s26 + $0x88] sm:$0xff] }
  0x16   : > { %186 = vst [vmem:[%s1731_s27 + $0x40] sm:$0xff] %v185_v8  ;;  %v189_v10 = vld [vmem:[%s1726_s26 + $0xa0] sm:$0xff]  ;;  %v191_v11 = vld [vmem:[%s1726_s26 + $0xa8] sm:$0xff]  ;;  %188 = vst [vmem:[%s1731_s27 + $0x48] sm:$0xff] %v187_v9 }
  0x17   : > { %190 = vst [vmem:[%s1731_s27 + $0x50] sm:$0xff] %v189_v10  ;;  %192 = vst [vmem:[%s1731_s27 + $0x58] sm:$0xff] %v191_v11  ;;  %v193_v12 = vld [vmem:[%s1726_s26 + $0xc0] sm:$0xff]  ;;  %v195_v13 = vld [vmem:[%s1726_s26 + $0xc8] sm:$0xff] }
  0x18   : > { %v197_v14 = vld [vmem:[%s1726_s26 + $0xe0] sm:$0xff]  ;;  %194 = vst [vmem:[%s1731_s27 + $0x60] sm:$0xff] %v193_v12  ;;  %196 = vst [vmem:[%s1731_s27 + $0x68] sm:$0xff] %v195_v13  ;;  %v199_v15 = vld [vmem:[%s1726_s26 + $0xe8] sm:$0xff] }
  0x19   : > { %198 = vst [vmem:[%s1731_s27 + $0x70] sm:$0xff] %v197_v14  ;;  %v201_v16 = vld [vmem:[%s1726_s26 + $0x100] sm:$0xff]  ;;  %v203_v17 = vld [vmem:[%s1726_s26 + $0x108] sm:$0xff]  ;;  %200 = vst [vmem:[%s1731_s27 + $0x78] sm:$0xff] %v199_v15 }
  0x1a   : > { %202 = vst [vmem:[%s1731_s27 + $0x80] sm:$0xff] %v201_v16  ;;  %204 = vst [vmem:[%s1731_s27 + $0x88] sm:$0xff] %v203_v17  ;;  %v205_v18 = vld [vmem:[%s1726_s26 + $0x120] sm:$0xff]  ;;  %v207_v19 = vld [vmem:[%s1726_s26 + $0x128] sm:$0xff] }
  0x1b   : > { %v209_v20 = vld [vmem:[%s1726_s26 + $0x140] sm:$0xff]  ;;  %206 = vst [vmem:[%s1731_s27 + $0x90] sm:$0xff] %v205_v18  ;;  %208 = vst [vmem:[%s1731_s27 + $0x98] sm:$0xff] %v207_v19  ;;  %v211_v21 = vld [vmem:[%s1726_s26 + $0x148] sm:$0xff] }
  0x1c   : > { %210 = vst [vmem:[%s1731_s27 + $0xa0] sm:$0xff] %v209_v20  ;;  %v213_v22 = vld [vmem:[%s1726_s26 + $0x160] sm:$0xff]  ;;  %v215_v23 = vld [vmem:[%s1726_s26 + $0x168] sm:$0xff]  ;;  %212 = vst [vmem:[%s1731_s27 + $0xa8] sm:$0xff] %v211_v21 }
  0x1d   : > { %214 = vst [vmem:[%s1731_s27 + $0xb0] sm:$0xff] %v213_v22  ;;  %216 = vst [vmem:[%s1731_s27 + $0xb8] sm:$0xff] %v215_v23  ;;  %v217_v24 = vld [vmem:[%s1726_s26 + $0x180] sm:$0xff]  ;;  %v219_v25 = vld [vmem:[%s1726_s26 + $0x188] sm:$0xff] }
  0x1e   : > { %v221_v26 = vld [vmem:[%s1726_s26 + $0x1a0] sm:$0xff]  ;;  %218 = vst [vmem:[%s1731_s27 + $0xc0] sm:$0xff] %v217_v24  ;;  %220 = vst [vmem:[%s1731_s27 + $0xc8] sm:$0xff] %v219_v25  ;;  %v223_v27 = vld [vmem:[%s1726_s26 + $0x1a8] sm:$0xff] }
  0x1f   : > { %222 = vst [vmem:[%s1731_s27 + $0xd0] sm:$0xff] %v221_v26  ;;  %v225_v28 = vld [vmem:[%s1726_s26 + $0x1c0] sm:$0xff]  ;;  %v227_v29 = vld [vmem:[%s1726_s26 + $0x1c8] sm:$0xff]  ;;  %224 = vst [vmem:[%s1731_s27 + $0xd8] sm:$0xff] %v223_v27 }
  0x20   : > { %226 = vst [vmem:[%s1731_s27 + $0xe0] sm:$0xff] %v225_v28  ;;  %228 = vst [vmem:[%s1731_s27 + $0xe8] sm:$0xff] %v227_v29  ;;  %v229_v30 = vld [vmem:[%s1726_s26 + $0x1e0] sm:$0xff]  ;;  %v231_v31 = vld [vmem:[%s1726_s26 + $0x1e8] sm:$0xff] }
  0x21   : > { %230 = vst [vmem:[%s1731_s27 + $0xf0] sm:$0xff] %v229_v30  ;;  %232 = vst [vmem:[%s1731_s27 + $0xf8] sm:$0xff] %v231_v31 }
  0x22 PF: > { %p1218_p6 = scmp.ge.s32.totalorder %s1660_s16, 1  ;;  %p246_p7 = scmp.lt.s32.totalorder %s1660_s16, 3 }
  0x24   : > { %p247_p8 = pnand %p1218_p6, %p246_p7 }
  0x25   : > { %s253_s28 = sand.u32 (!%p247_p8), 1, %s1644_s12   ;;  %s1220_s29 = sshll.u32 (!%p247_p8), %s1652_s14, 6 }
  0x26   : > { %250 = sbr.rel (%p247_p8) target bundleno = 380 (0x17c), region = 51  ;;  %s1219_s30 = sshll.u32 (!%p247_p8), %s253_s28, 8 }
  0x27   : > { %p284_p9 = scmp.lt.s32.totalorder (!%p247_p8), %s1220_s29, 127  ;;  %s1803_s8 = scalar_lea.vmem (!%p247_p8), [#allocation3], %s1219_s30 }
  0x28   : > { %p1222_p10 = scmp.ne.s32.totalorder (!%p247_p8), %s1652_s14, 0 }
  0x2d   : > { %s1924_s29 = smov (!%p284_p9, %s1220_s29), 127  ;;  %299 = sbr.rel (%p1222_p10) target bundleno = 55 (0x37), region = 59 }
  0x2e   : > { %s1221_s4 = sshll.u32 %s1924_s29, 2  ;;  %v1662_v32 = vmov (!%p1222_p10), 0.0  }
  0x2f   : > { %s1801_s7 = scalar_lea.vmem %s1914_s1, %s1221_s4  ;;  %300 = vst [vmem:[#allocation2] sm:$0xff] (!%p1222_p10), %v1662_v32  ;;  %301 = vst [vmem:[#allocation2 + $0x8] sm:$0xff] (!%p1222_p10), %v1662_v32 }
  0x30   : > { %302 = vst [vmem:[#allocation2 + $0x10] sm:$0xff] (!%p1222_p10), %v1662_v32  ;;  %303 = vst [vmem:[#allocation2 + $0x18] sm:$0xff] (!%p1222_p10), %v1662_v32 }
  0x31   : > { %304 = vst [vmem:[#allocation2 + $0x20] sm:$0xff] (!%p1222_p10), %v1662_v32  ;;  %305 = vst [vmem:[#allocation2 + $0x28] sm:$0xff] (!%p1222_p10), %v1662_v32 }
  0x32   : > { %306 = vst [vmem:[#allocation2 + $0x30] sm:$0xff] (!%p1222_p10), %v1662_v32  ;;  %307 = vst [vmem:[#allocation2 + $0x38] sm:$0xff] (!%p1222_p10), %v1662_v32 }
  0x33   : > { %308 = vst [vmem:[#allocation2 + $0x40] sm:$0xff] (!%p1222_p10), %v1662_v32  ;;  %309 = vst [vmem:[#allocation2 + $0x48] sm:$0xff] (!%p1222_p10), %v1662_v32 }
  0x34   : > { %310 = vst [vmem:[#allocation2 + $0x50] sm:$0xff] %v1662_v32  ;;  %311 = vst [vmem:[#allocation2 + $0x58] sm:$0xff] %v1662_v32 }
  0x35   : > { %312 = vst [vmem:[#allocation2 + $0x60] sm:$0xff] %v1662_v32  ;;  %313 = vst [vmem:[#allocation2 + $0x68] sm:$0xff] %v1662_v32 }
  0x36   : > { %314 = vst [vmem:[#allocation2 + $0x70] sm:$0xff] %v1662_v32  ;;  %315 = vst [vmem:[#allocation2 + $0x78] sm:$0xff] %v1662_v32 }
  0x37 PF: > { %v1542_v33 = vld [vmem:[%s1801_s7 + $0x40] sm:$0xff]   ;;  %v1546_v37 = vld [vmem:[%s1801_s7 + $0x48] sm:$0xff]   ;;  %v1550_v41 = vld [vmem:[%s1801_s7 + $0x50] sm:$0xff]   ;;  %p1287_p11 = scmp.ne.s32.totalorder %s1652_s14, 1 }
  0x38   : > { %v1543_v34 = vld [vmem:[%s1801_s7 + $0xc0] sm:$0xff]   ;;  %1373 = vmatprep.subr.bf16.mxu0 %v1542_v33  ;;  %v1547_v38 = vld [vmem:[%s1801_s7 + $0xc8] sm:$0xff]   ;;  %v1551_v42 = vld [vmem:[%s1801_s7 + $0xd0] sm:$0xff]  }
  0x39   : > { %v1544_v35 = vld [vmem:[%s1801_s7] sm:$0xff]   ;;  %1437 = vmatprep.subr.bf16.mxu1 %v1543_v34  ;;  %v1548_v39 = vld [vmem:[%s1801_s7 + $0x8] sm:$0xff]   ;;  %v1552_v43 = vld [vmem:[%s1801_s7 + $0x10] sm:$0xff]  }
  0x3a   : > { %v1545_v36 = vld [vmem:[%s1801_s7 + $0x80] sm:$0xff]   ;;  %1374 = vmatpush3.bf16.msra.mxu0 %v1544_v35  ;;  %v1549_v40 = vld [vmem:[%s1801_s7 + $0x88] sm:$0xff]   ;;  %v1553_v44 = vld [vmem:[%s1801_s7 + $0x90] sm:$0xff]  }
  0x3b   : > { %1438 = vmatpush3.bf16.msra.mxu1 %v1545_v36  ;;  %1375 = vmatprep.subr.bf16.mxu0 %v1546_v37  ;;  %v1554_v45 = vld [vmem:[%s1801_s7 + $0x58] sm:$0xff]   ;;  %v1558_v49 = vld [vmem:[%s1801_s7 + $0x60] sm:$0xff]   ;;  %v1562_v53 = vld [vmem:[%s1801_s7 + $0x68] sm:$0xff]  }
  0x3c   : > { %1439 = vmatprep.subr.bf16.mxu1 %v1547_v38  ;;  %v1555_v46 = vld [vmem:[%s1801_s7 + $0xd8] sm:$0xff]   ;;  %v1559_v50 = vld [vmem:[%s1801_s7 + $0xe0] sm:$0xff]   ;;  %v1563_v54 = vld [vmem:[%s1801_s7 + $0xe8] sm:$0xff]  }
  0x3d   : > { %v1556_v47 = vld [vmem:[%s1801_s7 + $0x18] sm:$0xff]   ;;  %v1560_v51 = vld [vmem:[%s1801_s7 + $0x20] sm:$0xff]   ;;  %v1564_v55 = vld [vmem:[%s1801_s7 + $0x28] sm:$0xff]  }
  0x3e   : > { %1376 = vmatpush3.bf16.msra.mxu0 %v1548_v39  ;;  %v1557_v48 = vld [vmem:[%s1801_s7 + $0x98] sm:$0xff]   ;;  %v1561_v52 = vld [vmem:[%s1801_s7 + $0xa0] sm:$0xff]   ;;  %v1565_v56 = vld [vmem:[%s1801_s7 + $0xa8] sm:$0xff]  }
  0x3f   : > { %1440 = vmatpush3.bf16.msra.mxu1 %v1549_v40  ;;  %1377 = vmatprep.subr.bf16.mxu0 %v1550_v41  ;;  %v1566_v57 = vld [vmem:[%s1801_s7 + $0x70] sm:$0xff]   ;;  %v1570_v61 = vld [vmem:[%s1801_s7 + $0x78] sm:$0xff]  }
  0x40   : > { %1441 = vmatprep.subr.bf16.mxu1 %v1551_v42  ;;  %v1567_v58 = vld [vmem:[%s1801_s7 + $0xf0] sm:$0xff]   ;;  %v1571_v62 = vld [vmem:[%s1801_s7 + $0xf8] sm:$0xff]   ;;  %v316_v42 = vld [vmem:[#allocation2] sm:$0xff] }
  0x41   : > { %v1568_v59 = vld [vmem:[%s1801_s7 + $0x30] sm:$0xff]   ;;  %v1572_v63 = vld [vmem:[%s1801_s7 + $0x38] sm:$0xff]  }
  0x42   : > { %1378 = vmatpush3.bf16.msra.mxu0 %v1552_v43  ;;  %v1569_v60 = vld [vmem:[%s1801_s7 + $0xb0] sm:$0xff]   ;;  %v1573_v0 = vld [vmem:[%s1801_s7 + $0xb8] sm:$0xff]  }
  0x43   : > { %1442 = vmatpush3.bf16.msra.mxu1 %v1553_v44  ;;  %1379 = vmatprep.subr.bf16.mxu0 %v1554_v45  ;;  %v1574_v1 = vld [vmem:[%s1803_s8] ss:$16 sps:$4 sm:$0xff]   ;;  %v1576_v2 = vld [vmem:[%s1803_s8 + $0x4] ss:$16 sps:$4 sm:$0xff]   ;;  %v1577_v3 = vld [vmem:[%s1803_s8 + $0x8] ss:$16 sps:$4 sm:$0xff]  }
  0x44   : > { %1443 = vmatprep.subr.bf16.mxu1 %v1555_v46  ;;  %v1579_v4 = vld [vmem:[%s1803_s8 + $0xc] ss:$16 sps:$4 sm:$0xff]   ;;  %812 = vmatprep.mubr.bf16.mxu0 %v1576_v2  ;;  %v1580_v5 = vld [vmem:[%s1803_s8 + $0x24] ss:$16 sps:$4 sm:$0xff]   ;;  %v1584_v7 = vld [vmem:[%s1803_s8 + $0x20] ss:$16 sps:$4 sm:$0xff]  }
  0x45   : > { %909 = vmatprep.mubr.bf16.mxu1 %v1579_v4  ;;  %v1582_v6 = vld [vmem:[%s1803_s8 + $0x2c] ss:$16 sps:$4 sm:$0xff]   ;;  %v1585_v8 = vld [vmem:[%s1803_s8 + $0x28] ss:$16 sps:$4 sm:$0xff]   ;;  %v1586_v9 = vld [vmem:[%s1803_s8 + $0x44] ss:$16 sps:$4 sm:$0xff]  }
  0x46   : > { %1380 = vmatpush3.bf16.msra.mxu0 %v1556_v47  ;;  %v1588_v10 = vld [vmem:[%s1803_s8 + $0x4c] ss:$16 sps:$4 sm:$0xff]   ;;  %v1590_v11 = vld [vmem:[%s1803_s8 + $0x40] ss:$16 sps:$4 sm:$0xff]   ;;  %v1591_v12 = vld [vmem:[%s1803_s8 + $0x48] ss:$16 sps:$4 sm:$0xff]  }
  0x47   : > { %1444 = vmatpush3.bf16.msra.mxu1 %v1557_v48  ;;  %1381 = vmatprep.subr.bf16.mxu0 %v1558_v49  ;;  %v1592_v13 = vld [vmem:[%s1803_s8 + $0x64] ss:$16 sps:$4 sm:$0xff]   ;;  %v1594_v14 = vld [vmem:[%s1803_s8 + $0x6c] ss:$16 sps:$4 sm:$0xff]   ;;  %v1596_v15 = vld [vmem:[%s1803_s8 + $0x60] ss:$16 sps:$4 sm:$0xff]  }
  0x48   : > { %1445 = vmatprep.subr.bf16.mxu1 %v1559_v50  ;;  %v1597_v16 = vld [vmem:[%s1803_s8 + $0x68] ss:$16 sps:$4 sm:$0xff]   ;;  %v1598_v17 = vld [vmem:[%s1803_s8 + $0x84] ss:$16 sps:$4 sm:$0xff]   ;;  %v1600_v18 = vld [vmem:[%s1803_s8 + $0x8c] ss:$16 sps:$4 sm:$0xff]  }
  0x49   : > { %v1602_v19 = vld [vmem:[%s1803_s8 + $0x80] ss:$16 sps:$4 sm:$0xff]   ;;  %v1603_v20 = vld [vmem:[%s1803_s8 + $0x88] ss:$16 sps:$4 sm:$0xff]   ;;  %v1604_v21 = vld [vmem:[%s1803_s8 + $0xa4] ss:$16 sps:$4 sm:$0xff]  }
  0x4a   : > { %1382 = vmatpush3.bf16.msra.mxu0 %v1560_v51  ;;  %v1606_v22 = vld [vmem:[%s1803_s8 + $0xac] ss:$16 sps:$4 sm:$0xff]   ;;  %v1608_v23 = vld [vmem:[%s1803_s8 + $0xa0] ss:$16 sps:$4 sm:$0xff]   ;;  %v1609_v24 = vld [vmem:[%s1803_s8 + $0xa8] ss:$16 sps:$4 sm:$0xff]  }
  0x4b   : > { %1446 = vmatpush3.bf16.msra.mxu1 %v1561_v52  ;;  %1383 = vmatprep.subr.bf16.mxu0 %v1562_v53  ;;  %v1610_v25 = vld [vmem:[%s1803_s8 + $0xc4] ss:$16 sps:$4 sm:$0xff]   ;;  %v1612_v26 = vld [vmem:[%s1803_s8 + $0xcc] ss:$16 sps:$4 sm:$0xff]   ;;  %v1614_v27 = vld [vmem:[%s1803_s8 + $0xc0] ss:$16 sps:$4 sm:$0xff]  }
  0x4c   : > { %1447 = vmatprep.subr.bf16.mxu1 %v1563_v54  ;;  %v1615_v28 = vld [vmem:[%s1803_s8 + $0xc8] ss:$16 sps:$4 sm:$0xff]   ;;  %v1616_v29 = vld [vmem:[%s1803_s8 + $0xe4] ss:$16 sps:$4 sm:$0xff]   ;;  %v1618_v30 = vld [vmem:[%s1803_s8 + $0xec] ss:$16 sps:$4 sm:$0xff]  }
  0x4d   : > { %v1620_v31 = vld [vmem:[%s1803_s8 + $0xe0] ss:$16 sps:$4 sm:$0xff]   ;;  %v1621_v32 = vld [vmem:[%s1803_s8 + $0xe8] ss:$16 sps:$4 sm:$0xff]  }
  0x4e   : > { %1384 = vmatpush3.bf16.msra.mxu0 %v1564_v55  ;;  %v317_v47 = vld [vmem:[#allocation2 + $0x8] sm:$0xff] }
  0x4f   : > { %1448 = vmatpush3.bf16.msra.mxu1 %v1565_v56  ;;  %1385 = vmatprep.subr.bf16.mxu0 %v1566_v57 }
  0x50   : > { %1449 = vmatprep.subr.bf16.mxu1 %v1567_v58 }
  0x52   : > { %1386 = vmatpush3.bf16.msra.mxu0 %v1568_v59 }
  0x53   : > { %1450 = vmatpush3.bf16.msra.mxu1 %v1569_v60  ;;  %1387 = vmatprep.subr.bf16.mxu0 %v1570_v61  ;;  %v318_v60 = vld [vmem:[#allocation2 + $0x10] sm:$0xff] }
  0x54   : > { %1451 = vmatprep.subr.bf16.mxu1 %v1571_v62 }
  0x56   : > { %1388 = vmatpush3.bf16.msra.mxu0 %v1572_v63 }
  0x57   : > { %1452 = vmatpush3.bf16.msra.mxu1 %v1573_v0 }
  0x59   : > { %813 = vmatmul.mubr.bf16.vlgmr.msra.gmra.mrb[0].mxu0 %v1574_v1  ;;  %v319_v1 = vld [vmem:[#allocation2 + $0x18] sm:$0xff] }
  0x5a   : > { %910 = vmatmul.mubr.bf16.vlgmr.msra.gmra.mrb[0].mxu1 %v1577_v3  ;;  %820 = vmatprep.mubr.bf16.mxu0 %v1580_v5 }
  0x5b   : > { %917 = vmatprep.mubr.bf16.mxu1 %v1582_v6 }
  0x61   : > { %821 = vmatmul.mubr.bf16.gmra.mrb[4].mxu0 %v1584_v7 }
  0x62   : > { %918 = vmatmul.mubr.bf16.gmra.mrb[4].mxu1 %v1585_v8  ;;  %828 = vmatprep.mubr.bf16.mxu0 %v1586_v9 }
  0x63   : > { %925 = vmatprep.mubr.bf16.mxu1 %v1588_v10 }
  0x69   : > { %829 = vmatmul.mubr.bf16.gmra.mrb[8].mxu0 %v1590_v11 }
  0x6a   : > { %926 = vmatmul.mubr.bf16.gmra.mrb[8].mxu1 %v1591_v12  ;;  %836 = vmatprep.mubr.bf16.mxu0 %v1592_v13 }
  0x6b   : > { %933 = vmatprep.mubr.bf16.mxu1 %v1594_v14  ;;  %v320_v14 = vld [vmem:[#allocation2 + $0x20] sm:$0xff] }
  0x71   : > { %837 = vmatmul.mubr.bf16.gmra.mrb[12].mxu0 %v1596_v15 }
  0x72   : > { %934 = vmatmul.mubr.bf16.gmra.mrb[12].mxu1 %v1597_v16  ;;  %844 = vmatprep.mubr.bf16.mxu0 %v1598_v17 }
  0x73   : > { %941 = vmatprep.mubr.bf16.mxu1 %v1600_v18 }
  0x79   : > { %845 = vmatmul.mubr.bf16.gmra.mrb[16].mxu0 %v1602_v19  ;;  %v321_v19 = vld [vmem:[#allocation2 + $0x28] sm:$0xff] }
  0x7a   : > { %942 = vmatmul.mubr.bf16.gmra.mrb[16].mxu1 %v1603_v20  ;;  %852 = vmatprep.mubr.bf16.mxu0 %v1604_v21 }
  0x7b   : > { %949 = vmatprep.mubr.bf16.mxu1 %v1606_v22 }
  0x81   : > { %853 = vmatmul.mubr.bf16.gmra.mrb[20].mxu0 %v1608_v23 }
  0x82   : > { %950 = vmatmul.mubr.bf16.gmra.mrb[20].mxu1 %v1609_v24  ;;  %860 = vmatprep.mubr.bf16.mxu0 %v1610_v25 }
  0x83   : > { %957 = vmatprep.mubr.bf16.mxu1 %v1612_v26 }
  0x89   : > { %861 = vmatmul.mubr.bf16.gmra.mrb[24].mxu0 %v1614_v27 }
  0x8a   : > { %958 = vmatmul.mubr.bf16.gmra.mrb[24].mxu1 %v1615_v28  ;;  %868 = vmatprep.mubr.bf16.mxu0 %v1616_v29 }
  0x8b   : > { %965 = vmatprep.mubr.bf16.mxu1 %v1618_v30 }
  0x91   : > { %869 = vmatmul.mubr.bf16.gmra.mrb[28].mxu0 %v1620_v31 }
  0x92   : > { %966 = vmatmul.mubr.bf16.gmra.mrb[28].mxu1 %v1621_v32  ;;  %v322_v32 = vld [vmem:[#allocation2 + $0x30] sm:$0xff] }
 0x12c   : > { %v1389_v33 = vpop.f32.mrb[0].mxu0 }
 0x12d   : > { %v1453_v34 = vpop.f32.mrb[0].mxu1  ;;  %v1390_v35 = vpop.f32.mrb[1].mxu0 }
 0x12e   : > { %v1391_v36 = vadd.f32 %v1390_v35, %v1389_v33  ;;  %v1454_v37 = vpop.f32.mrb[1].mxu1  ;;  %v1392_v38 = vpop.f32.mrb[2].mxu0 }
 0x12f   : > { %v1455_v39 = vadd.f32 %v1454_v37, %v1453_v34  ;;  %v1456_v40 = vpop.f32.mrb[2].mxu1  ;;  %v1393_v41 = vpop.f32.mrb[3].mxu0  ;;  %v323_v37 = vld [vmem:[#allocation2 + $0x38] sm:$0xff] }
 0x130   : > { %v1394_v43 = vadd.f32 %v1393_v41, %v1392_v38  ;;  %v1457_v44 = vpop.f32.mrb[3].mxu1 }
 0x131   : > { %v912_v45 = vadd.f32 %v1455_v39, %v1391_v36  ;;  %v1458_v46 = vadd.f32 %v1457_v44, %v1456_v40 }
 0x133   : > { %v974_v48 = vadd.f32 %v912_v45, %v316_v42  ;;  %v915_v49 = vadd.f32 %v1458_v46, %v1394_v43 }
 0x134   : > { %v1395_v50 = vpop.f32.mrb[4].mxu0 }
 0x135   : > { %990 = vst [vmem:[#allocation2] sm:$0xff] %v974_v48  ;;  %v975_v51 = vadd.f32 %v915_v49, %v317_v47  ;;  %v1459_v52 = vpop.f32.mrb[4].mxu1  ;;  %v1396_v53 = vpop.f32.mrb[5].mxu0 }
 0x136   : > { %v1397_v54 = vadd.f32 %v1396_v53, %v1395_v50  ;;  %v1460_v55 = vpop.f32.mrb[5].mxu1  ;;  %v1398_v56 = vpop.f32.mrb[6].mxu0  ;;  %v324_v50 = vld [vmem:[#allocation2 + $0x40] sm:$0xff] }
 0x137   : > { %991 = vst [vmem:[#allocation2 + $0x8] sm:$0xff] %v975_v51  ;;  %v1461_v57 = vadd.f32 %v1460_v55, %v1459_v52  ;;  %v1462_v58 = vpop.f32.mrb[6].mxu1  ;;  %v1399_v59 = vpop.f32.mrb[7].mxu0  ;;  %v325_v55 = vld [vmem:[#allocation2 + $0x48] sm:$0xff] }
 0x138   : > { %v1400_v61 = vadd.f32 %v1399_v59, %v1398_v56  ;;  %v1463_v62 = vpop.f32.mrb[7].mxu1 }
 0x139   : > { %v920_v63 = vadd.f32 %v1461_v57, %v1397_v54  ;;  %v1464_v0 = vadd.f32 %v1463_v62, %v1462_v58 }
 0x13b   : > { %v976_v2 = vadd.f32 %v920_v63, %v318_v60  ;;  %v923_v3 = vadd.f32 %v1464_v0, %v1400_v61 }
 0x13c   : > { %v1401_v4 = vpop.f32.mrb[8].mxu0 }
 0x13d   : > { %992 = vst [vmem:[#allocation2 + $0x10] sm:$0xff] %v976_v2  ;;  %v977_v5 = vadd.f32 %v923_v3, %v319_v1  ;;  %v1465_v6 = vpop.f32.mrb[8].mxu1  ;;  %v1402_v7 = vpop.f32.mrb[9].mxu0 }
 0x13e   : > { %v1403_v8 = vadd.f32 %v1402_v7, %v1401_v4  ;;  %v1466_v9 = vpop.f32.mrb[9].mxu1  ;;  %v1404_v10 = vpop.f32.mrb[10].mxu0  ;;  %v326_v4 = vld [vmem:[#allocation2 + $0x50] sm:$0xff] }
 0x13f   : > { %993 = vst [vmem:[#allocation2 + $0x18] sm:$0xff] %v977_v5  ;;  %v1467_v11 = vadd.f32 %v1466_v9, %v1465_v6  ;;  %v1468_v12 = vpop.f32.mrb[10].mxu1  ;;  %v1405_v13 = vpop.f32.mrb[11].mxu0  ;;  %v327_v9 = vld [vmem:[#allocation2 + $0x58] sm:$0xff] }
 0x140   : > { %v1406_v15 = vadd.f32 %v1405_v13, %v1404_v10  ;;  %v1469_v16 = vpop.f32.mrb[11].mxu1 }
 0x141   : > { %v928_v17 = vadd.f32 %v1467_v11, %v1403_v8  ;;  %v1470_v18 = vadd.f32 %v1469_v16, %v1468_v12 }
 0x143   : > { %v978_v20 = vadd.f32 %v928_v17, %v320_v14  ;;  %v931_v21 = vadd.f32 %v1470_v18, %v1406_v15 }
 0x144   : > { %v1407_v22 = vpop.f32.mrb[12].mxu0 }
 0x145   : > { %994 = vst [vmem:[#allocation2 + $0x20] sm:$0xff] %v978_v20  ;;  %v979_v23 = vadd.f32 %v931_v21, %v321_v19  ;;  %v1471_v24 = vpop.f32.mrb[12].mxu1  ;;  %v1408_v25 = vpop.f32.mrb[13].mxu0 }
 0x146   : > { %v1409_v26 = vadd.f32 %v1408_v25, %v1407_v22  ;;  %v1472_v27 = vpop.f32.mrb[13].mxu1  ;;  %v1410_v28 = vpop.f32.mrb[14].mxu0  ;;  %v328_v22 = vld [vmem:[#allocation2 + $0x60] sm:$0xff] }
 0x147   : > { %995 = vst [vmem:[#allocation2 + $0x28] sm:$0xff] %v979_v23  ;;  %v1473_v29 = vadd.f32 %v1472_v27, %v1471_v24  ;;  %v1474_v30 = vpop.f32.mrb[14].mxu1  ;;  %v1411_v31 = vpop.f32.mrb[15].mxu0  ;;  %v329_v27 = vld [vmem:[#allocation2 + $0x68] sm:$0xff] }
 0x148   : > { %v1412_v33 = vadd.f32 %v1411_v31, %v1410_v28  ;;  %v1475_v34 = vpop.f32.mrb[15].mxu1 }
 0x149   : > { %v936_v35 = vadd.f32 %v1473_v29, %v1409_v26  ;;  %v1476_v36 = vadd.f32 %v1475_v34, %v1474_v30 }
 0x14b   : > { %v980_v38 = vadd.f32 %v936_v35, %v322_v32  ;;  %v939_v39 = vadd.f32 %v1476_v36, %v1412_v33 }
 0x14c   : > { %v1413_v40 = vpop.f32.mrb[16].mxu0 }
 0x14d   : > { %996 = vst [vmem:[#allocation2 + $0x30] sm:$0xff] %v980_v38  ;;  %v981_v41 = vadd.f32 %v939_v39, %v323_v37  ;;  %v1477_v42 = vpop.f32.mrb[16].mxu1  ;;  %v1414_v43 = vpop.f32.mrb[17].mxu0 }
 0x14e   : > { %v1415_v44 = vadd.f32 %v1414_v43, %v1413_v40  ;;  %v1478_v45 = vpop.f32.mrb[17].mxu1  ;;  %v1416_v46 = vpop.f32.mrb[18].mxu0  ;;  %v330_v40 = vld [vmem:[#allocation2 + $0x70] sm:$0xff] }
 0x14f   : > { %997 = vst [vmem:[#allocation2 + $0x38] sm:$0xff] %v981_v41  ;;  %v1479_v47 = vadd.f32 %v1478_v45, %v1477_v42  ;;  %v1480_v48 = vpop.f32.mrb[18].mxu1  ;;  %v1417_v49 = vpop.f32.mrb[19].mxu0  ;;  %v331_v45 = vld [vmem:[#allocation2 + $0x78] sm:$0xff] }
 0x150   : > { %v1418_v51 = vadd.f32 %v1417_v49, %v1416_v46  ;;  %v1481_v52 = vpop.f32.mrb[19].mxu1  ;;  %v1010_v49 = vld [vmem:[#allocation2] sm:$0xff] (!%p1287_p11) }
 0x151   : > { %v944_v53 = vadd.f32 %v1479_v47, %v1415_v44  ;;  %v1482_v54 = vadd.f32 %v1481_v52, %v1480_v48 }
 0x153   : > { %v982_v56 = vadd.f32 %v944_v53, %v324_v50  ;;  %v947_v57 = vadd.f32 %v1482_v54, %v1418_v51  ;;  %v1011_v50 = vld [vmem:[#allocation2 + $0x8] sm:$0xff] (!%p1287_p11)  ;;  %v1288_v51 = vld [vmem:[%s1915_s2] ss:$0 sm:$0xff] (!%p1287_p11)  ;;  %v1012_v54 = vld [vmem:[#allocation2 + $0x10] sm:$0xff] (!%p1287_p11) }
 0x154   : > { %v1419_v58 = vpop.f32.mrb[20].mxu0  ;;  %v1033_v52 = vadd.f32 (!%p1287_p11), %v1288_v51, %v1010_v49  ;;  %v1034_v53 = vadd.f32 (!%p1287_p11), %v1288_v51, %v1011_v50 }
 0x155   : > { %998 = vst [vmem:[#allocation2 + $0x40] sm:$0xff] %v982_v56  ;;  %v983_v59 = vadd.f32 %v947_v57, %v325_v55  ;;  %v1483_v60 = vpop.f32.mrb[20].mxu1  ;;  %v1420_v61 = vpop.f32.mrb[21].mxu0  ;;  %v1013_v55 = vld [vmem:[#allocation2 + $0x18] sm:$0xff] (!%p1287_p11)  ;;  %v1014_v56 = vld [vmem:[#allocation2 + $0x20] sm:$0xff] (!%p1287_p11)  ;;  %v1035_v57 = vadd.f32 (!%p1287_p11), %v1288_v51, %v1012_v54 }
 0x156   : > { %v1421_v62 = vadd.f32 %v1420_v61, %v1419_v58  ;;  %v1484_v63 = vpop.f32.mrb[21].mxu1  ;;  %v1422_v0 = vpop.f32.mrb[22].mxu0  ;;  %v1036_v58 = vadd.f32 (!%p1287_p11), %v1288_v51, %v1013_v55  ;;  %v1016_v61 = vld [vmem:[#allocation2 + $0x30] sm:$0xff] (!%p1287_p11) }
 0x157   : > { %999 = vst [vmem:[#allocation2 + $0x48] sm:$0xff] %v983_v59  ;;  %v1485_v1 = vadd.f32 %v1484_v63, %v1483_v60  ;;  %v1486_v2 = vpop.f32.mrb[22].mxu1  ;;  %v1423_v3 = vpop.f32.mrb[23].mxu0  ;;  %v1015_v59 = vld [vmem:[#allocation2 + $0x28] sm:$0xff] (!%p1287_p11)  ;;  %v1037_v60 = vadd.f32 (!%p1287_p11), %v1288_v51, %v1014_v56  ;;  %v1329_v63 = vpack.c.bf16 (!%p1287_p11), %v1034_v53, %v1033_v52 }
 0x158   : > { %v1424_v5 = vadd.f32 %v1423_v3, %v1422_v0  ;;  %v1487_v6 = vpop.f32.mrb[23].mxu1  ;;  %v1038_v0 = vadd.f32 (!%p1287_p11), %v1288_v51, %v1015_v59 }
 0x159   : > { %v952_v7 = vadd.f32 %v1485_v1, %v1421_v62  ;;  %v1488_v8 = vadd.f32 %v1487_v6, %v1486_v2  ;;  %v1017_v62 = vld [vmem:[#allocation2 + $0x38] sm:$0xff] (!%p1287_p11)  ;;  %v1039_v1 = vadd.f32 (!%p1287_p11), %v1288_v51, %v1016_v61  ;;  %v1334_v6 = vpack.c.bf16 (!%p1287_p11), %v1036_v58, %v1035_v57  ;;  %1330 = vst [vmem:[%s1916_s3] sm:$0xff] (!%p1287_p11), %v1329_v63  }
 0x15a   : > { %v1040_v2 = vadd.f32 (!%p1287_p11), %v1288_v51, %v1017_v62 }
 0x15b   : > { %v984_v10 = vadd.f32 %v952_v7, %v326_v4  ;;  %v955_v11 = vadd.f32 %v1488_v8, %v1424_v5  ;;  %1366 = vst [vmem:[%s1916_s3 + $0x8] sm:$0xff] (!%p1287_p11), %v1334_v6  }
 0x15c   : > { %v1425_v12 = vpop.f32.mrb[24].mxu0  ;;  %v1018_v3 = vld [vmem:[#allocation2 + $0x40] sm:$0xff] (!%p1287_p11) }
 0x15d   : > { %1000 = vst [vmem:[#allocation2 + $0x50] sm:$0xff] %v984_v10  ;;  %v985_v13 = vadd.f32 %v955_v11, %v327_v9  ;;  %v1489_v14 = vpop.f32.mrb[24].mxu1  ;;  %v1426_v15 = vpop.f32.mrb[25].mxu0  ;;  %v1041_v7 = vadd.f32 (!%p1287_p11), %v1288_v51, %v1018_v3 }
 0x15e   : > { %v1427_v16 = vadd.f32 %v1426_v15, %v1425_v12  ;;  %v1490_v17 = vpop.f32.mrb[25].mxu1  ;;  %v1428_v18 = vpop.f32.mrb[26].mxu0  ;;  %v1019_v4 = vld [vmem:[#allocation2 + $0x48] sm:$0xff] (!%p1287_p11) }
 0x15f   : > { %1001 = vst [vmem:[#allocation2 + $0x58] sm:$0xff] %v985_v13  ;;  %v1491_v19 = vadd.f32 %v1490_v17, %v1489_v14  ;;  %v1492_v20 = vpop.f32.mrb[26].mxu1  ;;  %v1429_v21 = vpop.f32.mrb[27].mxu0  ;;  %v1042_v8 = vadd.f32 (!%p1287_p11), %v1288_v51, %v1019_v4  ;;  %v1339_v13 = vpack.c.bf16 (!%p1287_p11), %v1038_v0, %v1037_v60  ;;  %v1344_v14 = vpack.c.bf16 (!%p1287_p11), %v1040_v2, %v1039_v1 }
 0x160   : > { %v1430_v23 = vadd.f32 %v1429_v21, %v1428_v18  ;;  %v1493_v24 = vpop.f32.mrb[27].mxu1 }
 0x161   : > { %v960_v25 = vadd.f32 %v1491_v19, %v1427_v16  ;;  %v1494_v26 = vadd.f32 %v1493_v24, %v1492_v20  ;;  %v1349_v19 = vpack.c.bf16 (!%p1287_p11), %v1042_v8, %v1041_v7  ;;  %1367 = vst [vmem:[%s1916_s3 + $0x10] sm:$0xff] (!%p1287_p11), %v1339_v13   ;;  %1368 = vst [vmem:[%s1916_s3 + $0x18] sm:$0xff] (!%p1287_p11), %v1344_v14  }
 0x163   : > { %v986_v28 = vadd.f32 %v960_v25, %v328_v22  ;;  %v963_v29 = vadd.f32 %v1494_v26, %v1430_v23  ;;  %1369 = vst [vmem:[%s1916_s3 + $0x20] sm:$0xff] (!%p1287_p11), %v1349_v19  }
 0x164   : > { %v1431_v30 = vpop.f32.mrb[28].mxu0  ;;  %v1020_v5 = vld [vmem:[#allocation2 + $0x50] sm:$0xff] (!%p1287_p11) }
 0x165   : > { %1002 = vst [vmem:[#allocation2 + $0x60] sm:$0xff] %v986_v28  ;;  %v987_v31 = vadd.f32 %v963_v29, %v329_v27  ;;  %v1495_v32 = vpop.f32.mrb[28].mxu1  ;;  %v1432_v33 = vpop.f32.mrb[29].mxu0  ;;  %v1043_v10 = vadd.f32 (!%p1287_p11), %v1288_v51, %v1020_v5 }
 0x166   : > { %v1433_v34 = vadd.f32 %v1432_v33, %v1431_v30  ;;  %v1496_v35 = vpop.f32.mrb[29].mxu1  ;;  %v1434_v36 = vpop.f32.mrb[30].mxu0  ;;  %v1021_v9 = vld [vmem:[#allocation2 + $0x58] sm:$0xff] (!%p1287_p11) }
 0x167   : > { %1003 = vst [vmem:[#allocation2 + $0x68] sm:$0xff] %v987_v31  ;;  %v1497_v37 = vadd.f32 %v1496_v35, %v1495_v32  ;;  %v1498_v38 = vpop.f32.mrb[30].mxu1  ;;  %v1435_v39 = vpop.f32.mrb[31].mxu0  ;;  %v1044_v15 = vadd.f32 (!%p1287_p11), %v1288_v51, %v1021_v9 }
 0x168   : > { %v1436_v41 = vadd.f32 %v1435_v39, %v1434_v36  ;;  %v1499_v42 = vpop.f32.mrb[31].mxu1 }
 0x169   : > { %v968_v43 = vadd.f32 %v1497_v37, %v1433_v34  ;;  %v1500_v44 = vadd.f32 %v1499_v42, %v1498_v38  ;;  %1009 = sbr.rel (%p1287_p11) target bundleno = 380 (0x17c), region = 63  ;;  %v1354_v23 = vpack.c.bf16 (!%p1287_p11), %v1044_v15, %v1043_v10 }
 0x16b   : > { %v988_v46 = vadd.f32 %v968_v43, %v330_v40  ;;  %v971_v47 = vadd.f32 %v1500_v44, %v1436_v41  ;;  %1370 = vst [vmem:[%s1916_s3 + $0x28] sm:$0xff] (!%p1287_p11), %v1354_v23  }
 0x16c   : > { %v1022_v11 = vld [vmem:[#allocation2 + $0x60] sm:$0xff] (!%p1287_p11) }
 0x16d   : > { %1004 = vst [vmem:[#allocation2 + $0x70] sm:$0xff] %v988_v46  ;;  %v989_v48 = vadd.f32 %v971_v47, %v331_v45  ;;  %v1045_v16 = vadd.f32 (!%p1287_p11), %v1288_v51, %v1022_v11 }
 0x16e   : > { %v1023_v12 = vld [vmem:[#allocation2 + $0x68] sm:$0xff] (!%p1287_p11) }
 0x16f   : > { %1005 = vst [vmem:[#allocation2 + $0x78] sm:$0xff] %v989_v48  ;;  %v1046_v20 = vadd.f32 (!%p1287_p11), %v1288_v51, %v1023_v12 }
 0x171   : > { %v1359_v24 = vpack.c.bf16 %v1046_v20, %v1045_v16 }
 0x173   : > { %1371 = vst [vmem:[%s1916_s3 + $0x30] sm:$0xff] %v1359_v24  }
 0x174   : > { %v1024_v17 = vld [vmem:[#allocation2 + $0x70] sm:$0xff] }
 0x175   : > { %v1047_v21 = vadd.f32 %v1288_v51, %v1024_v17 }
 0x176   : > { %v1025_v18 = vld [vmem:[#allocation2 + $0x78] sm:$0xff] }
 0x177   : > { %v1048_v22 = vadd.f32 %v1288_v51, %v1025_v18 }
 0x179   : > { %v1364_v25 = vpack.c.bf16 %v1048_v22, %v1047_v21 }
 0x17b   : > { %1372 = vst [vmem:[%s1916_s3 + $0x38] sm:$0xff] %v1364_v25  }
 0x17c PF: > { %s13_s16 = sadd.s32 1, %s1660_s16   ;;  %s1917_s12 = smov %s1648_s13 }
 0x17d   : > { %p10_p12 = scmp.ge.s32.totalorder %s13_s16, 4   ;;  %s1918_s13 = smov %s1718_s20 }
 0x17e   : > { %s1919_s14 = smov %s1656_s15  ;;  %s1920_s15 = smov %s1922_s17 }
 0x17f   :  { %12 = sbr.rel (!%p10_p12) target bundleno = 3 (0x3), region = 101 }

// kernel: _lambda_.12
= control target key start
LH: loop header
LB: loop body
LE: loop exit
PB: predicated region body
PF: predicated region fallthrough
CT: control target
= control target key end

     0   :  { %s496_s6 = smov 0   ;;  %s498_s7 = smov 0   ;;  %s596_s0 = inlined_call_operand.vmem [shape: bf16[2,16,256], index: 0, kind: input, shape index: {}]   ;;  %s597_s1 = inlined_call_operand.vmem [shape: bf16[2,16,256], index: 1, kind: output, shape index: {}]  }
   0x1   :  { %s500_s8 = smov 0   ;;  %s502_s9 = smov 0  }
   0x2   :  { %s504_s10 = smov 0   ;;  %s506_s11 = smov 0  }
   0x3   :  { %s508_s12 = smov 0  }
   0x4 LB: > { %s20_s13 = sadd.s32 1, %s476_s10  ;;  %s23_s14 = sadd.s32 1, %s480_s11  ;;  %s484_s12 = sphi %s508_s12, %s11_s12   ;;  %s480_s11 = sphi %s506_s11, %s604_s11   ;;  %s476_s10 = sphi %s504_s10, %s603_s10   ;;  %s472_s9 = sphi %s502_s9, %s602_s9   ;;  %s468_s8 = sphi %s500_s8, %s601_s8   ;;  %s464_s7 = sphi %s498_s7, %s600_s7   ;;  %s460_s6 = sphi %s496_s6, %s599_s6  }
   0x5   : > { %p21_p0 = scmp.ge.s32.totalorder %s20_s13, 2  ;;  %s344_s15 = sadd.s32 4294967295, %s484_s12  }
   0x6   : > { %p39_p1 = scmp.ne.s32.totalorder %s464_s7, %s460_s6  ;;  %p40_p2 = scmp.eq.s32.totalorder %s484_s12, 0 }
   0x7   : > { %s606_s13 = smov (%p21_p0, %s20_s13), 0  ;;  %s608_s14 = smov (!%p21_p0, %s23_s14), %s480_s11 }
   0x8   : > { %p25_p3 = scmp.ge.s32.totalorder %s608_s14, 2  ;;  %p71_p4 = scmp.eq.s32.totalorder %s344_s15, 3 }
   0x9   : > { %s28_s16 = ssub.s32 %s476_s10, %s606_s13  ;;  %p41_p5 = por %p40_p2, %p39_p1 }
   0xa   : > { %s610_s14 = smov (%p25_p3, %s608_s14), 0  ;;  %p544_p6 = por %p71_p4, %p39_p1 }
   0xb   : > { %s27_s18 = ssub.s32 %s480_s11, %s610_s14  ;;  %s32_s20 = sadd.s32 1, %s464_s7 }
   0xc   : > { %s29_s19 = sor.u32 %s28_s16, %s27_s18  ;;  %p347_p8 = scmp.ge.s32.totalorder %s484_s12, 4 }
   0xd   : > { %p30_p7 = scmp.eq.s32.totalorder %s29_s19, 0 }
   0xe   : > { %93 = sbr.rel (%p347_p8) target bundleno = 28 (0x1c), region = 16 }
   0xf   : > { %s552_s21 = scalar_select %p30_p7, %s464_s7, %s32_s20  }
  0x15   : > { %96 = sbr.rel (!%p41_p5) target bundleno = 28 (0x1c), region = 20  ;;  %s98_s22 = sand.u32 (%p41_p5), 1, %s464_s7  }
  0x16   : > { %s349_s23 = sshll.u32 (%p41_p5), %s480_s11, 2  ;;  %s348_s24 = sshll.u32 (%p41_p5), %s98_s22, 3 }
  0x17   : > { %s102_s25 = sadd.s32 (%p41_p5), %s476_s10, %s349_s23  ;;  %s100_s30 = scalar_lea.vmem (%p41_p5), [#allocation2], %s348_s24 }
  0x18   : > { %s350_s26 = sshll.u32 (%p41_p5), %s102_s25, 2 }
  0x19   : > { %s104_s29 = scalar_lea.vmem (%p41_p5), %s596_s0, %s350_s26 }
  0x1a   : > { %v120_v0 = vld [vmem:[%s104_s29] sm:$0xf] (%p41_p5)  ;;  %v122_v1 = vld [vmem:[%s104_s29 + $0x8] sm:$0xf] (%p41_p5) }
  0x1b   : > { %121 = vst [vmem:[%s100_s30] sm:$0xf] (%p41_p5), %v120_v0  ;;  %123 = vst [vmem:[%s100_s30 + $0x4] sm:$0xf] (%p41_p5), %v122_v1 }
  0x1c PF: > { %p351_p9 = scmp.ge.s32.totalorder %s484_s12, 1  ;;  %p149_p10 = scmp.lt.s32.totalorder %s484_s12, 5 }
  0x1e   : > { %p150_p11 = pnand %p351_p9, %p149_p10 }
  0x1f   : > { %s156_s2 = sand.u32 (!%p150_p11), 1, %s460_s6  }
  0x20   : > { %153 = sbr.rel (%p150_p11) target bundleno = 102 (0x66), region = 61  ;;  %s564_s3 = sshll.u32 (!%p150_p11), %s156_s2, 3 }
  0x21   : > { %s158_s4 = scalar_lea.vmem (!%p150_p11), [#allocation2], %s564_s3  ;;  %s173_s5 = scalar_lea.vmem (!%p150_p11), [#allocation3], %s564_s3 }
  0x22   : > { %v364_v2 = vld [vmem:[%s158_s4] sm:$0xff] (!%p150_p11)  }
  0x23   : > { %v365_v3 = vunpack.c.l.bf16 (!%p150_p11), %v364_v2  ;;  %v366_v4 = vunpack.c.h.bf16 (!%p150_p11), %v364_v2 }
  0x25   : > { %v178_v5 = vadd.f32 (!%p150_p11), %v366_v4, %v365_v3 }
  0x27   : > { %v179_v6 = vrot.slane %v178_v5, 4  ;;  %s357_s6 = sshll.u32 (%p544_p6), %s472_s9, 2 }
  0x28   : > { %s226_s15 = sadd.s32 (%p544_p6), %s468_s8, %s357_s6 }
  0x29   : > { %v180_v7 = vadd.f32 %v179_v6, %v178_v5  ;;  %s358_s16 = sshll.u32 (%p544_p6), %s226_s15, 2 }
  0x2a   : > { %s228_s20 = scalar_lea.vmem (%p544_p6), %s597_s1, %s358_s16 }
  0x2b   : > { %v181_v8 = vrot.slane %v180_v7, 2 }
  0x2d   : > { %v182_v9 = vadd.f32 %v181_v8, %v180_v7 }
  0x2f   : > { %v183_v10 = vrot.slane %v182_v9, 1 }
  0x31   : > { %v184_v11 = vadd.f32 %v183_v10, %v182_v9 }
  0x33   : > { %v185_v12 = vmul.f32 0.0625, %v184_v11 }
  0x35   : > { %v186_v13 = vsub.f32 %v365_v3, %v185_v12  ;;  %v187_v14 = vsub.f32 %v366_v4, %v185_v12 }
  0x37   : > { %v188_v15 = vmul.f32 %v186_v13, %v186_v13  ;;  %v189_v16 = vmul.f32 %v187_v14, %v187_v14 }
  0x39   : > { %v190_v17 = vadd.f32 %v189_v16, %v188_v15 }
  0x3b   : > { %v191_v18 = vrot.slane %v190_v17, 4 }
  0x3d   : > { %v192_v19 = vadd.f32 %v191_v18, %v190_v17 }
  0x3f   : > { %v193_v20 = vrot.slane %v192_v19, 2 }
  0x41   : > { %v194_v21 = vadd.f32 %v193_v20, %v192_v19 }
  0x43   : > { %v195_v22 = vrot.slane %v194_v21, 1 }
  0x45   : > { %v196_v23 = vadd.f32 %v195_v22, %v194_v21 }
  0x47   : > { %v197_v24 = vmul.f32 0.0625, %v196_v23 }
  0x49   : > { %v198_v25 = vadd.f32 1e-05, %v197_v24 }
  0x4b   : > { %428 = vrsqrt.f32 %v198_v25 }
  0x55   : > { %v429_v26 = vpop.eup %428 }
  0x56   : > { %v200_v27 = vmul.f32 %v429_v26, %v186_v13  ;;  %v201_v28 = vmul.f32 %v429_v26, %v187_v14 }
  0x57   : > { %224 = sbr.rel (!%p544_p6) target bundleno = 102 (0x66), region = 69 }
  0x58   : > { %vm202_vm0 = vcmp.ge.f32.partialorder %v200_v27, 0.0  ;;  %vm203_vm1 = vcmp.ge.f32.partialorder %v201_v28, 0.0  ;;  %v204_v29 = vmul.f32 0.2, %v200_v27  ;;  %v205_v30 = vmul.f32 0.2, %v201_v28 }
  0x5a   : > { %v206_v31 = vsel %vm202_vm0, %v200_v27, %v204_v29  ;;  %v207_v32 = vsel %vm203_vm1, %v201_v28, %v205_v30 }
  0x5b   : > { %v370_v33 = vpack.c.bf16 %v207_v32, %v206_v31 }
  0x5d   : > { %371 = vst [vmem:[%s173_s5] sm:$0xff] %v370_v33  }
  0x64   : > { %v244_v34 = vld [vmem:[%s173_s5] sm:$0xf]  ;;  %v246_v35 = vld [vmem:[%s173_s5 + $0x4] sm:$0xf] }
  0x65   : > { %245 = vst [vmem:[%s228_s20] sm:$0xf] %v244_v34  ;;  %247 = vst [vmem:[%s228_s20 + $0x8] sm:$0xf] %v246_v35 }
  0x66 PF: > { %s11_s12 = sadd.s32 1, %s484_s12   ;;  %s599_s6 = smov %s464_s7 }
  0x67   : > { %p8_p12 = scmp.ge.s32.totalorder %s11_s12, 6   ;;  %s600_s7 = smov %s552_s21 }
  0x68   : > { %s601_s8 = smov %s476_s10  ;;  %s602_s9 = smov %s480_s11 }
  0x69   : > { %s603_s10 = smov %s606_s13  ;;  %s604_s11 = smov %s610_s14 }
  0x6a   :  { %10 = sbr.rel (!%p8_p12) target bundleno = 4 (0x4), region = 141 }

// kernel: _lambda_.11
= control target key start
LH: loop header
LB: loop body
LE: loop exit
PB: predicated region body
PF: predicated region fallthrough
CT: control target
= control target key end

     0   :  { %s1288_s12 = smov 0   ;;  %s1290_s13 = smov 0   ;;  %s1446_s0 = inlined_call_operand.vmem [shape: bf16[32,2048], index: 0, kind: input, shape index: {}]   ;;  %s1447_s1 = inlined_call_operand.vmem [shape: bf16[2048,256], index: 1, kind: input, shape index: {}]   ;;  %s1448_s2 = inlined_call_operand.vmem [shape: f32[1,256], index: 2, kind: input, shape index: {}]   ;;  %s1449_s3 = inlined_call_operand.vmem [shape: bf16[32,256], index: 3, kind: output, shape index: {}]  }
   0x1   :  { %s1292_s14 = smov 0   ;;  %s1294_s15 = smov 0  }
   0x2   :  { %s1296_s16 = smov 0  }
   0x3 LB: > { %s22_s17 = sadd.s32 1, %s1261_s15  ;;  %p41_p1 = scmp.ne.s32.totalorder %s1253_s13, %s1249_s12  ;;  %s1265_s16 = sphi %s1296_s16, %s13_s16   ;;  %s1261_s15 = sphi %s1294_s15, %s1453_s15   ;;  %s1257_s14 = sphi %s1292_s14, %s1452_s14   ;;  %s1253_s13 = sphi %s1290_s13, %s1451_s13   ;;  %s1249_s12 = sphi %s1288_s12, %s1450_s12  }
   0x4   : > { %p23_p0 = scmp.ge.s32.totalorder %s22_s17, 4  ;;  %p42_p2 = scmp.eq.s32.totalorder %s1265_s16, 0 }
   0x5   : > { %s34_s19 = sadd.s32 1, %s1253_s13  ;;  %p973_p5 = scmp.ge.s32.totalorder %s1265_s16, 4 }
   0x6   : > { %s1455_s17 = smov (%p23_p0, %s22_s17), 0  ;;  %p43_p3 = por %p42_p2, %p41_p1 }
   0x7   : > { %s30_s18 = ssub.s32 %s1261_s15, %s1455_s17  ;;  %143 = sbr.rel (%p973_p5) target bundleno = 22 (0x16), region = 20 }
   0x8   : > { %p32_p4 = scmp.eq.s32.totalorder %s30_s18, 0 }
   0xa   : > { %s1323_s20 = scalar_select %p32_p4, %s1253_s13, %s34_s19  }
   0xe   : > { %146 = sbr.rel (!%p43_p3) target bundleno = 22 (0x16), region = 24  ;;  %s148_s21 = sand.u32 (%p43_p3), 1, %s1253_s13  }
   0xf   : > { %s1064_s22 = sshll.u32 (%p43_p3), %s1261_s15, 4  ;;  %s974_s23 = sshll.u32 (%p43_p3), %s148_s21, 6 }
  0x10   : > { %s156_s26 = scalar_lea.vmem (%p43_p3), %s1446_s0, %s1064_s22  ;;  %s150_s27 = scalar_lea.vmem (%p43_p3), [#allocation3], %s974_s23 }
  0x11   : > { %v169_v0 = vld [vmem:[%s156_s26] sm:$0xff] (%p43_p3)  ;;  %v171_v1 = vld [vmem:[%s156_s26 + $0x8] sm:$0xff] (%p43_p3) }
  0x12   : > { %v173_v2 = vld [vmem:[%s156_s26 + $0x40] sm:$0xff] (%p43_p3)  ;;  %170 = vst [vmem:[%s150_s27] sm:$0xff] (%p43_p3), %v169_v0  ;;  %172 = vst [vmem:[%s150_s27 + $0x8] sm:$0xff] (%p43_p3), %v171_v1  ;;  %v175_v3 = vld [vmem:[%s156_s26 + $0x48] sm:$0xff] (%p43_p3) }
  0x13   : > { %174 = vst [vmem:[%s150_s27 + $0x10] sm:$0xff] (%p43_p3), %v173_v2  ;;  %v177_v4 = vld [vmem:[%s156_s26 + $0x80] sm:$0xff] (%p43_p3)  ;;  %v179_v5 = vld [vmem:[%s156_s26 + $0x88] sm:$0xff] (%p43_p3)  ;;  %176 = vst [vmem:[%s150_s27 + $0x18] sm:$0xff] (%p43_p3), %v175_v3 }
  0x14   : > { %178 = vst [vmem:[%s150_s27 + $0x20] sm:$0xff] (%p43_p3), %v177_v4  ;;  %180 = vst [vmem:[%s150_s27 + $0x28] sm:$0xff] (%p43_p3), %v179_v5  ;;  %v181_v6 = vld [vmem:[%s156_s26 + $0xc0] sm:$0xff] (%p43_p3)  ;;  %v183_v7 = vld [vmem:[%s156_s26 + $0xc8] sm:$0xff] (%p43_p3) }
  0x15   : > { %182 = vst [vmem:[%s150_s27 + $0x30] sm:$0xff] %v181_v6  ;;  %184 = vst [vmem:[%s150_s27 + $0x38] sm:$0xff] %v183_v7 }
  0x16 PF: > { %p977_p6 = scmp.ge.s32.totalorder %s1265_s16, 1  ;;  %p199_p7 = scmp.lt.s32.totalorder %s1265_s16, 5 }
  0x18   : > { %p200_p8 = pnand %p977_p6, %p199_p7 }
  0x19   : > { %s206_s28 = sand.u32 (!%p200_p8), 1, %s1249_s12   ;;  %s979_s29 = sshll.u32 (!%p200_p8), %s1257_s14, 6 }
  0x1a   : > { %203 = sbr.rel (%p200_p8) target bundleno = 346 (0x15a), region = 51  ;;  %s978_s30 = sshll.u32 (!%p200_p8), %s206_s28, 6 }
  0x1b   : > { %p239_p9 = scmp.lt.s32.totalorder (!%p200_p8), %s979_s29, 255  ;;  %s1340_s8 = scalar_lea.vmem (!%p200_p8), [#allocation3], %s978_s30 }
  0x1c   : > { %p982_p10 = scmp.ne.s32.totalorder (!%p200_p8), %s1257_s14, 0 }
  0x21   : > { %s1457_s29 = smov (!%p239_p9, %s979_s29), 255  ;;  %255 = sbr.rel (%p982_p10) target bundleno = 40 (0x28), region = 59 }
  0x22   : > { %s1065_s4 = sshll.u32 %s1457_s29, 3  ;;  %v1267_v8 = vmov (!%p982_p10), 0.0  }
  0x23   : > { %s1338_s7 = scalar_lea.vmem %s1447_s1, %s1065_s4  ;;  %256 = vst [vmem:[#allocation2] sm:$0xff] (!%p982_p10), %v1267_v8  ;;  %257 = vst [vmem:[#allocation2 + $0x8] sm:$0xff] (!%p982_p10), %v1267_v8 }
  0x24   : > { %258 = vst [vmem:[#allocation2 + $0x10] sm:$0xff] (!%p982_p10), %v1267_v8  ;;  %259 = vst [vmem:[#allocation2 + $0x18] sm:$0xff] (!%p982_p10), %v1267_v8 }
  0x25   : > { %260 = vst [vmem:[#allocation2 + $0x20] sm:$0xff] (!%p982_p10), %v1267_v8  ;;  %261 = vst [vmem:[#allocation2 + $0x28] sm:$0xff] (!%p982_p10), %v1267_v8 }
  0x26   : > { %262 = vst [vmem:[#allocation2 + $0x30] sm:$0xff] (!%p982_p10), %v1267_v8  ;;  %263 = vst [vmem:[#allocation2 + $0x38] sm:$0xff] (!%p982_p10), %v1267_v8 }
  0x28 PF: > { %v1119_v9 = vld [vmem:[%s1338_s7 + $0x4] ss:$8 sps:$4 sm:$0xff]   ;;  %v1123_v11 = vld [vmem:[%s1338_s7] ss:$8 sps:$4 sm:$0xff]   ;;  %v1125_v13 = vld [vmem:[%s1338_s7 + $0x14] ss:$8 sps:$4 sm:$0xff]  }
  0x29   : > { %v1121_v10 = vld [vmem:[%s1338_s7 + $0x104] ss:$8 sps:$4 sm:$0xff]   ;;  %704 = vmatprep.subr.bf16.mxu1 %v1119_v9  ;;  %v1124_v12 = vld [vmem:[%s1338_s7 + $0x100] ss:$8 sps:$4 sm:$0xff]   ;;  %v1127_v14 = vld [vmem:[%s1338_s7 + $0x114] ss:$8 sps:$4 sm:$0xff]  }
  0x2a   : > { %757 = vmatprep.subr.bf16.mxu0 %v1121_v10  ;;  %705 = vmatpush1.bf16.msra.mxu1 %v1123_v11  ;;  %v1129_v15 = vld [vmem:[%s1338_s7 + $0x10] ss:$8 sps:$4 sm:$0xff]   ;;  %v1131_v17 = vld [vmem:[%s1338_s7 + $0x24] ss:$8 sps:$4 sm:$0xff]   ;;  %v1135_v19 = vld [vmem:[%s1338_s7 + $0x20] ss:$8 sps:$4 sm:$0xff]  }
  0x2b   : > { %758 = vmatpush1.bf16.msra.mxu0 %v1124_v12  ;;  %706 = vmatprep.subr.bf16.mxu1 %v1125_v13  ;;  %v1130_v16 = vld [vmem:[%s1338_s7 + $0x110] ss:$8 sps:$4 sm:$0xff]   ;;  %v1133_v18 = vld [vmem:[%s1338_s7 + $0x124] ss:$8 sps:$4 sm:$0xff]   ;;  %v1136_v20 = vld [vmem:[%s1338_s7 + $0x120] ss:$8 sps:$4 sm:$0xff]  }
  0x2c   : > { %759 = vmatprep.subr.bf16.mxu0 %v1127_v14  ;;  %v1137_v21 = vld [vmem:[%s1338_s7 + $0x34] ss:$8 sps:$4 sm:$0xff]   ;;  %v1141_v23 = vld [vmem:[%s1338_s7 + $0x30] ss:$8 sps:$4 sm:$0xff]   ;;  %v1143_v25 = vld [vmem:[%s1338_s7 + $0x44] ss:$8 sps:$4 sm:$0xff]  }
  0x2d   : > { %v1139_v22 = vld [vmem:[%s1338_s7 + $0x134] ss:$8 sps:$4 sm:$0xff]   ;;  %v1142_v24 = vld [vmem:[%s1338_s7 + $0x130] ss:$8 sps:$4 sm:$0xff]   ;;  %v1145_v26 = vld [vmem:[%s1338_s7 + $0x144] ss:$8 sps:$4 sm:$0xff]  }
  0x2e   : > { %707 = vmatpush1.bf16.msra.mxu1 %v1129_v15  ;;  %v1147_v27 = vld [vmem:[%s1338_s7 + $0x40] ss:$8 sps:$4 sm:$0xff]   ;;  %v1149_v29 = vld [vmem:[%s1338_s7 + $0x54] ss:$8 sps:$4 sm:$0xff]   ;;  %v1153_v31 = vld [vmem:[%s1338_s7 + $0x50] ss:$8 sps:$4 sm:$0xff]  }
  0x2f   : > { %760 = vmatpush1.bf16.msra.mxu0 %v1130_v16  ;;  %708 = vmatprep.subr.bf16.mxu1 %v1131_v17  ;;  %v1148_v28 = vld [vmem:[%s1338_s7 + $0x140] ss:$8 sps:$4 sm:$0xff]   ;;  %v1151_v30 = vld [vmem:[%s1338_s7 + $0x154] ss:$8 sps:$4 sm:$0xff]   ;;  %v1154_v32 = vld [vmem:[%s1338_s7 + $0x150] ss:$8 sps:$4 sm:$0xff]  }
  0x30   : > { %761 = vmatprep.subr.bf16.mxu0 %v1133_v18  ;;  %v1155_v33 = vld [vmem:[%s1338_s7 + $0x64] ss:$8 sps:$4 sm:$0xff]   ;;  %v1159_v35 = vld [vmem:[%s1338_s7 + $0x60] ss:$8 sps:$4 sm:$0xff]   ;;  %v1161_v37 = vld [vmem:[%s1338_s7 + $0x74] ss:$8 sps:$4 sm:$0xff]  }
  0x31   : > { %v1157_v34 = vld [vmem:[%s1338_s7 + $0x164] ss:$8 sps:$4 sm:$0xff]   ;;  %v1160_v36 = vld [vmem:[%s1338_s7 + $0x160] ss:$8 sps:$4 sm:$0xff]   ;;  %v1163_v38 = vld [vmem:[%s1338_s7 + $0x174] ss:$8 sps:$4 sm:$0xff]  }
  0x32   : > { %709 = vmatpush1.bf16.msra.mxu1 %v1135_v19  ;;  %v1165_v39 = vld [vmem:[%s1338_s7 + $0x70] ss:$8 sps:$4 sm:$0xff]   ;;  %v1167_v41 = vld [vmem:[%s1338_s7 + $0x84] ss:$8 sps:$4 sm:$0xff]   ;;  %v1171_v43 = vld [vmem:[%s1338_s7 + $0x80] ss:$8 sps:$4 sm:$0xff]  }
  0x33   : > { %762 = vmatpush1.bf16.msra.mxu0 %v1136_v20  ;;  %710 = vmatprep.subr.bf16.mxu1 %v1137_v21  ;;  %v1166_v40 = vld [vmem:[%s1338_s7 + $0x170] ss:$8 sps:$4 sm:$0xff]   ;;  %v1169_v42 = vld [vmem:[%s1338_s7 + $0x184] ss:$8 sps:$4 sm:$0xff]   ;;  %v1172_v44 = vld [vmem:[%s1338_s7 + $0x180] ss:$8 sps:$4 sm:$0xff]  }
  0x34   : > { %763 = vmatprep.subr.bf16.mxu0 %v1139_v22  ;;  %v1173_v45 = vld [vmem:[%s1338_s7 + $0x94] ss:$8 sps:$4 sm:$0xff]   ;;  %v1177_v47 = vld [vmem:[%s1338_s7 + $0x90] ss:$8 sps:$4 sm:$0xff]   ;;  %v1179_v49 = vld [vmem:[%s1338_s7 + $0xa4] ss:$8 sps:$4 sm:$0xff]  }
  0x35   : > { %v1175_v46 = vld [vmem:[%s1338_s7 + $0x194] ss:$8 sps:$4 sm:$0xff]   ;;  %v1178_v48 = vld [vmem:[%s1338_s7 + $0x190] ss:$8 sps:$4 sm:$0xff]   ;;  %v1181_v50 = vld [vmem:[%s1338_s7 + $0x1a4] ss:$8 sps:$4 sm:$0xff]  }
  0x36   : > { %711 = vmatpush1.bf16.msra.mxu1 %v1141_v23  ;;  %v1183_v51 = vld [vmem:[%s1338_s7 + $0xa0] ss:$8 sps:$4 sm:$0xff]   ;;  %v1185_v53 = vld [vmem:[%s1338_s7 + $0xb4] ss:$8 sps:$4 sm:$0xff]   ;;  %v1189_v55 = vld [vmem:[%s1338_s7 + $0xb0] ss:$8 sps:$4 sm:$0xff]  }
  0x37   : > { %764 = vmatpush1.bf16.msra.mxu0 %v1142_v24  ;;  %712 = vmatprep.subr.bf16.mxu1 %v1143_v25  ;;  %v1184_v52 = vld [vmem:[%s1338_s7 + $0x1a0] ss:$8 sps:$4 sm:$0xff]   ;;  %v1187_v54 = vld [vmem:[%s1338_s7 + $0x1b4] ss:$8 sps:$4 sm:$0xff]   ;;  %v1190_v56 = vld [vmem:[%s1338_s7 + $0x1b0] ss:$8 sps:$4 sm:$0xff]  }
  0x38   : > { %765 = vmatprep.subr.bf16.mxu0 %v1145_v26  ;;  %v1191_v57 = vld [vmem:[%s1338_s7 + $0xc4] ss:$8 sps:$4 sm:$0xff]   ;;  %v1195_v61 = vld [vmem:[%s1338_s7 + $0xc0] ss:$8 sps:$4 sm:$0xff]   ;;  %v1197_v63 = vld [vmem:[%s1338_s7 + $0xd4] ss:$8 sps:$4 sm:$0xff]  }
  0x39   : > { %v1217_v58 = vld [vmem:[%s1340_s8 + $0x4] ss:$16 sps:$4 sm:$0xff]   ;;  %v1220_v60 = vld [vmem:[%s1340_s8 + $0xc] ss:$16 sps:$4 sm:$0xff]   ;;  %v1196_v62 = vld [vmem:[%s1338_s7 + $0x1c0] ss:$8 sps:$4 sm:$0xff]  }
  0x3a   : > { %713 = vmatpush1.bf16.msra.mxu1 %v1147_v27  ;;  %v1193_v59 = vld [vmem:[%s1338_s7 + $0x1c4] ss:$8 sps:$4 sm:$0xff]   ;;  %736 = vmatprep.mubr.bf16.mxu1 %v1217_v58  ;;  %v1199_v0 = vld [vmem:[%s1338_s7 + $0x1d4] ss:$8 sps:$4 sm:$0xff]   ;;  %v1201_v1 = vld [vmem:[%s1338_s7 + $0xd0] ss:$8 sps:$4 sm:$0xff]  }
  0x3b   : > { %766 = vmatpush1.bf16.msra.mxu0 %v1148_v28  ;;  %714 = vmatprep.subr.bf16.mxu1 %v1149_v29  ;;  %v1202_v2 = vld [vmem:[%s1338_s7 + $0x1d0] ss:$8 sps:$4 sm:$0xff]   ;;  %v1203_v3 = vld [vmem:[%s1338_s7 + $0xe4] ss:$8 sps:$4 sm:$0xff]   ;;  %v1207_v5 = vld [vmem:[%s1338_s7 + $0xe0] ss:$8 sps:$4 sm:$0xff]  }
  0x3c   : > { %767 = vmatprep.subr.bf16.mxu0 %v1151_v30  ;;  %789 = vmatprep.mubr.bf16.mxu0 %v1220_v60  ;;  %v1205_v4 = vld [vmem:[%s1338_s7 + $0x1e4] ss:$8 sps:$4 sm:$0xff]   ;;  %v1208_v6 = vld [vmem:[%s1338_s7 + $0x1e0] ss:$8 sps:$4 sm:$0xff]   ;;  %v1209_v7 = vld [vmem:[%s1338_s7 + $0xf4] ss:$8 sps:$4 sm:$0xff]  }
  0x3d   : > { %v1211_v8 = vld [vmem:[%s1338_s7 + $0x1f4] ss:$8 sps:$4 sm:$0xff]   ;;  %v1213_v9 = vld [vmem:[%s1338_s7 + $0xf0] ss:$8 sps:$4 sm:$0xff]   ;;  %v264_v18 = vld [vmem:[#allocation2] sm:$0xff]  ;;  %p1055_p11 = scmp.ne.s32.totalorder %s1257_s14, 3 }
  0x3e   : > { %715 = vmatpush1.bf16.msra.mxu1 %v1153_v31  ;;  %v1214_v10 = vld [vmem:[%s1338_s7 + $0x1f0] ss:$8 sps:$4 sm:$0xff]   ;;  %v1221_v13 = vld [vmem:[%s1340_s8 + $0x24] ss:$16 sps:$4 sm:$0xff]   ;;  %v1223_v14 = vld [vmem:[%s1340_s8 + $0x2c] ss:$16 sps:$4 sm:$0xff]  }
  0x3f   : > { %768 = vmatpush1.bf16.msra.mxu0 %v1154_v32  ;;  %716 = vmatprep.subr.bf16.mxu1 %v1155_v33  ;;  %v1215_v11 = vld [vmem:[%s1340_s8] ss:$16 sps:$4 sm:$0xff]   ;;  %v1218_v12 = vld [vmem:[%s1340_s8 + $0x8] ss:$16 sps:$4 sm:$0xff]  }
  0x40   : > { %769 = vmatprep.subr.bf16.mxu0 %v1157_v34  ;;  %v1225_v15 = vld [vmem:[%s1340_s8 + $0x20] ss:$16 sps:$4 sm:$0xff]   ;;  %v1226_v16 = vld [vmem:[%s1340_s8 + $0x28] ss:$16 sps:$4 sm:$0xff]  }
  0x41   : > { %v265_v22 = vld [vmem:[#allocation2 + $0x8] sm:$0xff]  ;;  %v266_v26 = vld [vmem:[#allocation2 + $0x10] sm:$0xff]  ;;  %v267_v31 = vld [vmem:[#allocation2 + $0x18] sm:$0xff] }
  0x42   : > { %717 = vmatpush1.bf16.msra.mxu1 %v1159_v35 }
  0x43   : > { %770 = vmatpush1.bf16.msra.mxu0 %v1160_v36  ;;  %718 = vmatprep.subr.bf16.mxu1 %v1161_v37 }
  0x44   : > { %771 = vmatprep.subr.bf16.mxu0 %v1163_v38  ;;  %v268_v38 = vld [vmem:[#allocation2 + $0x20] sm:$0xff] }
  0x46   : > { %719 = vmatpush1.bf16.msra.mxu1 %v1165_v39 }
  0x47   : > { %772 = vmatpush1.bf16.msra.mxu0 %v1166_v40  ;;  %720 = vmatprep.subr.bf16.mxu1 %v1167_v41 }
  0x48   : > { %773 = vmatprep.subr.bf16.mxu0 %v1169_v42  ;;  %v269_v42 = vld [vmem:[#allocation2 + $0x28] sm:$0xff] }
  0x4a   : > { %721 = vmatpush1.bf16.msra.mxu1 %v1171_v43 }
  0x4b   : > { %774 = vmatpush1.bf16.msra.mxu0 %v1172_v44  ;;  %722 = vmatprep.subr.bf16.mxu1 %v1173_v45 }
  0x4c   : > { %775 = vmatprep.subr.bf16.mxu0 %v1175_v46  ;;  %v270_v46 = vld [vmem:[#allocation2 + $0x30] sm:$0xff] }
  0x4e   : > { %723 = vmatpush1.bf16.msra.mxu1 %v1177_v47 }
  0x4f   : > { %776 = vmatpush1.bf16.msra.mxu0 %v1178_v48  ;;  %724 = vmatprep.subr.bf16.mxu1 %v1179_v49 }
  0x50   : > { %777 = vmatprep.subr.bf16.mxu0 %v1181_v50 }
  0x52   : > { %725 = vmatpush1.bf16.msra.mxu1 %v1183_v51  ;;  %v271_v51 = vld [vmem:[#allocation2 + $0x38] sm:$0xff] }
  0x53   : > { %778 = vmatpush1.bf16.msra.mxu0 %v1184_v52  ;;  %726 = vmatprep.subr.bf16.mxu1 %v1185_v53 }
  0x54   : > { %779 = vmatprep.subr.bf16.mxu0 %v1187_v54 }
  0x56   : > { %727 = vmatpush1.bf16.msra.mxu1 %v1189_v55 }
  0x57   : > { %780 = vmatpush1.bf16.msra.mxu0 %v1190_v56  ;;  %728 = vmatprep.subr.bf16.mxu1 %v1191_v57  ;;  %v840_v57 = vlaneseq (!%p1055_p11) }
  0x58   : > { %781 = vmatprep.subr.bf16.mxu0 %v1193_v59  ;;  %v838_v59 = vld [vmem:[%s1448_s2] sm:$0x3] (!%p1055_p11) }
  0x59   : > { %v841_v58 = vshrl.u32 (!%p1055_p11), %v840_v57, 7 }
  0x5a   : > { %729 = vmatpush1.bf16.msra.mxu1 %v1195_v61 }
  0x5b   : > { %782 = vmatpush1.bf16.msra.mxu0 %v1196_v62  ;;  %730 = vmatprep.subr.bf16.mxu1 %v1197_v63  ;;  %v842_v62 = vsub.s32 (!%p1055_p11), 0, %v841_v58  ;;  %v846_v63 = vsub.s32 (!%p1055_p11), 1, %v841_v58 }
  0x5c   : > { %783 = vmatprep.subr.bf16.mxu0 %v1199_v0 }
  0x5e   : > { %731 = vmatpush1.bf16.msra.mxu1 %v1201_v1 }
  0x5f   : > { %784 = vmatpush1.bf16.msra.mxu0 %v1202_v2  ;;  %732 = vmatprep.subr.bf16.mxu1 %v1203_v3  ;;  %v843_v3 = vrot.slane (!%p1055_p11), %v838_v59, %v842_v62 }
  0x60   : > { %785 = vmatprep.subr.bf16.mxu0 %v1205_v4  ;;  %v847_v4 = vrot.slane (!%p1055_p11), %v838_v59, %v846_v63 }
  0x62   : > { %733 = vmatpush1.bf16.msra.mxu1 %v1207_v5 }
  0x63   : > { %786 = vmatpush1.bf16.msra.mxu0 %v1208_v6  ;;  %734 = vmatprep.subr.bf16.mxu1 %v1209_v7 }
  0x64   : > { %787 = vmatprep.subr.bf16.mxu0 %v1211_v8 }
  0x66   : > { %735 = vmatpush1.bf16.msra.mxu1 %v1213_v9 }
  0x67   : > { %788 = vmatpush1.bf16.msra.mxu0 %v1214_v10 }
  0x69   : > { %737 = vmatmul.mubr.bf16.vlgmr.msra.gmra.mrb[0].mxu1 %v1215_v11 }
  0x6a   : > { %790 = vmatmul.mubr.bf16.vlgmr.msra.gmra.mrb[0].mxu0 %v1218_v12  ;;  %746 = vmatprep.mubr.bf16.mxu1 %v1221_v13 }
  0x6b   : > { %799 = vmatprep.mubr.bf16.mxu0 %v1223_v14 }
  0x71   : > { %747 = vmatmul.mubr.bf16.gmra.mrb[4].mxu1 %v1225_v15 }
  0x72   : > { %800 = vmatmul.mubr.bf16.gmra.mrb[4].mxu0 %v1226_v16 }
 0x13c   : > { %v738_v17 = vpop.f32.mrb[0].mxu1 }
 0x13d   : > { %v791_v19 = vpop.f32.mrb[0].mxu0  ;;  %v740_v21 = vpop.f32.mrb[1].mxu1 }
 0x13e   : > { %v792_v20 = vadd.f32 %v791_v19, %v738_v17  ;;  %v793_v23 = vpop.f32.mrb[1].mxu0  ;;  %v742_v25 = vpop.f32.mrb[2].mxu1 }
 0x13f   : > { %v794_v24 = vadd.f32 %v793_v23, %v740_v21  ;;  %v795_v27 = vpop.f32.mrb[2].mxu0  ;;  %v744_v30 = vpop.f32.mrb[3].mxu1 }
 0x140   : > { %v810_v28 = vadd.f32 %v792_v20, %v264_v18  ;;  %v796_v29 = vadd.f32 %v795_v27, %v742_v25  ;;  %v797_v32 = vpop.f32.mrb[3].mxu0 }
 0x141   : > { %v811_v33 = vadd.f32 %v794_v24, %v265_v22  ;;  %v798_v34 = vadd.f32 %v797_v32, %v744_v30 }
 0x142   : > { %818 = vst [vmem:[#allocation2] sm:$0xff] %v810_v28  ;;  %v812_v35 = vadd.f32 %v796_v29, %v266_v26 }
 0x143   : > { %819 = vst [vmem:[#allocation2 + $0x8] sm:$0xff] %v811_v33  ;;  %v813_v36 = vadd.f32 %v798_v34, %v267_v31 }
 0x144   : > { %820 = vst [vmem:[#allocation2 + $0x10] sm:$0xff] %v812_v35  ;;  %v748_v37 = vpop.f32.mrb[4].mxu1 }
 0x145   : > { %821 = vst [vmem:[#allocation2 + $0x18] sm:$0xff] %v813_v36  ;;  %v801_v39 = vpop.f32.mrb[4].mxu0  ;;  %v750_v41 = vpop.f32.mrb[5].mxu1 }
 0x146   : > { %v802_v40 = vadd.f32 %v801_v39, %v748_v37  ;;  %v803_v43 = vpop.f32.mrb[5].mxu0  ;;  %v752_v45 = vpop.f32.mrb[6].mxu1 }
 0x147   : > { %v804_v44 = vadd.f32 %v803_v43, %v750_v41  ;;  %v805_v47 = vpop.f32.mrb[6].mxu0  ;;  %v754_v50 = vpop.f32.mrb[7].mxu1  ;;  %829 = sbr.rel (%p1055_p11) target bundleno = 346 (0x15a), region = 63 }
 0x148   : > { %v814_v48 = vadd.f32 %v802_v40, %v268_v38  ;;  %v806_v49 = vadd.f32 %v805_v47, %v752_v45  ;;  %v807_v52 = vpop.f32.mrb[7].mxu0 }
 0x149   : > { %v815_v53 = vadd.f32 %v804_v44, %v269_v42  ;;  %v808_v54 = vadd.f32 %v807_v52, %v754_v50  ;;  %v830_v60 = vld [vmem:[#allocation2] sm:$0xff] (!%p1055_p11) }
 0x14a   : > { %822 = vst [vmem:[#allocation2 + $0x20] sm:$0xff] %v814_v48  ;;  %v816_v55 = vadd.f32 %v806_v49, %v270_v46  ;;  %v831_v61 = vld [vmem:[#allocation2 + $0x8] sm:$0xff] (!%p1055_p11)  ;;  %v850_v8 = vadd.f32 (!%p1055_p11), %v843_v3, %v830_v60 }
 0x14b   : > { %823 = vst [vmem:[#allocation2 + $0x28] sm:$0xff] %v815_v53  ;;  %v817_v56 = vadd.f32 %v808_v54, %v271_v51  ;;  %v832_v0 = vld [vmem:[#allocation2 + $0x10] sm:$0xff] (!%p1055_p11)  ;;  %v851_v9 = vadd.f32 (!%p1055_p11), %v847_v4, %v831_v61 }
 0x14c   : > { %824 = vst [vmem:[#allocation2 + $0x30] sm:$0xff] %v816_v55  ;;  %v833_v1 = vld [vmem:[#allocation2 + $0x18] sm:$0xff] (!%p1055_p11)  ;;  %v852_v10 = vadd.f32 (!%p1055_p11), %v843_v3, %v832_v0 }
 0x14d   : > { %825 = vst [vmem:[#allocation2 + $0x38] sm:$0xff] %v817_v56  ;;  %v853_v11 = vadd.f32 (!%p1055_p11), %v847_v4, %v833_v1  ;;  %v1066_v16 = vpack.c.bf16 (!%p1055_p11), %v851_v9, %v850_v8 }
 0x14f   : > { %v1067_v17 = vpack.c.bf16 %v853_v11, %v852_v10  ;;  %882 = vst [vmem:[%s1449_s3] sm:$0xff] %v1066_v16 }
 0x151   : > { %v834_v2 = vld [vmem:[#allocation2 + $0x20] sm:$0xff]  ;;  %883 = vst [vmem:[%s1449_s3 + $0x8] sm:$0xff] %v1067_v17 }
 0x152   : > { %v835_v5 = vld [vmem:[#allocation2 + $0x28] sm:$0xff]  ;;  %v854_v12 = vadd.f32 %v843_v3, %v834_v2 }
 0x153   : > { %v836_v6 = vld [vmem:[#allocation2 + $0x30] sm:$0xff]  ;;  %v855_v13 = vadd.f32 %v847_v4, %v835_v5 }
 0x154   : > { %v837_v7 = vld [vmem:[#allocation2 + $0x38] sm:$0xff]  ;;  %v856_v14 = vadd.f32 %v843_v3, %v836_v6 }
 0x155   : > { %v857_v15 = vadd.f32 %v847_v4, %v837_v7  ;;  %v1068_v18 = vpack.c.bf16 %v855_v13, %v854_v12 }
 0x157   : > { %v1069_v19 = vpack.c.bf16 %v857_v15, %v856_v14  ;;  %884 = vst [vmem:[%s1449_s3 + $0x10] sm:$0xff] %v1068_v18 }
 0x159   : > { %885 = vst [vmem:[%s1449_s3 + $0x18] sm:$0xff] %v1069_v19 }
 0x15a PF: > { %s13_s16 = sadd.s32 1, %s1265_s16   ;;  %s1450_s12 = smov %s1253_s13 }
 0x15b   : > { %p10_p12 = scmp.ge.s32.totalorder %s13_s16, 6   ;;  %s1451_s13 = smov %s1323_s20 }
 0x15c   : > { %s1452_s14 = smov %s1261_s15  ;;  %s1453_s15 = smov %s1455_s17 }
 0x15d   :  { %12 = sbr.rel (!%p10_p12) target bundleno = 3 (0x3), region = 101 }

// kernel: _lambda_.14
= control target key start
LH: loop header
LB: loop body
LE: loop exit
PB: predicated region body
PF: predicated region fallthrough
CT: control target
= control target key end

     0   :  { %s366_s6 = smov 0   ;;  %s368_s7 = smov 0   ;;  %s424_s0 = inlined_call_operand.vmem [shape: bf16[2,4,512], index: 0, kind: input, shape index: {}]   ;;  %s425_s1 = inlined_call_operand.vmem [shape: bf16[2,4,512], index: 1, kind: output, shape index: {}]  }
   0x1   :  { %s370_s8 = smov 0   ;;  %s372_s9 = smov 0  }
   0x2   :  { %s374_s10 = smov 0  }
   0x3 LB: > { %s20_s11 = sadd.s32 1, %s346_s8  ;;  %s23_s12 = sadd.s32 1, %s350_s9  ;;  %s354_s10 = sphi %s374_s10, %s11_s10   ;;  %s350_s9 = sphi %s372_s9, %s429_s9   ;;  %s346_s8 = sphi %s370_s8, %s428_s8   ;;  %s342_s7 = sphi %s368_s7, %s427_s7   ;;  %s338_s6 = sphi %s366_s6, %s426_s6  }
   0x4   : > { %p21_p0 = scmp.ge.s32.totalorder %s20_s11, 4  ;;  %p267_p1 = scmp.ge.s32.totalorder %s354_s10, 1 }
   0x5   : > { %p106_p2 = scmp.lt.s32.totalorder %s354_s10, 9 }
   0x6   : > { %s431_s11 = smov (%p21_p0, %s20_s11), 0  ;;  %s433_s12 = smov (!%p21_p0, %s23_s12), %s350_s9 }
   0x7   : > { %p107_p3 = pnand %p267_p1, %p106_p2  ;;  %p25_p4 = scmp.ge.s32.totalorder %s433_s12, 2 }
   0x8   : > { %p132_p5 = scmp.lt.s32.totalorder (!%p107_p3), %s342_s7, 1  ;;  %p134_p6 = scmp.lt.s32.totalorder (!%p107_p3), %s338_s6, 3  ;;  %vm150_vm0 = vcmask (!%p107_p3), 1043456  }
   0x9   : > { %s435_s12 = smov (%p25_p4, %s433_s12), 0  ;;  %110 = sbr.rel (%p107_p3) target bundleno = 79 (0x4f), region = 24 }
  0x10   : > { %s437_s7 = smov (!%p132_p5, %s342_s7), 1  ;;  %s439_s6 = smov (!%p134_p6, %s338_s6), 3 }
  0x11   : > { %s268_s13 = sshll.u32 %s437_s7, 2 }
  0x12   : > { %s396_s14 = sadd.s32 %s268_s13, %s439_s6 }
  0x13   : > { %s269_s15 = sshll.u32 %s396_s14, 1 }
  0x14   : > { %s139_s18 = scalar_lea.vmem %s424_s0, %s269_s15  ;;  %s147_s21 = scalar_lea.vmem %s425_s1, %s269_s15 }
  0x15   : > { %v148_v0 = vld [vmem:[%s139_s18] sm:$0x3] }
  0x16   : > { %v149_v1 = vunpack.c.l.bf16 %v148_v0 }
  0x18   : > { %v151_v2 = vsel %vm150_vm0, %v149_v1, 0.0 }
  0x19   : > { %v152_v3 = vrot.slane %v151_v2, 4 }
  0x1b   : > { %v153_v4 = vadd.f32 %v152_v3, %v151_v2 }
  0x1d   : > { %v154_v5 = vrot.slane %v153_v4, 2 }
  0x1f   : > { %v155_v6 = vadd.f32 %v154_v5, %v153_v4 }
  0x21   : > { %v156_v7 = vrot.slane %v155_v6, 1 }
  0x23   : > { %v157_v8 = vadd.f32 %v156_v7, %v155_v6 }
  0x25   : > { %v158_v9 = vmul.f32 0.25, %v157_v8 }
  0x27   : > { %v159_v10 = vsub.f32 %v149_v1, %v158_v9 }
  0x29   : > { %v160_v11 = vmul.f32 %v159_v10, %v159_v10 }
  0x2b   : > { %v161_v12 = vsel %vm150_vm0, %v160_v11, 0.0 }
  0x2c   : > { %v162_v13 = vrot.slane %v161_v12, 4 }
  0x2e   : > { %v163_v14 = vadd.f32 %v162_v13, %v161_v12 }
  0x30   : > { %v164_v15 = vrot.slane %v163_v14, 2 }
  0x32   : > { %v165_v16 = vadd.f32 %v164_v15, %v163_v14 }
  0x34   : > { %v166_v17 = vrot.slane %v165_v16, 1 }
  0x36   : > { %v167_v18 = vadd.f32 %v166_v17, %v165_v16 }
  0x38   : > { %v168_v19 = vmul.f32 0.25, %v167_v18 }
  0x3a   : > { %v169_v20 = vadd.f32 1e-05, %v168_v19 }
  0x3c   : > { %314 = vrsqrt.f32 %v169_v20 }
  0x46   : > { %v315_v21 = vpop.eup %314 }
  0x47   : > { %v171_v22 = vmul.f32 %v315_v21, %v159_v10 }
  0x49   : > { %vm172_vm1 = vcmp.ge.f32.partialorder %v171_v22, 0.0  ;;  %v173_v23 = vmul.f32 0.2, %v171_v22 }
  0x4b   : > { %v174_v24 = vsel %vm172_vm1, %v171_v22, %v173_v23 }
  0x4c   : > { %v175_v25 = vpack.c.bf16 %v174_v24, %v174_v24 }
  0x4e   : > { %176 = vst [vmem:[%s147_s21] sm:$0x3] %v175_v25 }
  0x4f PF: > { %s11_s10 = sadd.s32 1, %s354_s10   ;;  %s426_s6 = smov %s346_s8 }
  0x50   : > { %p8_p7 = scmp.ge.s32.totalorder %s11_s10, 10   ;;  %s427_s7 = smov %s350_s9 }
  0x51   : > { %s428_s8 = smov %s431_s11  ;;  %s429_s9 = smov %s435_s12 }
  0x52   :  { %10 = sbr.rel (!%p8_p7) target bundleno = 3 (0x3), region = 54 }

// kernel: _lambda_.13
= control target key start
LH: loop header
LB: loop body
LE: loop exit
PB: predicated region body
PF: predicated region fallthrough
CT: control target
= control target key end

     0   :  { %s1740_s12 = smov 0   ;;  %s1742_s13 = smov 0   ;;  %s1934_s0 = inlined_call_operand.vmem [shape: bf16[8,4096], index: 0, kind: input, shape index: {}]   ;;  %s1935_s1 = inlined_call_operand.vmem [shape: bf16[4096,512], index: 1, kind: input, shape index: {}]   ;;  %s1936_s2 = inlined_call_operand.vmem [shape: f32[1,512], index: 2, kind: input, shape index: {}]   ;;  %s1937_s3 = inlined_call_operand.vmem [shape: bf16[8,512], index: 3, kind: output, shape index: {}]  }
   0x1   :  { %s1744_s14 = smov 0  }
   0x2 LB: > { %s22_s15 = sadd.s32 1, %s1713_s13  ;;  %p1326_p0 = scmp.ge.s32.totalorder %s1717_s14, 1  ;;  %s1717_s14 = sphi %s1744_s14, %s13_s14   ;;  %s1713_s13 = sphi %s1742_s13, %s1939_s13   ;;  %s1709_s12 = sphi %s1740_s12, %s1938_s12  }
   0x3   : > { %p23_p1 = scmp.ge.s32.totalorder %s22_s15, 8  ;;  %p168_p2 = scmp.lt.s32.totalorder %s1717_s14, 9 }
   0x5   : > { %s1941_s15 = smov (%p23_p1, %s22_s15), 0  ;;  %p169_p3 = pnand %p1326_p0, %p168_p2 }
   0x6   : > { %s1327_s16 = sshll.u32 (!%p169_p3), %s1709_s12, 2  ;;  %s1329_s17 = sshll.u32 (!%p169_p3), %s1709_s12, 6 }
   0x7   : > { %172 = sbr.rel (%p169_p3) target bundleno = 384 (0x180), region = 32  ;;  %p205_p4 = scmp.lt.s32.totalorder (!%p169_p3), %s1327_s16, 31 }
   0x8   : > { %p213_p5 = scmp.lt.s32.totalorder (!%p169_p3), %s1329_s17, 511  ;;  %p1332_p6 = scmp.ne.s32.totalorder (!%p169_p3), %s1709_s12, 0 }
   0xe   : > { %s1943_s16 = smov (!%p205_p4, %s1327_s16), 31  ;;  %s1945_s17 = smov (!%p213_p5, %s1329_s17), 511 }
   0xf   : > { %s1328_s18 = sshll.u32 %s1943_s16, 2  ;;  %s1471_s22 = sshll.u32 %s1945_s17, 4  ;;  %v1719_v0 = vmov (!%p1332_p6), 0.0  }
  0x10   : > { %s1765_s21 = scalar_lea.vmem %s1934_s0, %s1328_s18  ;;  %s1770_s25 = scalar_lea.vmem %s1935_s1, %s1471_s22  ;;  %228 = vst [vmem:[#allocation2] sm:$0xff] (!%p1332_p6), %v1719_v0  ;;  %229 = vst [vmem:[#allocation2 + $0x8] sm:$0xff] (!%p1332_p6), %v1719_v0 }
  0x11   : > { %227 = sbr.rel (%p1332_p6) target bundleno = 24 (0x18), region = 36  ;;  %230 = vst [vmem:[#allocation2 + $0x10] sm:$0xff] (!%p1332_p6), %v1719_v0  ;;  %231 = vst [vmem:[#allocation2 + $0x18] sm:$0xff] (!%p1332_p6), %v1719_v0 }
  0x18 PF: > { %v1499_v1 = vld [vmem:[%s1770_s25 + $0x4] ss:$16 sps:$4 sm:$0xff]   ;;  %v1503_v3 = vld [vmem:[%s1770_s25] ss:$16 sps:$4 sm:$0xff]   ;;  %v237_v49 = vld [vmem:[%s1765_s21 + $0x8] sm:$0xff]  ;;  %p1465_p7 = scmp.ne.s32.totalorder %s1709_s12, 7 }
  0x19   : > { %v1501_v2 = vld [vmem:[%s1770_s25 + $0x204] ss:$16 sps:$4 sm:$0xff]   ;;  %1020 = vmatprep.subr.bf16.mxu0 %v1499_v1  ;;  %v1504_v4 = vld [vmem:[%s1770_s25 + $0x200] ss:$16 sps:$4 sm:$0xff]   ;;  %v1336_v52 = vcombine.high %v237_v49, %v237_v49 }
  0x1a   : > { %1061 = vmatprep.subr.bf16.mxu1 %v1501_v2  ;;  %v1505_v5 = vld [vmem:[%s1770_s25 + $0x24] ss:$16 sps:$4 sm:$0xff]   ;;  %1021 = vmatpush1.bf16.msra.mxu0 %v1503_v3  ;;  %v1509_v7 = vld [vmem:[%s1770_s25 + $0x20] ss:$16 sps:$4 sm:$0xff]  }
  0x1b   : > { %1062 = vmatpush1.bf16.msra.mxu1 %v1504_v4  ;;  %v1507_v6 = vld [vmem:[%s1770_s25 + $0x224] ss:$16 sps:$4 sm:$0xff]   ;;  %1022 = vmatprep.subr.bf16.mxu0 %v1505_v5  ;;  %v1510_v8 = vld [vmem:[%s1770_s25 + $0x220] ss:$16 sps:$4 sm:$0xff]   ;;  %v1601_v5 = vld [vmem:[%s1770_s25 + $0xc] ss:$16 sps:$4 sm:$0xff]  }
  0x1c   : > { %1063 = vmatprep.subr.bf16.mxu1 %v1507_v6  ;;  %v1511_v9 = vld [vmem:[%s1770_s25 + $0x44] ss:$16 sps:$4 sm:$0xff]   ;;  %v1515_v11 = vld [vmem:[%s1770_s25 + $0x40] ss:$16 sps:$4 sm:$0xff]   ;;  %1093 = vmatprep.mubr.bf16.mxu1 %v1336_v52  ;;  %v1604_v6 = vld [vmem:[%s1770_s25 + $0x20c] ss:$16 sps:$4 sm:$0xff]  }
  0x1d   : > { %v1513_v10 = vld [vmem:[%s1770_s25 + $0x244] ss:$16 sps:$4 sm:$0xff]   ;;  %v1516_v12 = vld [vmem:[%s1770_s25 + $0x240] ss:$16 sps:$4 sm:$0xff]  }
  0x1e   : > { %1023 = vmatpush1.bf16.msra.mxu0 %v1509_v7  ;;  %v1517_v13 = vld [vmem:[%s1770_s25 + $0x64] ss:$16 sps:$4 sm:$0xff]   ;;  %v1521_v15 = vld [vmem:[%s1770_s25 + $0x60] ss:$16 sps:$4 sm:$0xff]  }
  0x1f   : > { %1064 = vmatpush1.bf16.msra.mxu1 %v1510_v8  ;;  %1024 = vmatprep.subr.bf16.mxu0 %v1511_v9  ;;  %v1519_v14 = vld [vmem:[%s1770_s25 + $0x264] ss:$16 sps:$4 sm:$0xff]   ;;  %v1522_v16 = vld [vmem:[%s1770_s25 + $0x260] ss:$16 sps:$4 sm:$0xff]   ;;  %v1846_v8 = vcombine.low %v237_v49, %v237_v49  ;;  %v1599_v9 = vld [vmem:[%s1770_s25 + $0x8] ss:$16 sps:$4 sm:$0xff]  }
  0x20   : > { %1065 = vmatprep.subr.bf16.mxu1 %v1513_v10  ;;  %v1523_v17 = vld [vmem:[%s1770_s25 + $0x84] ss:$16 sps:$4 sm:$0xff]   ;;  %v1527_v19 = vld [vmem:[%s1770_s25 + $0x80] ss:$16 sps:$4 sm:$0xff]   ;;  %v1602_v10 = vld [vmem:[%s1770_s25 + $0x208] ss:$16 sps:$4 sm:$0xff]  }
  0x21   : > { %v1525_v18 = vld [vmem:[%s1770_s25 + $0x284] ss:$16 sps:$4 sm:$0xff]   ;;  %v1528_v20 = vld [vmem:[%s1770_s25 + $0x280] ss:$16 sps:$4 sm:$0xff]   ;;  %v1659_v49 = vld [vmem:[%s1770_s25 + $0x148] ss:$16 sps:$4 sm:$0xff]  }
  0x22   : > { %1025 = vmatpush1.bf16.msra.mxu0 %v1515_v11  ;;  %v1529_v21 = vld [vmem:[%s1770_s25 + $0xa4] ss:$16 sps:$4 sm:$0xff]   ;;  %v1533_v23 = vld [vmem:[%s1770_s25 + $0xa0] ss:$16 sps:$4 sm:$0xff]   ;;  %v1607_v11 = vld [vmem:[%s1770_s25 + $0x2c] ss:$16 sps:$4 sm:$0xff]  }
  0x23   : > { %1066 = vmatpush1.bf16.msra.mxu1 %v1516_v12  ;;  %1026 = vmatprep.subr.bf16.mxu0 %v1517_v13  ;;  %v1531_v22 = vld [vmem:[%s1770_s25 + $0x2a4] ss:$16 sps:$4 sm:$0xff]   ;;  %v1534_v24 = vld [vmem:[%s1770_s25 + $0x2a0] ss:$16 sps:$4 sm:$0xff]   ;;  %v1610_v12 = vld [vmem:[%s1770_s25 + $0x22c] ss:$16 sps:$4 sm:$0xff]  }
  0x24   : > { %1067 = vmatprep.subr.bf16.mxu1 %v1519_v14  ;;  %v1535_v25 = vld [vmem:[%s1770_s25 + $0xc4] ss:$16 sps:$4 sm:$0xff]   ;;  %v1539_v27 = vld [vmem:[%s1770_s25 + $0xc0] ss:$16 sps:$4 sm:$0xff]   ;;  %v1605_v13 = vld [vmem:[%s1770_s25 + $0x28] ss:$16 sps:$4 sm:$0xff]  }
  0x25   : > { %v1537_v26 = vld [vmem:[%s1770_s25 + $0x2c4] ss:$16 sps:$4 sm:$0xff]   ;;  %v1540_v28 = vld [vmem:[%s1770_s25 + $0x2c0] ss:$16 sps:$4 sm:$0xff]   ;;  %v1608_v14 = vld [vmem:[%s1770_s25 + $0x228] ss:$16 sps:$4 sm:$0xff]  }
  0x26   : > { %1027 = vmatpush1.bf16.msra.mxu0 %v1521_v15  ;;  %v1541_v29 = vld [vmem:[%s1770_s25 + $0xe4] ss:$16 sps:$4 sm:$0xff]   ;;  %v1545_v31 = vld [vmem:[%s1770_s25 + $0xe0] ss:$16 sps:$4 sm:$0xff]   ;;  %v1613_v15 = vld [vmem:[%s1770_s25 + $0x4c] ss:$16 sps:$4 sm:$0xff]  }
  0x27   : > { %1068 = vmatpush1.bf16.msra.mxu1 %v1522_v16  ;;  %1028 = vmatprep.subr.bf16.mxu0 %v1523_v17  ;;  %v1543_v30 = vld [vmem:[%s1770_s25 + $0x2e4] ss:$16 sps:$4 sm:$0xff]   ;;  %v1546_v32 = vld [vmem:[%s1770_s25 + $0x2e0] ss:$16 sps:$4 sm:$0xff]   ;;  %v1616_v16 = vld [vmem:[%s1770_s25 + $0x24c] ss:$16 sps:$4 sm:$0xff]  }
  0x28   : > { %1069 = vmatprep.subr.bf16.mxu1 %v1525_v18  ;;  %v1547_v33 = vld [vmem:[%s1770_s25 + $0x104] ss:$16 sps:$4 sm:$0xff]   ;;  %v1551_v35 = vld [vmem:[%s1770_s25 + $0x100] ss:$16 sps:$4 sm:$0xff]   ;;  %v1611_v17 = vld [vmem:[%s1770_s25 + $0x48] ss:$16 sps:$4 sm:$0xff]  }
  0x29   : > { %v1549_v34 = vld [vmem:[%s1770_s25 + $0x304] ss:$16 sps:$4 sm:$0xff]   ;;  %v1552_v36 = vld [vmem:[%s1770_s25 + $0x300] ss:$16 sps:$4 sm:$0xff]   ;;  %v1614_v18 = vld [vmem:[%s1770_s25 + $0x248] ss:$16 sps:$4 sm:$0xff]  }
  0x2a   : > { %1029 = vmatpush1.bf16.msra.mxu0 %v1527_v19  ;;  %v1553_v37 = vld [vmem:[%s1770_s25 + $0x124] ss:$16 sps:$4 sm:$0xff]   ;;  %v1557_v39 = vld [vmem:[%s1770_s25 + $0x120] ss:$16 sps:$4 sm:$0xff]   ;;  %v1619_v19 = vld [vmem:[%s1770_s25 + $0x6c] ss:$16 sps:$4 sm:$0xff]  }
  0x2b   : > { %1070 = vmatpush1.bf16.msra.mxu1 %v1528_v20  ;;  %1030 = vmatprep.subr.bf16.mxu0 %v1529_v21  ;;  %v1555_v38 = vld [vmem:[%s1770_s25 + $0x324] ss:$16 sps:$4 sm:$0xff]   ;;  %v1558_v40 = vld [vmem:[%s1770_s25 + $0x320] ss:$16 sps:$4 sm:$0xff]   ;;  %v1622_v20 = vld [vmem:[%s1770_s25 + $0x26c] ss:$16 sps:$4 sm:$0xff]  }
  0x2c   : > { %1071 = vmatprep.subr.bf16.mxu1 %v1531_v22  ;;  %v1559_v41 = vld [vmem:[%s1770_s25 + $0x144] ss:$16 sps:$4 sm:$0xff]   ;;  %v1563_v43 = vld [vmem:[%s1770_s25 + $0x140] ss:$16 sps:$4 sm:$0xff]   ;;  %v1617_v21 = vld [vmem:[%s1770_s25 + $0x68] ss:$16 sps:$4 sm:$0xff]  }
  0x2d   : > { %v1561_v42 = vld [vmem:[%s1770_s25 + $0x344] ss:$16 sps:$4 sm:$0xff]   ;;  %v1564_v44 = vld [vmem:[%s1770_s25 + $0x340] ss:$16 sps:$4 sm:$0xff]   ;;  %v1620_v22 = vld [vmem:[%s1770_s25 + $0x268] ss:$16 sps:$4 sm:$0xff]  }
  0x2e   : > { %1031 = vmatpush1.bf16.msra.mxu0 %v1533_v23  ;;  %v1565_v45 = vld [vmem:[%s1770_s25 + $0x164] ss:$16 sps:$4 sm:$0xff]   ;;  %v1569_v50 = vld [vmem:[%s1770_s25 + $0x160] ss:$16 sps:$4 sm:$0xff]   ;;  %v1625_v23 = vld [vmem:[%s1770_s25 + $0x8c] ss:$16 sps:$4 sm:$0xff]  }
  0x2f   : > { %1072 = vmatpush1.bf16.msra.mxu1 %v1534_v24  ;;  %1032 = vmatprep.subr.bf16.mxu0 %v1535_v25  ;;  %v1567_v46 = vld [vmem:[%s1770_s25 + $0x364] ss:$16 sps:$4 sm:$0xff]   ;;  %v1570_v51 = vld [vmem:[%s1770_s25 + $0x360] ss:$16 sps:$4 sm:$0xff]   ;;  %v1628_v24 = vld [vmem:[%s1770_s25 + $0x28c] ss:$16 sps:$4 sm:$0xff]  }
  0x30   : > { %1073 = vmatprep.subr.bf16.mxu1 %v1537_v26  ;;  %v236_v47 = vld [vmem:[%s1765_s21] sm:$0xff]  ;;  %v1623_v25 = vld [vmem:[%s1770_s25 + $0x88] ss:$16 sps:$4 sm:$0xff]  }
  0x31   : > { %v1820_v48 = vcombine.high %v236_v47, %v236_v47  ;;  %v1571_v53 = vld [vmem:[%s1770_s25 + $0x184] ss:$16 sps:$4 sm:$0xff]   ;;  %v1575_v55 = vld [vmem:[%s1770_s25 + $0x180] ss:$16 sps:$4 sm:$0xff]   ;;  %v1844_v7 = vcombine.low %v236_v47, %v236_v47  ;;  %v1626_v26 = vld [vmem:[%s1770_s25 + $0x288] ss:$16 sps:$4 sm:$0xff]  }
  0x32   : > { %1033 = vmatpush1.bf16.msra.mxu0 %v1539_v27  ;;  %v1573_v54 = vld [vmem:[%s1770_s25 + $0x384] ss:$16 sps:$4 sm:$0xff]   ;;  %v1576_v56 = vld [vmem:[%s1770_s25 + $0x380] ss:$16 sps:$4 sm:$0xff]   ;;  %v1631_v27 = vld [vmem:[%s1770_s25 + $0xac] ss:$16 sps:$4 sm:$0xff]  }
  0x33   : > { %1074 = vmatpush1.bf16.msra.mxu1 %v1540_v28  ;;  %1034 = vmatprep.subr.bf16.mxu0 %v1541_v29  ;;  %v1577_v57 = vld [vmem:[%s1770_s25 + $0x1a4] ss:$16 sps:$4 sm:$0xff]   ;;  %v1581_v59 = vld [vmem:[%s1770_s25 + $0x1a0] ss:$16 sps:$4 sm:$0xff]   ;;  %v1634_v28 = vld [vmem:[%s1770_s25 + $0x2ac] ss:$16 sps:$4 sm:$0xff]  }
  0x34   : > { %1075 = vmatprep.subr.bf16.mxu1 %v1543_v30  ;;  %1052 = vmatprep.mubr.bf16.mxu0 %v1820_v48  ;;  %v1579_v58 = vld [vmem:[%s1770_s25 + $0x3a4] ss:$16 sps:$4 sm:$0xff]   ;;  %v1582_v60 = vld [vmem:[%s1770_s25 + $0x3a0] ss:$16 sps:$4 sm:$0xff]   ;;  %v1629_v29 = vld [vmem:[%s1770_s25 + $0xa8] ss:$16 sps:$4 sm:$0xff]  }
  0x35   : > { %v1583_v61 = vld [vmem:[%s1770_s25 + $0x1c4] ss:$16 sps:$4 sm:$0xff]   ;;  %v1587_v63 = vld [vmem:[%s1770_s25 + $0x1c0] ss:$16 sps:$4 sm:$0xff]   ;;  %v1632_v30 = vld [vmem:[%s1770_s25 + $0x2a8] ss:$16 sps:$4 sm:$0xff]  }
  0x36   : > { %1035 = vmatpush1.bf16.msra.mxu0 %v1545_v31  ;;  %v1585_v62 = vld [vmem:[%s1770_s25 + $0x3c4] ss:$16 sps:$4 sm:$0xff]   ;;  %v1588_v0 = vld [vmem:[%s1770_s25 + $0x3c0] ss:$16 sps:$4 sm:$0xff]   ;;  %v1637_v31 = vld [vmem:[%s1770_s25 + $0xcc] ss:$16 sps:$4 sm:$0xff]  }
  0x37   : > { %1076 = vmatpush1.bf16.msra.mxu1 %v1546_v32  ;;  %1036 = vmatprep.subr.bf16.mxu0 %v1547_v33  ;;  %v1589_v1 = vld [vmem:[%s1770_s25 + $0x1e4] ss:$16 sps:$4 sm:$0xff]   ;;  %v1593_v3 = vld [vmem:[%s1770_s25 + $0x1e0] ss:$16 sps:$4 sm:$0xff]   ;;  %v1640_v32 = vld [vmem:[%s1770_s25 + $0x2cc] ss:$16 sps:$4 sm:$0xff]  }
  0x38   : > { %1077 = vmatprep.subr.bf16.mxu1 %v1549_v34  ;;  %v1591_v2 = vld [vmem:[%s1770_s25 + $0x3e4] ss:$16 sps:$4 sm:$0xff]   ;;  %v1594_v4 = vld [vmem:[%s1770_s25 + $0x3e0] ss:$16 sps:$4 sm:$0xff]   ;;  %v1635_v33 = vld [vmem:[%s1770_s25 + $0xc8] ss:$16 sps:$4 sm:$0xff]  }
  0x39   : > { %v1638_v34 = vld [vmem:[%s1770_s25 + $0x2c8] ss:$16 sps:$4 sm:$0xff]   ;;  %v1661_v47 = vld [vmem:[%s1770_s25 + $0x14c] ss:$16 sps:$4 sm:$0xff]  }
  0x3a   : > { %1037 = vmatpush1.bf16.msra.mxu0 %v1551_v35  ;;  %v1643_v35 = vld [vmem:[%s1770_s25 + $0xec] ss:$16 sps:$4 sm:$0xff]  }
  0x3b   : > { %1078 = vmatpush1.bf16.msra.mxu1 %v1552_v36  ;;  %1038 = vmatprep.subr.bf16.mxu0 %v1553_v37  ;;  %v1646_v36 = vld [vmem:[%s1770_s25 + $0x2ec] ss:$16 sps:$4 sm:$0xff]   ;;  %v1641_v37 = vld [vmem:[%s1770_s25 + $0xe8] ss:$16 sps:$4 sm:$0xff]  }
  0x3c   : > { %1079 = vmatprep.subr.bf16.mxu1 %v1555_v38  ;;  %v1644_v38 = vld [vmem:[%s1770_s25 + $0x2e8] ss:$16 sps:$4 sm:$0xff]  }
  0x3e   : > { %1039 = vmatpush1.bf16.msra.mxu0 %v1557_v39  ;;  %v1649_v39 = vld [vmem:[%s1770_s25 + $0x10c] ss:$16 sps:$4 sm:$0xff]  }
  0x3f   : > { %1080 = vmatpush1.bf16.msra.mxu1 %v1558_v40  ;;  %1040 = vmatprep.subr.bf16.mxu0 %v1559_v41  ;;  %v1652_v40 = vld [vmem:[%s1770_s25 + $0x30c] ss:$16 sps:$4 sm:$0xff]   ;;  %v1647_v41 = vld [vmem:[%s1770_s25 + $0x108] ss:$16 sps:$4 sm:$0xff]  }
  0x40   : > { %1081 = vmatprep.subr.bf16.mxu1 %v1561_v42  ;;  %v1650_v42 = vld [vmem:[%s1770_s25 + $0x308] ss:$16 sps:$4 sm:$0xff]  }
  0x42   : > { %1041 = vmatpush1.bf16.msra.mxu0 %v1563_v43  ;;  %v1655_v43 = vld [vmem:[%s1770_s25 + $0x12c] ss:$16 sps:$4 sm:$0xff]  }
  0x43   : > { %1082 = vmatpush1.bf16.msra.mxu1 %v1564_v44  ;;  %1042 = vmatprep.subr.bf16.mxu0 %v1565_v45  ;;  %v1658_v44 = vld [vmem:[%s1770_s25 + $0x32c] ss:$16 sps:$4 sm:$0xff]   ;;  %v1653_v45 = vld [vmem:[%s1770_s25 + $0x128] ss:$16 sps:$4 sm:$0xff]  }
  0x44   : > { %1083 = vmatprep.subr.bf16.mxu1 %v1567_v46  ;;  %v1656_v46 = vld [vmem:[%s1770_s25 + $0x328] ss:$16 sps:$4 sm:$0xff]  }
  0x46   : > { %1043 = vmatpush1.bf16.msra.mxu0 %v1569_v50  ;;  %v1662_v50 = vld [vmem:[%s1770_s25 + $0x348] ss:$16 sps:$4 sm:$0xff]  }
  0x47   : > { %1084 = vmatpush1.bf16.msra.mxu1 %v1570_v51  ;;  %1044 = vmatprep.subr.bf16.mxu0 %v1571_v53  ;;  %v1667_v51 = vld [vmem:[%s1770_s25 + $0x16c] ss:$16 sps:$4 sm:$0xff]   ;;  %v1665_v53 = vld [vmem:[%s1770_s25 + $0x168] ss:$16 sps:$4 sm:$0xff]  }
  0x48   : > { %1085 = vmatprep.subr.bf16.mxu1 %v1573_v54  ;;  %v1668_v54 = vld [vmem:[%s1770_s25 + $0x368] ss:$16 sps:$4 sm:$0xff]  }
  0x4a   : > { %1045 = vmatpush1.bf16.msra.mxu0 %v1575_v55  ;;  %v1673_v55 = vld [vmem:[%s1770_s25 + $0x18c] ss:$16 sps:$4 sm:$0xff]  }
  0x4b   : > { %1086 = vmatpush1.bf16.msra.mxu1 %v1576_v56  ;;  %1046 = vmatprep.subr.bf16.mxu0 %v1577_v57  ;;  %v1676_v56 = vld [vmem:[%s1770_s25 + $0x38c] ss:$16 sps:$4 sm:$0xff]   ;;  %v1671_v57 = vld [vmem:[%s1770_s25 + $0x188] ss:$16 sps:$4 sm:$0xff]  }
  0x4c   : > { %1087 = vmatprep.subr.bf16.mxu1 %v1579_v58  ;;  %v1674_v58 = vld [vmem:[%s1770_s25 + $0x388] ss:$16 sps:$4 sm:$0xff]  }
  0x4e   : > { %1047 = vmatpush1.bf16.msra.mxu0 %v1581_v59  ;;  %v1679_v59 = vld [vmem:[%s1770_s25 + $0x1ac] ss:$16 sps:$4 sm:$0xff]  }
  0x4f   : > { %1088 = vmatpush1.bf16.msra.mxu1 %v1582_v60  ;;  %1048 = vmatprep.subr.bf16.mxu0 %v1583_v61  ;;  %v1682_v60 = vld [vmem:[%s1770_s25 + $0x3ac] ss:$16 sps:$4 sm:$0xff]   ;;  %v1677_v61 = vld [vmem:[%s1770_s25 + $0x1a8] ss:$16 sps:$4 sm:$0xff]  }
  0x50   : > { %1089 = vmatprep.subr.bf16.mxu1 %v1585_v62  ;;  %v1680_v62 = vld [vmem:[%s1770_s25 + $0x3a8] ss:$16 sps:$4 sm:$0xff]  }
  0x52   : > { %1049 = vmatpush1.bf16.msra.mxu0 %v1587_v63  ;;  %v1685_v63 = vld [vmem:[%s1770_s25 + $0x1cc] ss:$16 sps:$4 sm:$0xff]  }
  0x53   : > { %1090 = vmatpush1.bf16.msra.mxu1 %v1588_v0  ;;  %1050 = vmatprep.subr.bf16.mxu0 %v1589_v1  ;;  %v1688_v0 = vld [vmem:[%s1770_s25 + $0x3cc] ss:$16 sps:$4 sm:$0xff]   ;;  %v1683_v1 = vld [vmem:[%s1770_s25 + $0x1c8] ss:$16 sps:$4 sm:$0xff]  }
  0x54   : > { %1091 = vmatprep.subr.bf16.mxu1 %v1591_v2  ;;  %v1686_v2 = vld [vmem:[%s1770_s25 + $0x3c8] ss:$16 sps:$4 sm:$0xff]  }
  0x56   : > { %1051 = vmatpush1.bf16.msra.mxu0 %v1593_v3  ;;  %v1691_v3 = vld [vmem:[%s1770_s25 + $0x1ec] ss:$16 sps:$4 sm:$0xff]  }
  0x57   : > { %1092 = vmatpush1.bf16.msra.mxu1 %v1594_v4  ;;  %1102 = vmatprep.subr.bf16.mxu0 %v1601_v5  ;;  %v1694_v4 = vld [vmem:[%s1770_s25 + $0x3ec] ss:$16 sps:$4 sm:$0xff]   ;;  %v1689_v5 = vld [vmem:[%s1770_s25 + $0x1e8] ss:$16 sps:$4 sm:$0xff]  }
  0x58   : > { %1143 = vmatprep.subr.bf16.mxu1 %v1604_v6  ;;  %v1692_v6 = vld [vmem:[%s1770_s25 + $0x3e8] ss:$16 sps:$4 sm:$0xff]  }
  0x59   : > { %1053 = vmatmul.mubr.bf16.vlgmr.msra.gmra.mrb[0].mxu0 %v1844_v7 }
  0x5a   : > { %1094 = vmatmul.mubr.bf16.vlgmr.msra.gmra.mrb[0].mxu1 %v1846_v8  ;;  %1103 = vmatpush1.bf16.msra.mxu0 %v1599_v9 }
  0x5b   : > { %1144 = vmatpush1.bf16.msra.mxu1 %v1602_v10  ;;  %1104 = vmatprep.subr.bf16.mxu0 %v1607_v11  ;;  %v232_v10 = vld [vmem:[#allocation2] sm:$0xff] }
  0x5c   : > { %1145 = vmatprep.subr.bf16.mxu1 %v1610_v12  ;;  %1134 = vmatprep.mubr.bf16.mxu0 %v1820_v48  ;;  %v1664_v48 = vld [vmem:[%s1770_s25 + $0x34c] ss:$16 sps:$4 sm:$0xff]  }
  0x5d   : > { %1175 = vmatprep.mubr.bf16.mxu1 %v1336_v52  ;;  %v1670_v52 = vld [vmem:[%s1770_s25 + $0x36c] ss:$16 sps:$4 sm:$0xff]  }
  0x5e   : > { %1105 = vmatpush1.bf16.msra.mxu0 %v1605_v13 }
  0x5f   : > { %1146 = vmatpush1.bf16.msra.mxu1 %v1608_v14  ;;  %1106 = vmatprep.subr.bf16.mxu0 %v1613_v15  ;;  %v233_v14 = vld [vmem:[#allocation2 + $0x8] sm:$0xff] }
  0x60   : > { %1147 = vmatprep.subr.bf16.mxu1 %v1616_v16 }
  0x62   : > { %1107 = vmatpush1.bf16.msra.mxu0 %v1611_v17 }
  0x63   : > { %1148 = vmatpush1.bf16.msra.mxu1 %v1614_v18  ;;  %1108 = vmatprep.subr.bf16.mxu0 %v1619_v19 }
  0x64   : > { %1149 = vmatprep.subr.bf16.mxu1 %v1622_v20 }
  0x66   : > { %1109 = vmatpush1.bf16.msra.mxu0 %v1617_v21 }
  0x67   : > { %1150 = vmatpush1.bf16.msra.mxu1 %v1620_v22  ;;  %1110 = vmatprep.subr.bf16.mxu0 %v1625_v23 }
  0x68   : > { %1151 = vmatprep.subr.bf16.mxu1 %v1628_v24 }
  0x6a   : > { %1111 = vmatpush1.bf16.msra.mxu0 %v1623_v25 }
  0x6b   : > { %1152 = vmatpush1.bf16.msra.mxu1 %v1626_v26  ;;  %1112 = vmatprep.subr.bf16.mxu0 %v1631_v27  ;;  %v235_v26 = vld [vmem:[#allocation2 + $0x18] sm:$0xff] }
  0x6c   : > { %1153 = vmatprep.subr.bf16.mxu1 %v1634_v28 }
  0x6e   : > { %1113 = vmatpush1.bf16.msra.mxu0 %v1629_v29 }
  0x6f   : > { %1154 = vmatpush1.bf16.msra.mxu1 %v1632_v30  ;;  %1114 = vmatprep.subr.bf16.mxu0 %v1637_v31 }
  0x70   : > { %1155 = vmatprep.subr.bf16.mxu1 %v1640_v32 }
  0x72   : > { %1115 = vmatpush1.bf16.msra.mxu0 %v1635_v33 }
  0x73   : > { %1156 = vmatpush1.bf16.msra.mxu1 %v1638_v34  ;;  %1116 = vmatprep.subr.bf16.mxu0 %v1643_v35  ;;  %v1202_v35 = vlaneseq (!%p1465_p7) }
  0x74   : > { %1157 = vmatprep.subr.bf16.mxu1 %v1646_v36 }
  0x75   : > { %v1203_v36 = vshrl.u32 (!%p1465_p7), %v1202_v35, 7 }
  0x76   : > { %1117 = vmatpush1.bf16.msra.mxu0 %v1641_v37  ;;  %v1200_v37 = vld [vmem:[%s1936_s2] sm:$0xf] (!%p1465_p7) }
  0x77   : > { %1158 = vmatpush1.bf16.msra.mxu1 %v1644_v38  ;;  %1118 = vmatprep.subr.bf16.mxu0 %v1649_v39  ;;  %v1204_v39 = vsub.s32 (!%p1465_p7), 0, %v1203_v36 }
  0x78   : > { %1159 = vmatprep.subr.bf16.mxu1 %v1652_v40  ;;  %v1208_v40 = vsub.s32 (!%p1465_p7), 1, %v1203_v36 }
  0x7a   : > { %1119 = vmatpush1.bf16.msra.mxu0 %v1647_v41  ;;  %v1212_v41 = vsub.s32 (!%p1465_p7), 2, %v1203_v36 }
  0x7b   : > { %1160 = vmatpush1.bf16.msra.mxu1 %v1650_v42  ;;  %1120 = vmatprep.subr.bf16.mxu0 %v1655_v43  ;;  %v1216_v42 = vsub.s32 (!%p1465_p7), 3, %v1203_v36 }
  0x7c   : > { %1161 = vmatprep.subr.bf16.mxu1 %v1658_v44 }
  0x7e   : > { %1121 = vmatpush1.bf16.msra.mxu0 %v1653_v45 }
  0x7f   : > { %1162 = vmatpush1.bf16.msra.mxu1 %v1656_v46  ;;  %1122 = vmatprep.subr.bf16.mxu0 %v1661_v47  ;;  %v1205_v46 = vrot.slane (!%p1465_p7), %v1200_v37, %v1204_v39  ;;  %v1209_v47 = vrot.slane (!%p1465_p7), %v1200_v37, %v1208_v40 }
  0x80   : > { %1163 = vmatprep.subr.bf16.mxu1 %v1664_v48  ;;  %v1213_v48 = vrot.slane (!%p1465_p7), %v1200_v37, %v1212_v41 }
  0x82   : > { %1123 = vmatpush1.bf16.msra.mxu0 %v1659_v49  ;;  %v1217_v49 = vrot.slane (!%p1465_p7), %v1200_v37, %v1216_v42 }
  0x83   : > { %1164 = vmatpush1.bf16.msra.mxu1 %v1662_v50  ;;  %1124 = vmatprep.subr.bf16.mxu0 %v1667_v51 }
  0x84   : > { %1165 = vmatprep.subr.bf16.mxu1 %v1670_v52 }
  0x86   : > { %1125 = vmatpush1.bf16.msra.mxu0 %v1665_v53 }
  0x87   : > { %1166 = vmatpush1.bf16.msra.mxu1 %v1668_v54  ;;  %1126 = vmatprep.subr.bf16.mxu0 %v1673_v55 }
  0x88   : > { %1167 = vmatprep.subr.bf16.mxu1 %v1676_v56 }
  0x8a   : > { %1127 = vmatpush1.bf16.msra.mxu0 %v1671_v57 }
  0x8b   : > { %1168 = vmatpush1.bf16.msra.mxu1 %v1674_v58  ;;  %1128 = vmatprep.subr.bf16.mxu0 %v1679_v59 }
  0x8c   : > { %1169 = vmatprep.subr.bf16.mxu1 %v1682_v60 }
  0x8e   : > { %1129 = vmatpush1.bf16.msra.mxu0 %v1677_v61 }
  0x8f   : > { %1170 = vmatpush1.bf16.msra.mxu1 %v1680_v62  ;;  %1130 = vmatprep.subr.bf16.mxu0 %v1685_v63 }
  0x90   : > { %1171 = vmatprep.subr.bf16.mxu1 %v1688_v0 }
  0x92   : > { %1131 = vmatpush1.bf16.msra.mxu0 %v1683_v1 }
  0x93   : > { %1172 = vmatpush1.bf16.msra.mxu1 %v1686_v2  ;;  %1132 = vmatprep.subr.bf16.mxu0 %v1691_v3 }
  0x94   : > { %1173 = vmatprep.subr.bf16.mxu1 %v1694_v4 }
  0x96   : > { %1133 = vmatpush1.bf16.msra.mxu0 %v1689_v5 }
  0x97   : > { %1174 = vmatpush1.bf16.msra.mxu1 %v1692_v6 }
  0x99   : > { %1135 = vmatmul.mubr.bf16.vlgmr.msra.gmra.mrb[4].mxu0 %v1844_v7  ;;  %v234_v7 = vld [vmem:[#allocation2 + $0x10] sm:$0xff] }
  0x9a   : > { %1176 = vmatmul.mubr.bf16.vlgmr.msra.gmra.mrb[4].mxu1 %v1846_v8 }
 0x12c   : > { %v1054_v9 = vpop.f32.mrb[0].mxu0 }
 0x12d   : > { %v1095_v11 = vpop.f32.mrb[0].mxu1  ;;  %v1056_v13 = vpop.f32.mrb[1].mxu0 }
 0x12e   : > { %v1096_v12 = vadd.f32 %v1095_v11, %v1054_v9  ;;  %v1097_v15 = vpop.f32.mrb[1].mxu1  ;;  %v1058_v17 = vpop.f32.mrb[2].mxu0 }
 0x12f   : > { %v1098_v16 = vadd.f32 %v1097_v15, %v1056_v13  ;;  %v1099_v18 = vpop.f32.mrb[2].mxu1  ;;  %v1059_v20 = vpop.f32.mrb[3].mxu0 }
 0x130   : > { %v1184_v19 = vadd.f32 %v1096_v12, %v232_v10  ;;  %v1100_v21 = vpop.f32.mrb[3].mxu1 }
 0x131   : > { %v1185_v22 = vadd.f32 %v1098_v16, %v233_v14 }
 0x132   : > { %1188 = vst [vmem:[#allocation2] sm:$0xff] %v1184_v19 }
 0x133   : > { %1189 = vst [vmem:[#allocation2 + $0x8] sm:$0xff] %v1185_v22 }
 0x139   : > { %v1196_v38 = vld [vmem:[#allocation2] sm:$0xff] (!%p1465_p7) }
 0x13a   : > { %v1197_v43 = vld [vmem:[#allocation2 + $0x8] sm:$0xff] (!%p1465_p7)  ;;  %v1222_v50 = vadd.f32 (!%p1465_p7), %v1205_v46, %v1196_v38 }
 0x13b   : > { %v1223_v51 = vadd.f32 (!%p1465_p7), %v1209_v47, %v1197_v43 }
 0x13d   : > { %v1472_v54 = vpack.c.bf16 (!%p1465_p7), %v1223_v51, %v1222_v50 }
 0x13f   : > { %1242 = vst [vmem:[%s1937_s3] sm:$0xff] (!%p1465_p7), %v1472_v54 }
 0x16c   : > { %v1136_v23 = vpop.f32.mrb[4].mxu0 }
 0x16d   : > { %v1177_v24 = vpop.f32.mrb[4].mxu1  ;;  %v1138_v25 = vpop.f32.mrb[5].mxu0  ;;  %1195 = sbr.rel (%p1465_p7) target bundleno = 384 (0x180), region = 40 }
 0x16e   : > { %v1178_v8 = vadd.f32 %v1177_v24, %v1136_v23  ;;  %v1179_v27 = vpop.f32.mrb[5].mxu1  ;;  %v1140_v29 = vpop.f32.mrb[6].mxu0 }
 0x16f   : > { %v1180_v28 = vadd.f32 %v1179_v27, %v1138_v25  ;;  %v1181_v30 = vpop.f32.mrb[6].mxu1  ;;  %v1141_v32 = vpop.f32.mrb[7].mxu0 }
 0x170   : > { %v1186_v31 = vadd.f32 %v1178_v8, %v234_v7  ;;  %v1182_v33 = vpop.f32.mrb[7].mxu1 }
 0x171   : > { %v1187_v34 = vadd.f32 %v1180_v28, %v235_v26 }
 0x172   : > { %1190 = vst [vmem:[#allocation2 + $0x10] sm:$0xff] %v1186_v31 }
 0x173   : > { %1191 = vst [vmem:[#allocation2 + $0x18] sm:$0xff] %v1187_v34 }
 0x179   : > { %v1198_v44 = vld [vmem:[#allocation2 + $0x10] sm:$0xff] }
 0x17a   : > { %v1199_v45 = vld [vmem:[#allocation2 + $0x18] sm:$0xff]  ;;  %v1224_v52 = vadd.f32 %v1213_v48, %v1198_v44 }
 0x17b   : > { %v1225_v53 = vadd.f32 %v1217_v49, %v1199_v45 }
 0x17d   : > { %v1473_v55 = vpack.c.bf16 %v1225_v53, %v1224_v52 }
 0x17f   : > { %1243 = vst [vmem:[%s1937_s3 + $0x8] sm:$0xff] %v1473_v55 }
 0x180 PF: > { %s13_s14 = sadd.s32 1, %s1717_s14   ;;  %s1938_s12 = smov %s1713_s13 }
 0x181   : > { %p10_p8 = scmp.ge.s32.totalorder %s13_s14, 10   ;;  %s1939_s13 = smov %s1941_s15 }
 0x183   :  { %12 = sbr.rel (!%p10_p8) target bundleno = 2 (0x2), region = 73 }

// kernel: _lambda_.15
= control target key start
LH: loop header
LB: loop body
LE: loop exit
PB: predicated region body
PF: predicated region fallthrough
CT: control target
= control target key end

     0   :  { %s1165_s12 = smov 0   ;;  %s1167_s13 = smov 0   ;;  %s1282_s0 = inlined_call_operand.vmem [shape: bf16[2,8192], index: 0, kind: input, shape index: {}]   ;;  %s1283_s1 = inlined_call_operand.vmem [shape: bf16[8192,128], index: 1, kind: input, shape index: {}]   ;;  %s1284_s2 = inlined_call_operand.vmem [shape: f32[1,128], index: 2, kind: input, shape index: {}]   ;;  %s1285_s3 = inlined_call_operand.vmem [shape: f32[2,128], index: 3, kind: output, shape index: {}]  }
   0x1   :  { %s1169_s14 = smov 0   ;;  %s1171_s15 = smov 0  }
   0x2   :  { %s1173_s16 = smov 0  }
   0x3 LB: > { %s826_s17 = sadd.s32 4294967295, %s1133_s16   ;;  %s22_s18 = sadd.s32 1, %s1129_s15  ;;  %s1133_s16 = sphi %s1173_s16, %s13_s16   ;;  %s1129_s15 = sphi %s1171_s15, %s1289_s15   ;;  %s1125_s14 = sphi %s1169_s14, %s1288_s14   ;;  %s1121_s13 = sphi %s1167_s13, %s1287_s13   ;;  %s1117_s12 = sphi %s1165_s12, %s1286_s12  }
   0x4   : > { %p23_p0 = scmp.ge.s32.totalorder %s22_s18, 16  ;;  %p41_p1 = scmp.ne.s32.totalorder %s1121_s13, %s1117_s12 }
   0x5   : > { %p42_p2 = scmp.eq.s32.totalorder %s1133_s16, 0  ;;  %s34_s20 = sadd.s32 1, %s1121_s13 }
   0x6   : > { %s1291_s18 = smov (%p23_p0, %s22_s18), 0  ;;  %p828_p5 = scmp.ge.s32.totalorder %s1133_s16, 16 }
   0x7   : > { %p43_p3 = por %p42_p2, %p41_p1  ;;  %s30_s19 = ssub.s32 %s1129_s15, %s1291_s18 }
   0x8   : > { %p32_p4 = scmp.eq.s32.totalorder %s30_s19, 0  ;;  %143 = sbr.rel (%p828_p5) target bundleno = 32 (0x20), region = 20 }
   0xa   : > { %s1201_s21 = scalar_select %p32_p4, %s1121_s13, %s34_s20  }
   0xf   : > { %146 = sbr.rel (!%p43_p3) target bundleno = 32 (0x20), region = 24  ;;  %s148_s22 = sand.u32 (%p43_p3), 1, %s1121_s13  }
  0x10   : > { %s830_s23 = sshll.u32 (%p43_p3), %s1129_s15, 2  ;;  %s829_s24 = sshll.u32 (%p43_p3), %s148_s22, 4 }
  0x11   : > { %s159_s27 = scalar_lea.vmem (%p43_p3), %s1282_s0, %s830_s23   ;;  %s150_s28 = scalar_lea.vmem (%p43_p3), [#allocation3], %s829_s24  }
  0x12   : > { %s1135_s29 = smov (%p43_p3), 0  }
  0x16 LB: >> { %v177_v0 = vld [vmem:[%s159_s27] sm:$0xf]  ;;  %s171_s29 = sadd.s32 1, %s1137_s29   ;;  %s1137_s29 = sphi %s1135_s29, %s171_s29  }
  0x17   : >> { %178 = vst [vmem:[%s150_s28] sm:$0xf] %v177_v0  ;;  %p170_p6 = scmp.ge.s32.totalorder %s171_s29, 1 }
  0x19   : > { %173 = sbr.rel (!%p170_p6) target bundleno = 22 (0x16), region = 143 }
  0x20 PF: > { %p833_p7 = scmp.ge.s32.totalorder %s1133_s16, 1  ;;  %p218_p8 = scmp.lt.s32.totalorder %s1133_s16, 17 }
  0x22   : > { %p219_p9 = pnand %p833_p7, %p218_p8 }
  0x23   : > { %s225_s30 = sand.u32 (!%p219_p9), 1, %s1117_s12   ;;  %s835_s4 = sshll.u32 (!%p219_p9), %s1125_s14, 6 }
  0x24   : > { %222 = sbr.rel (%p219_p9) target bundleno = 334 (0x14e), region = 62  ;;  %s1213_s5 = sshll.u32 (!%p219_p9), %s225_s30, 4 }
  0x25   : > { %p254_p10 = scmp.lt.s32.totalorder (!%p219_p9), %s835_s4, 1023  ;;  %s227_s10 = scalar_lea.vmem (!%p219_p9), [#allocation3], %s1213_s5 }
  0x26   : > { %p837_p11 = scmp.ne.s32.totalorder (!%p219_p9), %s1125_s14, 0 }
  0x2b   : > { %s1293_s4 = smov (!%p254_p10, %s835_s4), 1023  ;;  %266 = sbr.rel (%p837_p11) target bundleno = 50 (0x32), region = 70 }
  0x2c   : > { %s836_s6 = sshll.u32 %s1293_s4, 2  ;;  %v1143_v1 = vmov (!%p837_p11), 0.0  }
  0x2d   : > { %s1218_s9 = scalar_lea.vmem %s1283_s1, %s836_s6  ;;  %267 = vst [vmem:[#allocation2] sm:$0xff] (!%p837_p11), %v1143_v1 }
  0x32 PF: > { %v1027_v2 = vld [vmem:[%s1218_s9 + $0x40] sm:$0xff]   ;;  %v1031_v6 = vld [vmem:[%s1218_s9 + $0x48] sm:$0xff]   ;;  %v1035_v10 = vld [vmem:[%s1218_s9 + $0x50] sm:$0xff]   ;;  %v346_v33 = vlaneseq  ;;  %v1144_v35 = vmov 1966171168   ;;  %p870_p12 = scmp.ne.s32.totalorder %s1125_s14, 15 }
  0x33   : > { %v1028_v3 = vld [vmem:[%s1218_s9 + $0xc0] sm:$0xff]   ;;  %877 = vmatprep.subr.bf16.mxu0 %v1027_v2  ;;  %v1032_v7 = vld [vmem:[%s1218_s9 + $0xc8] sm:$0xff]   ;;  %v1036_v11 = vld [vmem:[%s1218_s9 + $0xd0] sm:$0xff]   ;;  %v344_v36 = vunpack.c.l.s4 %v1144_v35 }
  0x34   : > { %v1029_v4 = vld [vmem:[%s1218_s9] sm:$0xff]   ;;  %899 = vmatprep.subr.bf16.mxu1 %v1028_v3  ;;  %v1033_v8 = vld [vmem:[%s1218_s9 + $0x8] sm:$0xff]   ;;  %v1037_v12 = vld [vmem:[%s1218_s9 + $0x10] sm:$0xff]   ;;  %v347_v37 = vshrl.u32 %v346_v33, 7 }
  0x35   : > { %v1030_v5 = vld [vmem:[%s1218_s9 + $0x80] sm:$0xff]   ;;  %878 = vmatpush3.bf16.msra.mxu0 %v1029_v4  ;;  %v1034_v9 = vld [vmem:[%s1218_s9 + $0x88] sm:$0xff]   ;;  %v1038_v13 = vld [vmem:[%s1218_s9 + $0x90] sm:$0xff]   ;;  %v345_v40 = vunpack.c.0.s8 %v344_v36 }
  0x36   : > { %900 = vmatpush3.bf16.msra.mxu1 %v1030_v5  ;;  %879 = vmatprep.subr.bf16.mxu0 %v1031_v6  ;;  %v1039_v14 = vld [vmem:[%s1218_s9 + $0x58] sm:$0xff]   ;;  %v1043_v18 = vld [vmem:[%s1218_s9 + $0x60] sm:$0xff]   ;;  %v1047_v22 = vld [vmem:[%s1218_s9 + $0x68] sm:$0xff]  }
  0x37   : > { %901 = vmatprep.subr.bf16.mxu1 %v1032_v7  ;;  %v1040_v15 = vld [vmem:[%s1218_s9 + $0xd8] sm:$0xff]   ;;  %v1044_v19 = vld [vmem:[%s1218_s9 + $0xe0] sm:$0xff]   ;;  %v1048_v23 = vld [vmem:[%s1218_s9 + $0xe8] sm:$0xff]   ;;  %v348_v41 = vsub.s32 %v345_v40, %v347_v37 }
  0x38   : > { %v1041_v16 = vld [vmem:[%s1218_s9 + $0x18] sm:$0xff]   ;;  %v1045_v20 = vld [vmem:[%s1218_s9 + $0x20] sm:$0xff]   ;;  %v1049_v24 = vld [vmem:[%s1218_s9 + $0x28] sm:$0xff]  }
  0x39   : > { %880 = vmatpush3.bf16.msra.mxu0 %v1033_v8  ;;  %v1042_v17 = vld [vmem:[%s1218_s9 + $0x98] sm:$0xff]   ;;  %v1046_v21 = vld [vmem:[%s1218_s9 + $0xa0] sm:$0xff]   ;;  %v1050_v25 = vld [vmem:[%s1218_s9 + $0xa8] sm:$0xff]  }
  0x3a   : > { %902 = vmatpush3.bf16.msra.mxu1 %v1034_v9  ;;  %881 = vmatprep.subr.bf16.mxu0 %v1035_v10  ;;  %v1051_v26 = vld [vmem:[%s1218_s9 + $0x70] sm:$0xff]   ;;  %v1055_v30 = vld [vmem:[%s1218_s9 + $0x78] sm:$0xff]   ;;  %v268_v57 = vld [vmem:[#allocation2] sm:$0xff] }
  0x3b   : > { %903 = vmatprep.subr.bf16.mxu1 %v1036_v11  ;;  %v1052_v27 = vld [vmem:[%s1218_s9 + $0xf0] sm:$0xff]   ;;  %v1056_v31 = vld [vmem:[%s1218_s9 + $0xf8] sm:$0xff]   ;;  %v871_v62 = vld [vmem:[%s1284_s2] ss:$0 sm:$0xff] (!%p870_p12) }
  0x3c   : > { %v1053_v28 = vld [vmem:[%s1218_s9 + $0x30] sm:$0xff]   ;;  %v1057_v32 = vld [vmem:[%s1218_s9 + $0x38] sm:$0xff]  }
  0x3d   : > { %882 = vmatpush3.bf16.msra.mxu0 %v1037_v12  ;;  %v1054_v29 = vld [vmem:[%s1218_s9 + $0xb0] sm:$0xff]   ;;  %v1058_v34 = vld [vmem:[%s1218_s9 + $0xb8] sm:$0xff]  }
  0x3e   : > { %904 = vmatpush3.bf16.msra.mxu1 %v1038_v13  ;;  %883 = vmatprep.subr.bf16.mxu0 %v1039_v14  ;;  %v1061_v38 = vld.sshfl [vmem:[%s227_s10] sm:$0xff pattern:$0x75316420]  ;;  %v1062_v39 = vld.sshfl [vmem:[%s227_s10 + $0x8] sm:$0xff pattern:$0x75316420] }
  0x3f   : > { %905 = vmatprep.subr.bf16.mxu1 %v1040_v15  ;;  %v358_v42 = vcombine.high %v1061_v38, %v1062_v39  ;;  %v357_v43 = vcombine.low %v1061_v38, %v1062_v39 }
  0x41   : > { %884 = vmatpush3.bf16.msra.mxu0 %v1041_v16  ;;  %v372_v44 = vrot.slane %v358_v42, %v348_v41  ;;  %v365_v45 = vrot.slane %v357_v43, %v348_v41 }
  0x42   : > { %906 = vmatpush3.bf16.msra.mxu1 %v1042_v17  ;;  %885 = vmatprep.subr.bf16.mxu0 %v1043_v18 }
  0x43   : > { %907 = vmatprep.subr.bf16.mxu1 %v1044_v19  ;;  %603 = vmatprep.mubr.bf16.mxu0 %v372_v44  ;;  %v374_v46 = vcombine.high %v372_v44, %v372_v44  ;;  %v373_v47 = vcombine.high %v365_v45, %v365_v45 }
  0x45   : > { %886 = vmatpush3.bf16.msra.mxu0 %v1045_v20  ;;  %643 = vmatprep.mubr.bf16.mxu1 %v374_v46 }
  0x46   : > { %908 = vmatpush3.bf16.msra.mxu1 %v1046_v21  ;;  %887 = vmatprep.subr.bf16.mxu0 %v1047_v22 }
  0x47   : > { %909 = vmatprep.subr.bf16.mxu1 %v1048_v23 }
  0x49   : > { %888 = vmatpush3.bf16.msra.mxu0 %v1049_v24 }
  0x4a   : > { %910 = vmatpush3.bf16.msra.mxu1 %v1050_v25  ;;  %889 = vmatprep.subr.bf16.mxu0 %v1051_v26 }
  0x4b   : > { %911 = vmatprep.subr.bf16.mxu1 %v1052_v27 }
  0x4d   : > { %890 = vmatpush3.bf16.msra.mxu0 %v1053_v28 }
  0x4e   : > { %912 = vmatpush3.bf16.msra.mxu1 %v1054_v29  ;;  %891 = vmatprep.subr.bf16.mxu0 %v1055_v30 }
  0x4f   : > { %913 = vmatprep.subr.bf16.mxu1 %v1056_v31 }
  0x51   : > { %892 = vmatpush3.bf16.msra.mxu0 %v1057_v32 }
  0x52   : > { %914 = vmatpush3.bf16.msra.mxu1 %v1058_v34 }
  0x54   : > { %604 = vmatmul.mubr.bf16.vlgmr.msra.gmra.mrb[0].mxu0 %v365_v45 }
  0x55   : > { %644 = vmatmul.mubr.bf16.vlgmr.msra.gmra.mrb[0].mxu1 %v373_v47 }
 0x127   : > { %v893_v48 = vpop.f32.mrb[0].mxu0 }
 0x128   : > { %v894_v49 = vpop.f32.mrb[1].mxu0  ;;  %v915_v50 = vpop.f32.mrb[0].mxu1 }
 0x129   : > { %v895_v51 = vadd.f32 %v894_v49, %v893_v48  ;;  %v896_v52 = vpop.f32.mrb[2].mxu0  ;;  %v916_v53 = vpop.f32.mrb[1].mxu1 }
 0x12a   : > { %v897_v54 = vpop.f32.mrb[3].mxu0  ;;  %v917_v55 = vadd.f32 %v916_v53, %v915_v50  ;;  %v918_v56 = vpop.f32.mrb[2].mxu1  ;;  %656 = sbr.rel (%p870_p12) target bundleno = 315 (0x13b), region = 74 }
 0x12b   : > { %v919_v58 = vpop.f32.mrb[3].mxu1 }
 0x12c   : > { %v646_v59 = vadd.f32 %v917_v55, %v895_v51 }
 0x12e   : > { %v651_v60 = vadd.f32 %v646_v59, %v268_v57 }
 0x130   : > { %652 = vst [vmem:[#allocation2] sm:$0xff] %v651_v60 }
 0x137   : > { %v657_v61 = vld [vmem:[#allocation2] sm:$0xff] }
 0x138   : > { %v665_v63 = vadd.f32 %v871_v62, %v657_v61 }
 0x13a   : > { %666 = vst [vmem:[#allocation4] sm:$0xff] %v665_v63 }
 0x13b PF: > { %p872_p13 = scmp.ne.s32.totalorder %s826_s17, 15 }
 0x13c   : > { %s1139_s19 = smov (!%p872_p13), 0  }
 0x13d   : > { %669 = sbr.rel (%p872_p13) target bundleno = 334 (0x14e), region = 78 }
 0x144 LB: >> { %v693_v0 = vld [vmem:[#allocation4] sm:$0x3]  ;;  %s687_s19 = sadd.s32 1, %s1141_s19   ;;  %s1141_s19 = sphi %s1139_s19, %s687_s19  }
 0x145   : >> { %694 = vst [vmem:[%s1285_s3] sm:$0x3] %v693_v0  ;;  %p686_p0 = scmp.ge.s32.totalorder %s687_s19, 1 }
 0x147   : > { %689 = sbr.rel (!%p686_p0) target bundleno = 324 (0x144), region = 154 }
 0x14e PF: > { %s13_s16 = sadd.s32 1, %s1133_s16   ;;  %s1286_s12 = smov %s1121_s13 }
 0x14f   : > { %p10_p1 = scmp.ge.s32.totalorder %s13_s16, 18   ;;  %s1287_s13 = smov %s1201_s21 }
 0x150   : > { %s1288_s14 = smov %s1129_s15  ;;  %s1289_s15 = smov %s1291_s18 }
 0x151   :  { %12 = sbr.rel (!%p10_p1) target bundleno = 3 (0x3), region = 165 }

</bundles_post_ra>
